<compile_context>
chip_gen: v5e
topology: v5e:2x2
jax: 0.10.0
libtpu: 0.0.40
codegen_flags: <defaults>
</compile_context>

<pallas_src>
import functools

import jax
import jax.numpy as jnp
import numpy as np
from jax.experimental import pallas as pl
from jax.experimental.pallas import tpu as pltpu

H = 32
W = 32
SUB = 8      # sublane dim of the lane-dense slab
LANE = 128   # lane dim  (SUB*LANE == H*W)
EPS = 1e-8

# vx/vy bit tricks and the clamp bounds hard-code a 32x32 power-of-two grid.
assert H == 32 and W == 32 and H * W == SUB * LANE and (W & (W - 1)) == 0


def _recip(x):
    """EUP approximate reciprocal + one Newton step (~f32 accuracy)."""
    r = pl.reciprocal(x, approx=True)
    return r * (2.0 - x * r)


def _mls_kernel(p_ref, q_ref, trans_ref, ptwp_ref, w_ref, phatw_ref, qhat_ref,
                *, block_b, ctrls):
    """One block of `block_b` batch elements per grid step.

    p_ref / q_ref: flattened 1-D (Bpad*2*ctrls,) control-point tables in SMEM,
    laid out [batch, ctrl, coord] with coord 0 = x (columns already swapped
    and int16-truncated by the wrapper).  All vector work is on lane-dense
    (8,128) slabs of the flattened 32x32 grid.
    """
    g = pl.program_id(0)
    f32 = jnp.float32

    # flat pixel index over the (8,128) slab: idx = row*32 + col of the image
    idx = (jax.lax.broadcasted_iota(jnp.int32, (SUB, LANE), 0) * LANE
           + jax.lax.broadcasted_iota(jnp.int32, (SUB, LANE), 1))
    vx = (idx & (W - 1)).astype(f32)    # column (x)
    vy = (idx >> 5).astype(f32)         # row    (y)   (W == 32)
    zero = jnp.zeros((SUB, LANE), f32)

    # Keep per-control vregs live across passes only when they fit the 64-vreg
    # budget; otherwise stage the unnormalized weights through w_ref.
    keep_live = ctrls <= 16

    for bb in range(block_b):
        base = (g * block_b + bb) * (2 * ctrls)

        # ---- pass A: unnormalized weights + weighted sums ----------------
        wsum = zero
        sx = zero     # sum_i w_un_i * (px_i - vx)
        sy = zero
        qsx = zero    # sum_i w_un_i * qx_i
        qsy = zero
        w_un = []
        qxs = []
        qys = []
        for i in range(ctrls):
            px = p_ref[base + 2 * i]
            py = p_ref[base + 2 * i + 1]
            qx = q_ref[base + 2 * i]
            qy = q_ref[base + 2 * i + 1]
            qxs.append(qx)
            qys.append(qy)
            dx = px - vx
            dy = py - vy
            wu = _recip(dx * dx + dy * dy + EPS)     # alpha = 1.0
            if keep_live:
                w_un.append(wu)                       # stays in a vreg
            else:
                w_ref[bb, i] = wu                     # stage unnormalized
            wsum = wsum + wu
            sx = sx + wu * dx
            sy = sy + wu * dy
            qsx = qsx + wu * qx
            qsy = qsy + wu * qy

        inv_wsum = _recip(wsum)
        pstar_x = vx + sx * inv_wsum
        pstar_y = vy + sy * inv_wsum
        qstar_x = qsx * inv_wsum
        qstar_y = qsy * inv_wsum

        # ---- qhat: only depends on qstar, store it outside pass B --------
        qhx = []
        qhy = []
        for i in range(ctrls):
            hx = qxs[i] - qstar_x
            hy = qys[i] - qstar_y
            qhat_ref[bb, 2 * i] = hx
            qhat_ref[bb, 2 * i + 1] = hy
            if keep_live:
                qhx.append(hx)
                qhy.append(hy)

        # ---- pass B: normalized w, w*phat, fused reductions ---------------
        a = zero      # pTwp[0,0]
        bsym = zero   # pTwp[0,1] == pTwp[1,0]
        d = zero      # pTwp[1,1]
        sxx = zero    # sum_i (w_i*phx_i) * qhx_i
        syx = zero    # sum_i (w_i*phy_i) * qhx_i
        sxy = zero    # sum_i (w_i*phx_i) * qhy_i
        syy = zero    # sum_i (w_i*phy_i) * qhy_i
        # TODO(synk): for ctrls >~ 64-128 these reductions should become
        # (1024 x ctrls) MXU matmuls instead of the O(ctrls) VPU loop.
        for i in range(ctrls):
            px = p_ref[base + 2 * i]
            py = p_ref[base + 2 * i + 1]
            wu = w_un[i] if keep_live else w_ref[bb, i]
            w_i = wu * inv_wsum
            w_ref[bb, i] = w_i                        # final normalized weight
            hx = px - pstar_x
            hy = py - pstar_y
            wphx = w_i * hx                           # torch's returned "phat" = w*phat
            wphy = w_i * hy
            phatw_ref[bb, 2 * i] = wphx
            phatw_ref[bb, 2 * i + 1] = wphy
            if keep_live:
                cqx = qhx[i]
                cqy = qhy[i]
            else:
                cqx = q_ref[base + 2 * i] - qstar_x
                cqy = q_ref[base + 2 * i + 1] - qstar_y
            a = a + hx * wphx
            bsym = bsym + hx * wphy
            d = d + hy * wphy
            sxx = sxx + wphx * cqx
            syx = syx + wphy * cqx
            sxy = sxy + wphx * cqy
            syy = syy + wphy * cqy

        # ---- closed-form 2x2 inverse (replaces torch.linalg.inv) ----------
        inv_det = _recip(a * d - bsym * bsym)         # EUP + Newton step
        mlx = vx - pstar_x
        mly = vy - pstar_y
        B0 = (mlx * d - mly * bsym) * inv_det         # (v-pstar) @ inv(pTwp)
        B1 = (mly * a - mlx * bsym) * inv_det

        # trans = sum_i A_i * qhat_i + qstar, with A_i = B0*wphx_i + B1*wphy_i,
        # regrouped as B0*S.. + B1*S..  (no third pass needed)
        tx = B0 * sxx + B1 * syx + qstar_x
        ty = B0 * sxy + B1 * syy + qstar_y

        # fused clamp: keep t only when 0 <= t <= grid-1, else 0
        tx = jnp.where((tx >= 0.0) & (tx <= float(H - 1)), tx, 0.0)
        ty = jnp.where((ty >= 0.0) & (ty <= float(W - 1)), ty, 0.0)

        trans_ref[bb, 0] = tx
        trans_ref[bb, 1] = ty
        ptwp_ref[bb, 0] = a
        ptwp_ref[bb, 1] = bsym
        ptwp_ref[bb, 2] = bsym   # symmetric
        ptwp_ref[bb, 3] = d


def motion_estimation(sp, dp, block_batch=8):
    B, ctrls, _ = sp.shape
    # torch: q = dp[:, [1,0]].to(int16); p = sp[:, [1,0]].to(int16); p, q = q, p
    p_eff = dp[..., ::-1].astype(jnp.int16).astype(jnp.float32)
    q_eff = sp[..., ::-1].astype(jnp.int16).astype(jnp.float32)

    # Batch blocking: BB elements per grid step; pad B up to a multiple of BB.
    bb_size = max(1, min(block_batch, B))
    n_blocks = pl.cdiv(B, bb_size)
    b_pad = n_blocks * bb_size
    if b_pad != B:
        pad = b_pad - B
        p_eff = jnp.concatenate([p_eff, jnp.zeros((pad, ctrls, 2), jnp.float32)], 0)
        q_eff = jnp.concatenate([q_eff, jnp.zeros((pad, ctrls, 2), jnp.float32)], 0)
    # 1-D SMEM tables (2-D SMEM would pad each row to 128 lanes).
    p_flat = p_eff.reshape(b_pad * 2 * ctrls)
    q_flat = q_eff.reshape(b_pad * 2 * ctrls)

    out_shapes = (
        jax.ShapeDtypeStruct((b_pad, 2, SUB, LANE), jnp.float32),          # transformers
        jax.ShapeDtypeStruct((b_pad, 4, SUB, LANE), jnp.float32),          # pTwp (flat 2x2)
        jax.ShapeDtypeStruct((b_pad, ctrls, SUB, LANE), jnp.float32),      # w
        jax.ShapeDtypeStruct((b_pad, 2 * ctrls, SUB, LANE), jnp.float32),  # w*phat (flat)
        jax.ShapeDtypeStruct((b_pad, 2 * ctrls, SUB, LANE), jnp.float32),  # qhat (flat)
    )
    kernel = functools.partial(_mls_kernel, block_b=bb_size, ctrls=ctrls)
    trans, ptwp, w, phatw, qhat = pl.pallas_call(
        kernel,
        out_shape=out_shapes,
        grid=(n_blocks,),
        in_specs=[
            pl.BlockSpec(memory_space=pltpu.MemorySpace.SMEM),
            pl.BlockSpec(memory_space=pltpu.MemorySpace.SMEM),
        ],
        out_specs=(
            pl.BlockSpec((bb_size, 2, SUB, LANE), lambda g: (g, 0, 0, 0)),
            pl.BlockSpec((bb_size, 4, SUB, LANE), lambda g: (g, 0, 0, 0)),
            pl.BlockSpec((bb_size, ctrls, SUB, LANE), lambda g: (g, 0, 0, 0)),
            pl.BlockSpec((bb_size, 2 * ctrls, SUB, LANE), lambda g: (g, 0, 0, 0)),
            pl.BlockSpec((bb_size, 2 * ctrls, SUB, LANE), lambda g: (g, 0, 0, 0)),
        ),
        # Batch blocks are independent -> safe to shard across v7x's two TCs.
        # TODO(synk): if an xprof trace shows only one TC busy on v7x, switch
        # this axis to pltpu.CORE_PARALLEL (or pl.core_map) explicitly.
        compiler_params=pltpu.CompilerParams(dimension_semantics=("parallel",)),
    )(p_flat, q_flat)

    # (8,128) slab -> (32,32) image; row-major flat index is preserved.
    trans = trans[:B].reshape(B, 2, H, W)
    ptwp = ptwp[:B].reshape(B, 2, 2, H, W)
    w = w[:B].reshape(B, ctrls, H, W)
    phatw = phatw[:B].reshape(B, ctrls, 2, 1, H, W)
    qhat = qhat[:B].reshape(B, ctrls, 2, 1, H, W)
    return trans, ptwp, w, phatw, qhat


def _ref_single(p, q):
    """Pure-JAX mirror of the torch mls_affine_deformation for one batch."""
    ctrls = p.shape[0]
    vx = jnp.tile(jnp.arange(W, dtype=jnp.float32)[None, :], (H, 1))
    vy = jnp.tile(jnp.arange(H, dtype=jnp.float32)[:, None], (1, W))
    v = jnp.stack([vx, vy])                                       # (2,H,W)
    diff = p[:, :, None, None] - v[None]
    w = 1.0 / (jnp.sum(diff ** 2, axis=1) + EPS)
    w = w / jnp.sum(w, axis=0, keepdims=True)
    pstar = jnp.sum(w[:, None] * p[:, :, None, None], axis=0)
    phat = p[:, :, None, None] - pstar[None]
    pTwp = jnp.einsum('kahw,khw,kbhw->abhw', phat, w, phat)
    inv = jnp.linalg.inv(pTwp.transpose(2, 3, 0, 1))              # (H,W,2,2)
    mul_left = (v - pstar).transpose(1, 2, 0)[:, :, None, :]      # (H,W,1,2)
    wphat = w[:, None] * phat
    mr = wphat.transpose(0, 2, 3, 1)[..., None]                   # (ctrls,H,W,2,1)
    A = jnp.matmul(jnp.matmul(mul_left, inv)[None], mr).reshape(ctrls, H, W)
    qstar = jnp.sum(w[:, None] * q[:, :, None, None], axis=0)
    qhat = q[:, :, None, None] - qstar[None]
    trans = jnp.sum(A[:, None] * qhat, axis=0) + qstar
    trans = jnp.where(trans < 0.0, 0.0, trans)
    t0 = jnp.where(trans[0] > H - 1, 0.0, trans[0])
    t1 = jnp.where(trans[1] > W - 1, 0.0, trans[1])
    return jnp.stack([t0, t1]), pTwp, w, wphat, qhat


if __name__ == "__main__":
    key = jax.random.PRNGKey(0)
    B, ctrls = 2, 8
    k1, k2 = jax.random.split(key)
    # control-point coordinates on the 32x32 grid (the torch code int16-truncates them)
    sp = jax.random.uniform(k1, (B, ctrls, 2), jnp.float32, 0.0, 31.0)
    dp = jax.random.uniform(k2, (B, ctrls, 2), jnp.float32, 0.0, 31.0)

    outs = jax.block_until_ready(motion_estimation(sp, dp))
    trans_k, ptwp_k, w_k, phatw_k, qhat_k = outs

    # ---- pure-JAX reference check ----
    p_eff = dp[..., ::-1].astype(jnp.int16).astype(jnp.float32)
    q_eff = sp[..., ::-1].astype(jnp.int16).astype(jnp.float32)
    refs = [_ref_single(p_eff[i], q_eff[i]) for i in range(B)]
    trans_r = jnp.stack([r[0] for r in refs])
    ptwp_r = jnp.stack([r[1] for r in refs])
    w_r = jnp.stack([r[2] for r in refs])
    phatw_r = jnp.stack([r[3] for r in refs]).reshape(B, ctrls, 2, 1, H, W)
    qhat_r = jnp.stack([r[4] for r in refs]).reshape(B, ctrls, 2, 1, H, W)

    close = jnp.isclose(trans_k, trans_r, rtol=1e-2, atol=1e-2)
    # the ">grid-1 -> 0" clamp can legitimately flip for values sitting on the edge
    edge = ((trans_k == 0) & (jnp.abs(trans_r - (H - 1)) < 1e-2)) | \
           ((trans_r == 0) & (jnp.abs(trans_k - (H - 1)) < 1e-2))
    assert bool(jnp.all(close | edge)), "transformers mismatch"
    assert np.allclose(ptwp_k, ptwp_r, rtol=1e-2, atol=1e-2), "pTwp mismatch"
    assert np.allclose(w_k, w_r, rtol=1e-2, atol=1e-2), "w mismatch"
    assert np.allclose(phatw_k, phatw_r, rtol=1e-2, atol=1e-2), "phat mismatch"
    assert np.allclose(qhat_k, qhat_r, rtol=1e-2, atol=1e-2), "qhat mismatch"

    print("KERNEL_OK")
</pallas_src>

<mosaic_0001>
module attributes {stable_mosaic.version = 11 : i64} {
  func.func @_mls_kernel(%arg0: i32, %arg1: memref<32xf32, #tpu.memory_space<smem>>, %arg2: memref<32xf32, #tpu.memory_space<smem>>, %arg3: memref<2x2x8x128xf32, #tpu.memory_space<vmem>>, %arg4: memref<2x4x8x128xf32, #tpu.memory_space<vmem>>, %arg5: memref<2x8x8x128xf32, #tpu.memory_space<vmem>>, %arg6: memref<2x16x8x128xf32, #tpu.memory_space<vmem>>, %arg7: memref<2x16x8x128xf32, #tpu.memory_space<vmem>>) attributes {dimension_semantics = [#tpu.dimension_semantics<parallel>], iteration_bounds = array<i64: 1>, scalar_prefetch = 0 : i64, scratch_operands = 0 : i64, tpu.core_type = #tpu.core_type<tc>, window_params = [{transform_indices = @transform_0, window_bounds = array<i64: 32>}, {transform_indices = @transform_1, window_bounds = array<i64: 32>}, {transform_indices = @transform_2, window_bounds = array<i64: 2, 2, 8, 128>}, {transform_indices = @transform_3, window_bounds = array<i64: 2, 4, 8, 128>}, {transform_indices = @transform_4, window_bounds = array<i64: 2, 8, 8, 128>}, {transform_indices = @transform_5, window_bounds = array<i64: 2, 16, 8, 128>}, {transform_indices = @transform_6, window_bounds = array<i64: 2, 16, 8, 128>}]} {
    %0 = tpu.iota {dimensions = array<i32: 0>} : vector<8x128xi32>
    %c128_i32 = arith.constant 128 : i32
    %1 = vector.broadcast %c128_i32 : i32 to vector<8x128xi32>
    %2 = arith.muli %0, %1 : vector<8x128xi32>
    %3 = tpu.iota {dimensions = array<i32: 1>} : vector<8x128xi32>
    %4 = arith.addi %2, %3 : vector<8x128xi32>
    %c31_i32 = arith.constant 31 : i32
    %5 = vector.broadcast %c31_i32 : i32 to vector<8x128xi32>
    %6 = arith.andi %4, %5 : vector<8x128xi32>
    %7 = arith.sitofp %6 : vector<8x128xi32> to vector<8x128xf32>
    %c5_i32 = arith.constant 5 : i32
    %8 = vector.broadcast %c5_i32 : i32 to vector<8x128xi32>
    %9 = arith.shrsi %4, %8 : vector<8x128xi32>
    %10 = arith.sitofp %9 : vector<8x128xi32> to vector<8x128xf32>
    %cst = arith.constant 0.000000e+00 : f32
    %11 = vector.broadcast %cst : f32 to vector<8x128xf32>
    %c2_i32 = arith.constant 2 : i32
    %12 = arith.muli %arg0, %c2_i32 : i32
    %c0_i32 = arith.constant 0 : i32
    %13 = arith.addi %12, %c0_i32 : i32
    %c16_i32 = arith.constant 16 : i32
    %14 = arith.muli %13, %c16_i32 : i32
    %c0_i32_0 = arith.constant 0 : i32
    %15 = arith.addi %14, %c0_i32_0 : i32
    %16 = arith.index_cast %15 : i32 to index
    %17 = memref.load %arg1[%16] : memref<32xf32, #tpu.memory_space<smem>>
    %c0_i32_1 = arith.constant 0 : i32
    %18 = arith.addi %14, %c0_i32_1 : i32
    %c1_i32 = arith.constant 1 : i32
    %19 = arith.addi %18, %c1_i32 : i32
    %20 = arith.index_cast %19 : i32 to index
    %21 = memref.load %arg1[%20] : memref<32xf32, #tpu.memory_space<smem>>
    %c0_i32_2 = arith.constant 0 : i32
    %22 = arith.addi %14, %c0_i32_2 : i32
    %23 = arith.index_cast %22 : i32 to index
    %24 = memref.load %arg2[%23] : memref<32xf32, #tpu.memory_space<smem>>
    %c0_i32_3 = arith.constant 0 : i32
    %25 = arith.addi %14, %c0_i32_3 : i32
    %c1_i32_4 = arith.constant 1 : i32
    %26 = arith.addi %25, %c1_i32_4 : i32
    %27 = arith.index_cast %26 : i32 to index
    %28 = memref.load %arg2[%27] : memref<32xf32, #tpu.memory_space<smem>>
    %29 = vector.broadcast %17 : f32 to vector<8x128xf32>
    %30 = arith.subf %29, %7 : vector<8x128xf32>
    %31 = vector.broadcast %21 : f32 to vector<8x128xf32>
    %32 = arith.subf %31, %10 : vector<8x128xf32>
    %33 = arith.mulf %30, %30 : vector<8x128xf32>
    %34 = arith.mulf %32, %32 : vector<8x128xf32>
    %35 = arith.addf %33, %34 : vector<8x128xf32>
    %cst_5 = arith.constant 9.99999993E-9 : f32
    %36 = vector.broadcast %cst_5 : f32 to vector<8x128xf32>
    %37 = arith.addf %35, %36 : vector<8x128xf32>
    %38 = tpu.reciprocal %37 {approx = true} : vector<8x128xf32> -> vector<8x128xf32>
    %39 = arith.mulf %37, %38 : vector<8x128xf32>
    %cst_6 = arith.constant 2.000000e+00 : f32
    %40 = vector.broadcast %cst_6 : f32 to vector<8x128xf32>
    %41 = arith.subf %40, %39 : vector<8x128xf32>
    %42 = arith.mulf %38, %41 : vector<8x128xf32>
    %43 = arith.addf %11, %42 : vector<8x128xf32>
    %44 = arith.mulf %42, %30 : vector<8x128xf32>
    %45 = arith.addf %11, %44 : vector<8x128xf32>
    %46 = arith.mulf %42, %32 : vector<8x128xf32>
    %47 = arith.addf %11, %46 : vector<8x128xf32>
    %48 = vector.broadcast %24 : f32 to vector<8x128xf32>
    %49 = arith.mulf %42, %48 : vector<8x128xf32>
    %50 = arith.addf %11, %49 : vector<8x128xf32>
    %51 = vector.broadcast %28 : f32 to vector<8x128xf32>
    %52 = arith.mulf %42, %51 : vector<8x128xf32>
    %53 = arith.addf %11, %52 : vector<8x128xf32>
    %c2_i32_7 = arith.constant 2 : i32
    %54 = arith.addi %14, %c2_i32_7 : i32
    %55 = arith.index_cast %54 : i32 to index
    %56 = memref.load %arg1[%55] : memref<32xf32, #tpu.memory_space<smem>>
    %c2_i32_8 = arith.constant 2 : i32
    %57 = arith.addi %14, %c2_i32_8 : i32
    %c1_i32_9 = arith.constant 1 : i32
    %58 = arith.addi %57, %c1_i32_9 : i32
    %59 = arith.index_cast %58 : i32 to index
    %60 = memref.load %arg1[%59] : memref<32xf32, #tpu.memory_space<smem>>
    %c2_i32_10 = arith.constant 2 : i32
    %61 = arith.addi %14, %c2_i32_10 : i32
    %62 = arith.index_cast %61 : i32 to index
    %63 = memref.load %arg2[%62] : memref<32xf32, #tpu.memory_space<smem>>
    %c2_i32_11 = arith.constant 2 : i32
    %64 = arith.addi %14, %c2_i32_11 : i32
    %c1_i32_12 = arith.constant 1 : i32
    %65 = arith.addi %64, %c1_i32_12 : i32
    %66 = arith.index_cast %65 : i32 to index
    %67 = memref.load %arg2[%66] : memref<32xf32, #tpu.memory_space<smem>>
    %68 = vector.broadcast %56 : f32 to vector<8x128xf32>
    %69 = arith.subf %68, %7 : vector<8x128xf32>
    %70 = vector.broadcast %60 : f32 to vector<8x128xf32>
    %71 = arith.subf %70, %10 : vector<8x128xf32>
    %72 = arith.mulf %69, %69 : vector<8x128xf32>
    %73 = arith.mulf %71, %71 : vector<8x128xf32>
    %74 = arith.addf %72, %73 : vector<8x128xf32>
    %cst_13 = arith.constant 9.99999993E-9 : f32
    %75 = vector.broadcast %cst_13 : f32 to vector<8x128xf32>
    %76 = arith.addf %74, %75 : vector<8x128xf32>
    %77 = tpu.reciprocal %76 {approx = true} : vector<8x128xf32> -> vector<8x128xf32>
    %78 = arith.mulf %76, %77 : vector<8x128xf32>
    %cst_14 = arith.constant 2.000000e+00 : f32
    %79 = vector.broadcast %cst_14 : f32 to vector<8x128xf32>
    %80 = arith.subf %79, %78 : vector<8x128xf32>
    %81 = arith.mulf %77, %80 : vector<8x128xf32>
    %82 = arith.addf %43, %81 : vector<8x128xf32>
    %83 = arith.mulf %81, %69 : vector<8x128xf32>
    %84 = arith.addf %45, %83 : vector<8x128xf32>
    %85 = arith.mulf %81, %71 : vector<8x128xf32>
    %86 = arith.addf %47, %85 : vector<8x128xf32>
    %87 = vector.broadcast %63 : f32 to vector<8x128xf32>
    %88 = arith.mulf %81, %87 : vector<8x128xf32>
    %89 = arith.addf %50, %88 : vector<8x128xf32>
    %90 = vector.broadcast %67 : f32 to vector<8x128xf32>
    %91 = arith.mulf %81, %90 : vector<8x128xf32>
    %92 = arith.addf %53, %91 : vector<8x128xf32>
    %c4_i32 = arith.constant 4 : i32
    %93 = arith.addi %14, %c4_i32 : i32
    %94 = arith.index_cast %93 : i32 to index
    %95 = memref.load %arg1[%94] : memref<32xf32, #tpu.memory_space<smem>>
    %c4_i32_15 = arith.constant 4 : i32
    %96 = arith.addi %14, %c4_i32_15 : i32
    %c1_i32_16 = arith.constant 1 : i32
    %97 = arith.addi %96, %c1_i32_16 : i32
    %98 = arith.index_cast %97 : i32 to index
    %99 = memref.load %arg1[%98] : memref<32xf32, #tpu.memory_space<smem>>
    %c4_i32_17 = arith.constant 4 : i32
    %100 = arith.addi %14, %c4_i32_17 : i32
    %101 = arith.index_cast %100 : i32 to index
    %102 = memref.load %arg2[%101] : memref<32xf32, #tpu.memory_space<smem>>
    %c4_i32_18 = arith.constant 4 : i32
    %103 = arith.addi %14, %c4_i32_18 : i32
    %c1_i32_19 = arith.constant 1 : i32
    %104 = arith.addi %103, %c1_i32_19 : i32
    %105 = arith.index_cast %104 : i32 to index
    %106 = memref.load %arg2[%105] : memref<32xf32, #tpu.memory_space<smem>>
    %107 = vector.broadcast %95 : f32 to vector<8x128xf32>
    %108 = arith.subf %107, %7 : vector<8x128xf32>
    %109 = vector.broadcast %99 : f32 to vector<8x128xf32>
    %110 = arith.subf %109, %10 : vector<8x128xf32>
    %111 = arith.mulf %108, %108 : vector<8x128xf32>
    %112 = arith.mulf %110, %110 : vector<8x128xf32>
    %113 = arith.addf %111, %112 : vector<8x128xf32>
    %cst_20 = arith.constant 9.99999993E-9 : f32
    %114 = vector.broadcast %cst_20 : f32 to vector<8x128xf32>
    %115 = arith.addf %113, %114 : vector<8x128xf32>
    %116 = tpu.reciprocal %115 {approx = true} : vector<8x128xf32> -> vector<8x128xf32>
    %117 = arith.mulf %115, %116 : vector<8x128xf32>
    %cst_21 = arith.constant 2.000000e+00 : f32
    %118 = vector.broadcast %cst_21 : f32 to vector<8x128xf32>
    %119 = arith.subf %118, %117 : vector<8x128xf32>
    %120 = arith.mulf %116, %119 : vector<8x128xf32>
    %121 = arith.addf %82, %120 : vector<8x128xf32>
    %122 = arith.mulf %120, %108 : vector<8x128xf32>
    %123 = arith.addf %84, %122 : vector<8x128xf32>
    %124 = arith.mulf %120, %110 : vector<8x128xf32>
    %125 = arith.addf %86, %124 : vector<8x128xf32>
    %126 = vector.broadcast %102 : f32 to vector<8x128xf32>
    %127 = arith.mulf %120, %126 : vector<8x128xf32>
    %128 = arith.addf %89, %127 : vector<8x128xf32>
    %129 = vector.broadcast %106 : f32 to vector<8x128xf32>
    %130 = arith.mulf %120, %129 : vector<8x128xf32>
    %131 = arith.addf %92, %130 : vector<8x128xf32>
    %c6_i32 = arith.constant 6 : i32
    %132 = arith.addi %14, %c6_i32 : i32
    %133 = arith.index_cast %132 : i32 to index
    %134 = memref.load %arg1[%133] : memref<32xf32, #tpu.memory_space<smem>>
    %c6_i32_22 = arith.constant 6 : i32
    %135 = arith.addi %14, %c6_i32_22 : i32
    %c1_i32_23 = arith.constant 1 : i32
    %136 = arith.addi %135, %c1_i32_23 : i32
    %137 = arith.index_cast %136 : i32 to index
    %138 = memref.load %arg1[%137] : memref<32xf32, #tpu.memory_space<smem>>
    %c6_i32_24 = arith.constant 6 : i32
    %139 = arith.addi %14, %c6_i32_24 : i32
    %140 = arith.index_cast %139 : i32 to index
    %141 = memref.load %arg2[%140] : memref<32xf32, #tpu.memory_space<smem>>
    %c6_i32_25 = arith.constant 6 : i32
    %142 = arith.addi %14, %c6_i32_25 : i32
    %c1_i32_26 = arith.constant 1 : i32
    %143 = arith.addi %142, %c1_i32_26 : i32
    %144 = arith.index_cast %143 : i32 to index
    %145 = memref.load %arg2[%144] : memref<32xf32, #tpu.memory_space<smem>>
    %146 = vector.broadcast %134 : f32 to vector<8x128xf32>
    %147 = arith.subf %146, %7 : vector<8x128xf32>
    %148 = vector.broadcast %138 : f32 to vector<8x128xf32>
    %149 = arith.subf %148, %10 : vector<8x128xf32>
    %150 = arith.mulf %147, %147 : vector<8x128xf32>
    %151 = arith.mulf %149, %149 : vector<8x128xf32>
    %152 = arith.addf %150, %151 : vector<8x128xf32>
    %cst_27 = arith.constant 9.99999993E-9 : f32
    %153 = vector.broadcast %cst_27 : f32 to vector<8x128xf32>
    %154 = arith.addf %152, %153 : vector<8x128xf32>
    %155 = tpu.reciprocal %154 {approx = true} : vector<8x128xf32> -> vector<8x128xf32>
    %156 = arith.mulf %154, %155 : vector<8x128xf32>
    %cst_28 = arith.constant 2.000000e+00 : f32
    %157 = vector.broadcast %cst_28 : f32 to vector<8x128xf32>
    %158 = arith.subf %157, %156 : vector<8x128xf32>
    %159 = arith.mulf %155, %158 : vector<8x128xf32>
    %160 = arith.addf %121, %159 : vector<8x128xf32>
    %161 = arith.mulf %159, %147 : vector<8x128xf32>
    %162 = arith.addf %123, %161 : vector<8x128xf32>
    %163 = arith.mulf %159, %149 : vector<8x128xf32>
    %164 = arith.addf %125, %163 : vector<8x128xf32>
    %165 = vector.broadcast %141 : f32 to vector<8x128xf32>
    %166 = arith.mulf %159, %165 : vector<8x128xf32>
    %167 = arith.addf %128, %166 : vector<8x128xf32>
    %168 = vector.broadcast %145 : f32 to vector<8x128xf32>
    %169 = arith.mulf %159, %168 : vector<8x128xf32>
    %170 = arith.addf %131, %169 : vector<8x128xf32>
    %c8_i32 = arith.constant 8 : i32
    %171 = arith.addi %14, %c8_i32 : i32
    %172 = arith.index_cast %171 : i32 to index
    %173 = memref.load %arg1[%172] : memref<32xf32, #tpu.memory_space<smem>>
    %c8_i32_29 = arith.constant 8 : i32
    %174 = arith.addi %14, %c8_i32_29 : i32
    %c1_i32_30 = arith.constant 1 : i32
    %175 = arith.addi %174, %c1_i32_30 : i32
    %176 = arith.index_cast %175 : i32 to index
    %177 = memref.load %arg1[%176] : memref<32xf32, #tpu.memory_space<smem>>
    %c8_i32_31 = arith.constant 8 : i32
    %178 = arith.addi %14, %c8_i32_31 : i32
    %179 = arith.index_cast %178 : i32 to index
    %180 = memref.load %arg2[%179] : memref<32xf32, #tpu.memory_space<smem>>
    %c8_i32_32 = arith.constant 8 : i32
    %181 = arith.addi %14, %c8_i32_32 : i32
    %c1_i32_33 = arith.constant 1 : i32
    %182 = arith.addi %181, %c1_i32_33 : i32
    %183 = arith.index_cast %182 : i32 to index
    %184 = memref.load %arg2[%183] : memref<32xf32, #tpu.memory_space<smem>>
    %185 = vector.broadcast %173 : f32 to vector<8x128xf32>
    %186 = arith.subf %185, %7 : vector<8x128xf32>
    %187 = vector.broadcast %177 : f32 to vector<8x128xf32>
    %188 = arith.subf %187, %10 : vector<8x128xf32>
    %189 = arith.mulf %186, %186 : vector<8x128xf32>
    %190 = arith.mulf %188, %188 : vector<8x128xf32>
    %191 = arith.addf %189, %190 : vector<8x128xf32>
    %cst_34 = arith.constant 9.99999993E-9 : f32
    %192 = vector.broadcast %cst_34 : f32 to vector<8x128xf32>
    %193 = arith.addf %191, %192 : vector<8x128xf32>
    %194 = tpu.reciprocal %193 {approx = true} : vector<8x128xf32> -> vector<8x128xf32>
    %195 = arith.mulf %193, %194 : vector<8x128xf32>
    %cst_35 = arith.constant 2.000000e+00 : f32
    %196 = vector.broadcast %cst_35 : f32 to vector<8x128xf32>
    %197 = arith.subf %196, %195 : vector<8x128xf32>
    %198 = arith.mulf %194, %197 : vector<8x128xf32>
    %199 = arith.addf %160, %198 : vector<8x128xf32>
    %200 = arith.mulf %198, %186 : vector<8x128xf32>
    %201 = arith.addf %162, %200 : vector<8x128xf32>
    %202 = arith.mulf %198, %188 : vector<8x128xf32>
    %203 = arith.addf %164, %202 : vector<8x128xf32>
    %204 = vector.broadcast %180 : f32 to vector<8x128xf32>
    %205 = arith.mulf %198, %204 : vector<8x128xf32>
    %206 = arith.addf %167, %205 : vector<8x128xf32>
    %207 = vector.broadcast %184 : f32 to vector<8x128xf32>
    %208 = arith.mulf %198, %207 : vector<8x128xf32>
    %209 = arith.addf %170, %208 : vector<8x128xf32>
    %c10_i32 = arith.constant 10 : i32
    %210 = arith.addi %14, %c10_i32 : i32
    %211 = arith.index_cast %210 : i32 to index
    %212 = memref.load %arg1[%211] : memref<32xf32, #tpu.memory_space<smem>>
    %c10_i32_36 = arith.constant 10 : i32
    %213 = arith.addi %14, %c10_i32_36 : i32
    %c1_i32_37 = arith.constant 1 : i32
    %214 = arith.addi %213, %c1_i32_37 : i32
    %215 = arith.index_cast %214 : i32 to index
    %216 = memref.load %arg1[%215] : memref<32xf32, #tpu.memory_space<smem>>
    %c10_i32_38 = arith.constant 10 : i32
    %217 = arith.addi %14, %c10_i32_38 : i32
    %218 = arith.index_cast %217 : i32 to index
    %219 = memref.load %arg2[%218] : memref<32xf32, #tpu.memory_space<smem>>
    %c10_i32_39 = arith.constant 10 : i32
    %220 = arith.addi %14, %c10_i32_39 : i32
    %c1_i32_40 = arith.constant 1 : i32
    %221 = arith.addi %220, %c1_i32_40 : i32
    %222 = arith.index_cast %221 : i32 to index
    %223 = memref.load %arg2[%222] : memref<32xf32, #tpu.memory_space<smem>>
    %224 = vector.broadcast %212 : f32 to vector<8x128xf32>
    %225 = arith.subf %224, %7 : vector<8x128xf32>
    %226 = vector.broadcast %216 : f32 to vector<8x128xf32>
    %227 = arith.subf %226, %10 : vector<8x128xf32>
    %228 = arith.mulf %225, %225 : vector<8x128xf32>
    %229 = arith.mulf %227, %227 : vector<8x128xf32>
    %230 = arith.addf %228, %229 : vector<8x128xf32>
    %cst_41 = arith.constant 9.99999993E-9 : f32
    %231 = vector.broadcast %cst_41 : f32 to vector<8x128xf32>
    %232 = arith.addf %230, %231 : vector<8x128xf32>
    %233 = tpu.reciprocal %232 {approx = true} : vector<8x128xf32> -> vector<8x128xf32>
    %234 = arith.mulf %232, %233 : vector<8x128xf32>
    %cst_42 = arith.constant 2.000000e+00 : f32
    %235 = vector.broadcast %cst_42 : f32 to vector<8x128xf32>
    %236 = arith.subf %235, %234 : vector<8x128xf32>
    %237 = arith.mulf %233, %236 : vector<8x128xf32>
    %238 = arith.addf %199, %237 : vector<8x128xf32>
    %239 = arith.mulf %237, %225 : vector<8x128xf32>
    %240 = arith.addf %201, %239 : vector<8x128xf32>
    %241 = arith.mulf %237, %227 : vector<8x128xf32>
    %242 = arith.addf %203, %241 : vector<8x128xf32>
    %243 = vector.broadcast %219 : f32 to vector<8x128xf32>
    %244 = arith.mulf %237, %243 : vector<8x128xf32>
    %245 = arith.addf %206, %244 : vector<8x128xf32>
    %246 = vector.broadcast %223 : f32 to vector<8x128xf32>
    %247 = arith.mulf %237, %246 : vector<8x128xf32>
    %248 = arith.addf %209, %247 : vector<8x128xf32>
    %c12_i32 = arith.constant 12 : i32
    %249 = arith.addi %14, %c12_i32 : i32
    %250 = arith.index_cast %249 : i32 to index
    %251 = memref.load %arg1[%250] : memref<32xf32, #tpu.memory_space<smem>>
    %c12_i32_43 = arith.constant 12 : i32
    %252 = arith.addi %14, %c12_i32_43 : i32
    %c1_i32_44 = arith.constant 1 : i32
    %253 = arith.addi %252, %c1_i32_44 : i32
    %254 = arith.index_cast %253 : i32 to index
    %255 = memref.load %arg1[%254] : memref<32xf32, #tpu.memory_space<smem>>
    %c12_i32_45 = arith.constant 12 : i32
    %256 = arith.addi %14, %c12_i32_45 : i32
    %257 = arith.index_cast %256 : i32 to index
    %258 = memref.load %arg2[%257] : memref<32xf32, #tpu.memory_space<smem>>
    %c12_i32_46 = arith.constant 12 : i32
    %259 = arith.addi %14, %c12_i32_46 : i32
    %c1_i32_47 = arith.constant 1 : i32
    %260 = arith.addi %259, %c1_i32_47 : i32
    %261 = arith.index_cast %260 : i32 to index
    %262 = memref.load %arg2[%261] : memref<32xf32, #tpu.memory_space<smem>>
    %263 = vector.broadcast %251 : f32 to vector<8x128xf32>
    %264 = arith.subf %263, %7 : vector<8x128xf32>
    %265 = vector.broadcast %255 : f32 to vector<8x128xf32>
    %266 = arith.subf %265, %10 : vector<8x128xf32>
    %267 = arith.mulf %264, %264 : vector<8x128xf32>
    %268 = arith.mulf %266, %266 : vector<8x128xf32>
    %269 = arith.addf %267, %268 : vector<8x128xf32>
    %cst_48 = arith.constant 9.99999993E-9 : f32
    %270 = vector.broadcast %cst_48 : f32 to vector<8x128xf32>
    %271 = arith.addf %269, %270 : vector<8x128xf32>
    %272 = tpu.reciprocal %271 {approx = true} : vector<8x128xf32> -> vector<8x128xf32>
    %273 = arith.mulf %271, %272 : vector<8x128xf32>
    %cst_49 = arith.constant 2.000000e+00 : f32
    %274 = vector.broadcast %cst_49 : f32 to vector<8x128xf32>
    %275 = arith.subf %274, %273 : vector<8x128xf32>
    %276 = arith.mulf %272, %275 : vector<8x128xf32>
    %277 = arith.addf %238, %276 : vector<8x128xf32>
    %278 = arith.mulf %276, %264 : vector<8x128xf32>
    %279 = arith.addf %240, %278 : vector<8x128xf32>
    %280 = arith.mulf %276, %266 : vector<8x128xf32>
    %281 = arith.addf %242, %280 : vector<8x128xf32>
    %282 = vector.broadcast %258 : f32 to vector<8x128xf32>
    %283 = arith.mulf %276, %282 : vector<8x128xf32>
    %284 = arith.addf %245, %283 : vector<8x128xf32>
    %285 = vector.broadcast %262 : f32 to vector<8x128xf32>
    %286 = arith.mulf %276, %285 : vector<8x128xf32>
    %287 = arith.addf %248, %286 : vector<8x128xf32>
    %c14_i32 = arith.constant 14 : i32
    %288 = arith.addi %14, %c14_i32 : i32
    %289 = arith.index_cast %288 : i32 to index
    %290 = memref.load %arg1[%289] : memref<32xf32, #tpu.memory_space<smem>>
    %c14_i32_50 = arith.constant 14 : i32
    %291 = arith.addi %14, %c14_i32_50 : i32
    %c1_i32_51 = arith.constant 1 : i32
    %292 = arith.addi %291, %c1_i32_51 : i32
    %293 = arith.index_cast %292 : i32 to index
    %294 = memref.load %arg1[%293] : memref<32xf32, #tpu.memory_space<smem>>
    %c14_i32_52 = arith.constant 14 : i32
    %295 = arith.addi %14, %c14_i32_52 : i32
    %296 = arith.index_cast %295 : i32 to index
    %297 = memref.load %arg2[%296] : memref<32xf32, #tpu.memory_space<smem>>
    %c14_i32_53 = arith.constant 14 : i32
    %298 = arith.addi %14, %c14_i32_53 : i32
    %c1_i32_54 = arith.constant 1 : i32
    %299 = arith.addi %298, %c1_i32_54 : i32
    %300 = arith.index_cast %299 : i32 to index
    %301 = memref.load %arg2[%300] : memref<32xf32, #tpu.memory_space<smem>>
    %302 = vector.broadcast %290 : f32 to vector<8x128xf32>
    %303 = arith.subf %302, %7 : vector<8x128xf32>
    %304 = vector.broadcast %294 : f32 to vector<8x128xf32>
    %305 = arith.subf %304, %10 : vector<8x128xf32>
    %306 = arith.mulf %303, %303 : vector<8x128xf32>
    %307 = arith.mulf %305, %305 : vector<8x128xf32>
    %308 = arith.addf %306, %307 : vector<8x128xf32>
    %cst_55 = arith.constant 9.99999993E-9 : f32
    %309 = vector.broadcast %cst_55 : f32 to vector<8x128xf32>
    %310 = arith.addf %308, %309 : vector<8x128xf32>
    %311 = tpu.reciprocal %310 {approx = true} : vector<8x128xf32> -> vector<8x128xf32>
    %312 = arith.mulf %310, %311 : vector<8x128xf32>
    %cst_56 = arith.constant 2.000000e+00 : f32
    %313 = vector.broadcast %cst_56 : f32 to vector<8x128xf32>
    %314 = arith.subf %313, %312 : vector<8x128xf32>
    %315 = arith.mulf %311, %314 : vector<8x128xf32>
    %316 = arith.addf %277, %315 : vector<8x128xf32>
    %317 = arith.mulf %315, %303 : vector<8x128xf32>
    %318 = arith.addf %279, %317 : vector<8x128xf32>
    %319 = arith.mulf %315, %305 : vector<8x128xf32>
    %320 = arith.addf %281, %319 : vector<8x128xf32>
    %321 = vector.broadcast %297 : f32 to vector<8x128xf32>
    %322 = arith.mulf %315, %321 : vector<8x128xf32>
    %323 = arith.addf %284, %322 : vector<8x128xf32>
    %324 = vector.broadcast %301 : f32 to vector<8x128xf32>
    %325 = arith.mulf %315, %324 : vector<8x128xf32>
    %326 = arith.addf %287, %325 : vector<8x128xf32>
    %327 = tpu.reciprocal %316 {approx = true} : vector<8x128xf32> -> vector<8x128xf32>
    %328 = arith.mulf %316, %327 : vector<8x128xf32>
    %cst_57 = arith.constant 2.000000e+00 : f32
    %329 = vector.broadcast %cst_57 : f32 to vector<8x128xf32>
    %330 = arith.subf %329, %328 : vector<8x128xf32>
    %331 = arith.mulf %327, %330 : vector<8x128xf32>
    %332 = arith.mulf %318, %331 : vector<8x128xf32>
    %333 = arith.addf %7, %332 : vector<8x128xf32>
    %334 = arith.mulf %320, %331 : vector<8x128xf32>
    %335 = arith.addf %10, %334 : vector<8x128xf32>
    %336 = arith.mulf %323, %331 : vector<8x128xf32>
    %337 = arith.mulf %326, %331 : vector<8x128xf32>
    %338 = vector.broadcast %24 : f32 to vector<8x128xf32>
    %339 = arith.subf %338, %336 : vector<8x128xf32>
    %340 = vector.broadcast %28 : f32 to vector<8x128xf32>
    %341 = arith.subf %340, %337 : vector<8x128xf32>
    %c0 = arith.constant 0 : index
    %c0_58 = arith.constant 0 : index
    %c0_59 = arith.constant 0 : index
    %c0_60 = arith.constant 0 : index
    %342 = vector.load %arg7[%c0, %c0_58, %c0_59, %c0_60] : memref<2x16x8x128xf32, #tpu.memory_space<vmem>>, vector<1x1x8x128xf32>
    %343 = vector.shape_cast %342 : vector<1x1x8x128xf32> to vector<8x128xf32>
    %344 = vector.shape_cast %339 : vector<8x128xf32> to vector<1x1x8x128xf32>
    tpu.vector_store %arg7[%c0, %c0_58, %c0_59, %c0_60], %344 {strides = array<i32>} : memref<2x16x8x128xf32, #tpu.memory_space<vmem>>, vector<1x1x8x128xf32>,
    %c0_61 = arith.constant 0 : index
    %c1 = arith.constant 1 : index
    %c0_62 = arith.constant 0 : index
    %c0_63 = arith.constant 0 : index
    %345 = vector.load %arg7[%c0_61, %c1, %c0_62, %c0_63] : memref<2x16x8x128xf32, #tpu.memory_space<vmem>>, vector<1x1x8x128xf32>
    %346 = vector.shape_cast %345 : vector<1x1x8x128xf32> to vector<8x128xf32>
    %347 = vector.shape_cast %341 : vector<8x128xf32> to vector<1x1x8x128xf32>
    tpu.vector_store %arg7[%c0_61, %c1, %c0_62, %c0_63], %347 {strides = array<i32>} : memref<2x16x8x128xf32, #tpu.memory_space<vmem>>, vector<1x1x8x128xf32>,
    %348 = vector.broadcast %63 : f32 to vector<8x128xf32>
    %349 = arith.subf %348, %336 : vector<8x128xf32>
    %350 = vector.broadcast %67 : f32 to vector<8x128xf32>
    %351 = arith.subf %350, %337 : vector<8x128xf32>
    %c0_64 = arith.constant 0 : index
    %c2 = arith.constant 2 : index
    %c0_65 = arith.constant 0 : index
    %c0_66 = arith.constant 0 : index
    %352 = vector.load %arg7[%c0_64, %c2, %c0_65, %c0_66] : memref<2x16x8x128xf32, #tpu.memory_space<vmem>>, vector<1x1x8x128xf32>
    %353 = vector.shape_cast %352 : vector<1x1x8x128xf32> to vector<8x128xf32>
    %354 = vector.shape_cast %349 : vector<8x128xf32> to vector<1x1x8x128xf32>
    tpu.vector_store %arg7[%c0_64, %c2, %c0_65, %c0_66], %354 {strides = array<i32>} : memref<2x16x8x128xf32, #tpu.memory_space<vmem>>, vector<1x1x8x128xf32>,
    %c0_67 = arith.constant 0 : index
    %c3 = arith.constant 3 : index
    %c0_68 = arith.constant 0 : index
    %c0_69 = arith.constant 0 : index
    %355 = vector.load %arg7[%c0_67, %c3, %c0_68, %c0_69] : memref<2x16x8x128xf32, #tpu.memory_space<vmem>>, vector<1x1x8x128xf32>
    %356 = vector.shape_cast %355 : vector<1x1x8x128xf32> to vector<8x128xf32>
    %357 = vector.shape_cast %351 : vector<8x128xf32> to vector<1x1x8x128xf32>
    tpu.vector_store %arg7[%c0_67, %c3, %c0_68, %c0_69], %357 {strides = array<i32>} : memref<2x16x8x128xf32, #tpu.memory_space<vmem>>, vector<1x1x8x128xf32>,
    %358 = vector.broadcast %102 : f32 to vector<8x128xf32>
    %359 = arith.subf %358, %336 : vector<8x128xf32>
    %360 = vector.broadcast %106 : f32 to vector<8x128xf32>
    %361 = arith.subf %360, %337 : vector<8x128xf32>
    %c0_70 = arith.constant 0 : index
    %c4 = arith.constant 4 : index
    %c0_71 = arith.constant 0 : index
    %c0_72 = arith.constant 0 : index
    %362 = vector.load %arg7[%c0_70, %c4, %c0_71, %c0_72] : memref<2x16x8x128xf32, #tpu.memory_space<vmem>>, vector<1x1x8x128xf32>
    %363 = vector.shape_cast %362 : vector<1x1x8x128xf32> to vector<8x128xf32>
    %364 = vector.shape_cast %359 : vector<8x128xf32> to vector<1x1x8x128xf32>
    tpu.vector_store %arg7[%c0_70, %c4, %c0_71, %c0_72], %364 {strides = array<i32>} : memref<2x16x8x128xf32, #tpu.memory_space<vmem>>, vector<1x1x8x128xf32>,
    %c0_73 = arith.constant 0 : index
    %c5 = arith.constant 5 : index
    %c0_74 = arith.constant 0 : index
    %c0_75 = arith.constant 0 : index
    %365 = vector.load %arg7[%c0_73, %c5, %c0_74, %c0_75] : memref<2x16x8x128xf32, #tpu.memory_space<vmem>>, vector<1x1x8x128xf32>
    %366 = vector.shape_cast %365 : vector<1x1x8x128xf32> to vector<8x128xf32>
    %367 = vector.shape_cast %361 : vector<8x128xf32> to vector<1x1x8x128xf32>
    tpu.vector_store %arg7[%c0_73, %c5, %c0_74, %c0_75], %367 {strides = array<i32>} : memref<2x16x8x128xf32, #tpu.memory_space<vmem>>, vector<1x1x8x128xf32>,
    %368 = vector.broadcast %141 : f32 to vector<8x128xf32>
    %369 = arith.subf %368, %336 : vector<8x128xf32>
    %370 = vector.broadcast %145 : f32 to vector<8x128xf32>
    %371 = arith.subf %370, %337 : vector<8x128xf32>
    %c0_76 = arith.constant 0 : index
    %c6 = arith.constant 6 : index
    %c0_77 = arith.constant 0 : index
    %c0_78 = arith.constant 0 : index
    %372 = vector.load %arg7[%c0_76, %c6, %c0_77, %c0_78] : memref<2x16x8x128xf32, #tpu.memory_space<vmem>>, vector<1x1x8x128xf32>
    %373 = vector.shape_cast %372 : vector<1x1x8x128xf32> to vector<8x128xf32>
    %374 = vector.shape_cast %369 : vector<8x128xf32> to vector<1x1x8x128xf32>
    tpu.vector_store %arg7[%c0_76, %c6, %c0_77, %c0_78], %374 {strides = array<i32>} : memref<2x16x8x128xf32, #tpu.memory_space<vmem>>, vector<1x1x8x128xf32>,
    %c0_79 = arith.constant 0 : index
    %c7 = arith.constant 7 : index
    %c0_80 = arith.constant 0 : index
    %c0_81 = arith.constant 0 : index
    %375 = vector.load %arg7[%c0_79, %c7, %c0_80, %c0_81] : memref<2x16x8x128xf32, #tpu.memory_space<vmem>>, vector<1x1x8x128xf32>
    %376 = vector.shape_cast %375 : vector<1x1x8x128xf32> to vector<8x128xf32>
    %377 = vector.shape_cast %371 : vector<8x128xf32> to vector<1x1x8x128xf32>
    tpu.vector_store %arg7[%c0_79, %c7, %c0_80, %c0_81], %377 {strides = array<i32>} : memref<2x16x8x128xf32, #tpu.memory_space<vmem>>, vector<1x1x8x128xf32>,
    %378 = vector.broadcast %180 : f32 to vector<8x128xf32>
    %379 = arith.subf %378, %336 : vector<8x128xf32>
    %380 = vector.broadcast %184 : f32 to vector<8x128xf32>
    %381 = arith.subf %380, %337 : vector<8x128xf32>
    %c0_82 = arith.constant 0 : index
    %c8 = arith.constant 8 : index
    %c0_83 = arith.constant 0 : index
    %c0_84 = arith.constant 0 : index
    %382 = vector.load %arg7[%c0_82, %c8, %c0_83, %c0_84] : memref<2x16x8x128xf32, #tpu.memory_space<vmem>>, vector<1x1x8x128xf32>
    %383 = vector.shape_cast %382 : vector<1x1x8x128xf32> to vector<8x128xf32>
    %384 = vector.shape_cast %379 : vector<8x128xf32> to vector<1x1x8x128xf32>
    tpu.vector_store %arg7[%c0_82, %c8, %c0_83, %c0_84], %384 {strides = array<i32>} : memref<2x16x8x128xf32, #tpu.memory_space<vmem>>, vector<1x1x8x128xf32>,
    %c0_85 = arith.constant 0 : index
    %c9 = arith.constant 9 : index
    %c0_86 = arith.constant 0 : index
    %c0_87 = arith.constant 0 : index
    %385 = vector.load %arg7[%c0_85, %c9, %c0_86, %c0_87] : memref<2x16x8x128xf32, #tpu.memory_space<vmem>>, vector<1x1x8x128xf32>
    %386 = vector.shape_cast %385 : vector<1x1x8x128xf32> to vector<8x128xf32>
    %387 = vector.shape_cast %381 : vector<8x128xf32> to vector<1x1x8x128xf32>
    tpu.vector_store %arg7[%c0_85, %c9, %c0_86, %c0_87], %387 {strides = array<i32>} : memref<2x16x8x128xf32, #tpu.memory_space<vmem>>, vector<1x1x8x128xf32>,
    %388 = vector.broadcast %219 : f32 to vector<8x128xf32>
    %389 = arith.subf %388, %336 : vector<8x128xf32>
    %390 = vector.broadcast %223 : f32 to vector<8x128xf32>
    %391 = arith.subf %390, %337 : vector<8x128xf32>
    %c0_88 = arith.constant 0 : index
    %c10 = arith.constant 10 : index
    %c0_89 = arith.constant 0 : index
    %c0_90 = arith.constant 0 : index
    %392 = vector.load %arg7[%c0_88, %c10, %c0_89, %c0_90] : memref<2x16x8x128xf32, #tpu.memory_space<vmem>>, vector<1x1x8x128xf32>
    %393 = vector.shape_cast %392 : vector<1x1x8x128xf32> to vector<8x128xf32>
    %394 = vector.shape_cast %389 : vector<8x128xf32> to vector<1x1x8x128xf32>
    tpu.vector_store %arg7[%c0_88, %c10, %c0_89, %c0_90], %394 {strides = array<i32>} : memref<2x16x8x128xf32, #tpu.memory_space<vmem>>, vector<1x1x8x128xf32>,
    %c0_91 = arith.constant 0 : index
    %c11 = arith.constant 11 : index
    %c0_92 = arith.constant 0 : index
    %c0_93 = arith.constant 0 : index
    %395 = vector.load %arg7[%c0_91, %c11, %c0_92, %c0_93] : memref<2x16x8x128xf32, #tpu.memory_space<vmem>>, vector<1x1x8x128xf32>
    %396 = vector.shape_cast %395 : vector<1x1x8x128xf32> to vector<8x128xf32>
    %397 = vector.shape_cast %391 : vector<8x128xf32> to vector<1x1x8x128xf32>
    tpu.vector_store %arg7[%c0_91, %c11, %c0_92, %c0_93], %397 {strides = array<i32>} : memref<2x16x8x128xf32, #tpu.memory_space<vmem>>, vector<1x1x8x128xf32>,
    %398 = vector.broadcast %258 : f32 to vector<8x128xf32>
    %399 = arith.subf %398, %336 : vector<8x128xf32>
    %400 = vector.broadcast %262 : f32 to vector<8x128xf32>
    %401 = arith.subf %400, %337 : vector<8x128xf32>
    %c0_94 = arith.constant 0 : index
    %c12 = arith.constant 12 : index
    %c0_95 = arith.constant 0 : index
    %c0_96 = arith.constant 0 : index
    %402 = vector.load %arg7[%c0_94, %c12, %c0_95, %c0_96] : memref<2x16x8x128xf32, #tpu.memory_space<vmem>>, vector<1x1x8x128xf32>
    %403 = vector.shape_cast %402 : vector<1x1x8x128xf32> to vector<8x128xf32>
    %404 = vector.shape_cast %399 : vector<8x128xf32> to vector<1x1x8x128xf32>
    tpu.vector_store %arg7[%c0_94, %c12, %c0_95, %c0_96], %404 {strides = array<i32>} : memref<2x16x8x128xf32, #tpu.memory_space<vmem>>, vector<1x1x8x128xf32>,
    %c0_97 = arith.constant 0 : index
    %c13 = arith.constant 13 : index
    %c0_98 = arith.constant 0 : index
    %c0_99 = arith.constant 0 : index
    %405 = vector.load %arg7[%c0_97, %c13, %c0_98, %c0_99] : memref<2x16x8x128xf32, #tpu.memory_space<vmem>>, vector<1x1x8x128xf32>
    %406 = vector.shape_cast %405 : vector<1x1x8x128xf32> to vector<8x128xf32>
    %407 = vector.shape_cast %401 : vector<8x128xf32> to vector<1x1x8x128xf32>
    tpu.vector_store %arg7[%c0_97, %c13, %c0_98, %c0_99], %407 {strides = array<i32>} : memref<2x16x8x128xf32, #tpu.memory_space<vmem>>, vector<1x1x8x128xf32>,
    %408 = vector.broadcast %297 : f32 to vector<8x128xf32>
    %409 = arith.subf %408, %336 : vector<8x128xf32>
    %410 = vector.broadcast %301 : f32 to vector<8x128xf32>
    %411 = arith.subf %410, %337 : vector<8x128xf32>
    %c0_100 = arith.constant 0 : index
    %c14 = arith.constant 14 : index
    %c0_101 = arith.constant 0 : index
    %c0_102 = arith.constant 0 : index
    %412 = vector.load %arg7[%c0_100, %c14, %c0_101, %c0_102] : memref<2x16x8x128xf32, #tpu.memory_space<vmem>>, vector<1x1x8x128xf32>
    %413 = vector.shape_cast %412 : vector<1x1x8x128xf32> to vector<8x128xf32>
    %414 = vector.shape_cast %409 : vector<8x128xf32> to vector<1x1x8x128xf32>
    tpu.vector_store %arg7[%c0_100, %c14, %c0_101, %c0_102], %414 {strides = array<i32>} : memref<2x16x8x128xf32, #tpu.memory_space<vmem>>, vector<1x1x8x128xf32>,
    %c0_103 = arith.constant 0 : index
    %c15 = arith.constant 15 : index
    %c0_104 = arith.constant 0 : index
    %c0_105 = arith.constant 0 : index
    %415 = vector.load %arg7[%c0_103, %c15, %c0_104, %c0_105] : memref<2x16x8x128xf32, #tpu.memory_space<vmem>>, vector<1x1x8x128xf32>
    %416 = vector.shape_cast %415 : vector<1x1x8x128xf32> to vector<8x128xf32>
    %417 = vector.shape_cast %411 : vector<8x128xf32> to vector<1x1x8x128xf32>
    tpu.vector_store %arg7[%c0_103, %c15, %c0_104, %c0_105], %417 {strides = array<i32>} : memref<2x16x8x128xf32, #tpu.memory_space<vmem>>, vector<1x1x8x128xf32>,
    %c0_i32_106 = arith.constant 0 : i32
    %418 = arith.addi %14, %c0_i32_106 : i32
    %419 = arith.index_cast %418 : i32 to index
    %420 = memref.load %arg1[%419] : memref<32xf32, #tpu.memory_space<smem>>
    %c0_i32_107 = arith.constant 0 : i32
    %421 = arith.addi %14, %c0_i32_107 : i32
    %c1_i32_108 = arith.constant 1 : i32
    %422 = arith.addi %421, %c1_i32_108 : i32
    %423 = arith.index_cast %422 : i32 to index
    %424 = memref.load %arg1[%423] : memref<32xf32, #tpu.memory_space<smem>>
    %425 = arith.mulf %42, %331 : vector<8x128xf32>
    %c0_109 = arith.constant 0 : index
    %c0_110 = arith.constant 0 : index
    %c0_111 = arith.constant 0 : index
    %c0_112 = arith.constant 0 : index
    %426 = vector.load %arg5[%c0_109, %c0_110, %c0_111, %c0_112] : memref<2x8x8x128xf32, #tpu.memory_space<vmem>>, vector<1x1x8x128xf32>
    %427 = vector.shape_cast %426 : vector<1x1x8x128xf32> to vector<8x128xf32>
    %428 = vector.shape_cast %425 : vector<8x128xf32> to vector<1x1x8x128xf32>
    tpu.vector_store %arg5[%c0_109, %c0_110, %c0_111, %c0_112], %428 {strides = array<i32>} : memref<2x8x8x128xf32, #tpu.memory_space<vmem>>, vector<1x1x8x128xf32>,
    %429 = vector.broadcast %420 : f32 to vector<8x128xf32>
    %430 = arith.subf %429, %333 : vector<8x128xf32>
    %431 = vector.broadcast %424 : f32 to vector<8x128xf32>
    %432 = arith.subf %431, %335 : vector<8x128xf32>
    %433 = arith.mulf %425, %430 : vector<8x128xf32>
    %434 = arith.mulf %425, %432 : vector<8x128xf32>
    %c0_113 = arith.constant 0 : index
    %c0_114 = arith.constant 0 : index
    %c0_115 = arith.constant 0 : index
    %c0_116 = arith.constant 0 : index
    %435 = vector.load %arg6[%c0_113, %c0_114, %c0_115, %c0_116] : memref<2x16x8x128xf32, #tpu.memory_space<vmem>>, vector<1x1x8x128xf32>
    %436 = vector.shape_cast %435 : vector<1x1x8x128xf32> to vector<8x128xf32>
    %437 = vector.shape_cast %433 : vector<8x128xf32> to vector<1x1x8x128xf32>
    tpu.vector_store %arg6[%c0_113, %c0_114, %c0_115, %c0_116], %437 {strides = array<i32>} : memref<2x16x8x128xf32, #tpu.memory_space<vmem>>, vector<1x1x8x128xf32>,
    %c0_117 = arith.constant 0 : index
    %c1_118 = arith.constant 1 : index
    %c0_119 = arith.constant 0 : index
    %c0_120 = arith.constant 0 : index
    %438 = vector.load %arg6[%c0_117, %c1_118, %c0_119, %c0_120] : memref<2x16x8x128xf32, #tpu.memory_space<vmem>>, vector<1x1x8x128xf32>
    %439 = vector.shape_cast %438 : vector<1x1x8x128xf32> to vector<8x128xf32>
    %440 = vector.shape_cast %434 : vector<8x128xf32> to vector<1x1x8x128xf32>
    tpu.vector_store %arg6[%c0_117, %c1_118, %c0_119, %c0_120], %440 {strides = array<i32>} : memref<2x16x8x128xf32, #tpu.memory_space<vmem>>, vector<1x1x8x128xf32>,
    %441 = arith.mulf %430, %433 : vector<8x128xf32>
    %442 = arith.addf %11, %441 : vector<8x128xf32>
    %443 = arith.mulf %430, %434 : vector<8x128xf32>
    %444 = arith.addf %11, %443 : vector<8x128xf32>
    %445 = arith.mulf %432, %434 : vector<8x128xf32>
    %446 = arith.addf %11, %445 : vector<8x128xf32>
    %447 = arith.mulf %433, %339 : vector<8x128xf32>
    %448 = arith.addf %11, %447 : vector<8x128xf32>
    %449 = arith.mulf %434, %339 : vector<8x128xf32>
    %450 = arith.addf %11, %449 : vector<8x128xf32>
    %451 = arith.mulf %433, %341 : vector<8x128xf32>
    %452 = arith.addf %11, %451 : vector<8x128xf32>
    %453 = arith.mulf %434, %341 : vector<8x128xf32>
    %454 = arith.addf %11, %453 : vector<8x128xf32>
    %c2_i32_121 = arith.constant 2 : i32
    %455 = arith.addi %14, %c2_i32_121 : i32
    %456 = arith.index_cast %455 : i32 to index
    %457 = memref.load %arg1[%456] : memref<32xf32, #tpu.memory_space<smem>>
    %c2_i32_122 = arith.constant 2 : i32
    %458 = arith.addi %14, %c2_i32_122 : i32
    %c1_i32_123 = arith.constant 1 : i32
    %459 = arith.addi %458, %c1_i32_123 : i32
    %460 = arith.index_cast %459 : i32 to index
    %461 = memref.load %arg1[%460] : memref<32xf32, #tpu.memory_space<smem>>
    %462 = arith.mulf %81, %331 : vector<8x128xf32>
    %c0_124 = arith.constant 0 : index
    %c1_125 = arith.constant 1 : index
    %c0_126 = arith.constant 0 : index
    %c0_127 = arith.constant 0 : index
    %463 = vector.load %arg5[%c0_124, %c1_125, %c0_126, %c0_127] : memref<2x8x8x128xf32, #tpu.memory_space<vmem>>, vector<1x1x8x128xf32>
    %464 = vector.shape_cast %463 : vector<1x1x8x128xf32> to vector<8x128xf32>
    %465 = vector.shape_cast %462 : vector<8x128xf32> to vector<1x1x8x128xf32>
    tpu.vector_store %arg5[%c0_124, %c1_125, %c0_126, %c0_127], %465 {strides = array<i32>} : memref<2x8x8x128xf32, #tpu.memory_space<vmem>>, vector<1x1x8x128xf32>,
    %466 = vector.broadcast %457 : f32 to vector<8x128xf32>
    %467 = arith.subf %466, %333 : vector<8x128xf32>
    %468 = vector.broadcast %461 : f32 to vector<8x128xf32>
    %469 = arith.subf %468, %335 : vector<8x128xf32>
    %470 = arith.mulf %462, %467 : vector<8x128xf32>
    %471 = arith.mulf %462, %469 : vector<8x128xf32>
    %c0_128 = arith.constant 0 : index
    %c2_129 = arith.constant 2 : index
    %c0_130 = arith.constant 0 : index
    %c0_131 = arith.constant 0 : index
    %472 = vector.load %arg6[%c0_128, %c2_129, %c0_130, %c0_131] : memref<2x16x8x128xf32, #tpu.memory_space<vmem>>, vector<1x1x8x128xf32>
    %473 = vector.shape_cast %472 : vector<1x1x8x128xf32> to vector<8x128xf32>
    %474 = vector.shape_cast %470 : vector<8x128xf32> to vector<1x1x8x128xf32>
    tpu.vector_store %arg6[%c0_128, %c2_129, %c0_130, %c0_131], %474 {strides = array<i32>} : memref<2x16x8x128xf32, #tpu.memory_space<vmem>>, vector<1x1x8x128xf32>,
    %c0_132 = arith.constant 0 : index
    %c3_133 = arith.constant 3 : index
    %c0_134 = arith.constant 0 : index
    %c0_135 = arith.constant 0 : index
    %475 = vector.load %arg6[%c0_132, %c3_133, %c0_134, %c0_135] : memref<2x16x8x128xf32, #tpu.memory_space<vmem>>, vector<1x1x8x128xf32>
    %476 = vector.shape_cast %475 : vector<1x1x8x128xf32> to vector<8x128xf32>
    %477 = vector.shape_cast %471 : vector<8x128xf32> to vector<1x1x8x128xf32>
    tpu.vector_store %arg6[%c0_132, %c3_133, %c0_134, %c0_135], %477 {strides = array<i32>} : memref<2x16x8x128xf32, #tpu.memory_space<vmem>>, vector<1x1x8x128xf32>,
    %478 = arith.mulf %467, %470 : vector<8x128xf32>
    %479 = arith.addf %442, %478 : vector<8x128xf32>
    %480 = arith.mulf %467, %471 : vector<8x128xf32>
    %481 = arith.addf %444, %480 : vector<8x128xf32>
    %482 = arith.mulf %469, %471 : vector<8x128xf32>
    %483 = arith.addf %446, %482 : vector<8x128xf32>
    %484 = arith.mulf %470, %349 : vector<8x128xf32>
    %485 = arith.addf %448, %484 : vector<8x128xf32>
    %486 = arith.mulf %471, %349 : vector<8x128xf32>
    %487 = arith.addf %450, %486 : vector<8x128xf32>
    %488 = arith.mulf %470, %351 : vector<8x128xf32>
    %489 = arith.addf %452, %488 : vector<8x128xf32>
    %490 = arith.mulf %471, %351 : vector<8x128xf32>
    %491 = arith.addf %454, %490 : vector<8x128xf32>
    %c4_i32_136 = arith.constant 4 : i32
    %492 = arith.addi %14, %c4_i32_136 : i32
    %493 = arith.index_cast %492 : i32 to index
    %494 = memref.load %arg1[%493] : memref<32xf32, #tpu.memory_space<smem>>
    %c4_i32_137 = arith.constant 4 : i32
    %495 = arith.addi %14, %c4_i32_137 : i32
    %c1_i32_138 = arith.constant 1 : i32
    %496 = arith.addi %495, %c1_i32_138 : i32
    %497 = arith.index_cast %496 : i32 to index
    %498 = memref.load %arg1[%497] : memref<32xf32, #tpu.memory_space<smem>>
    %499 = arith.mulf %120, %331 : vector<8x128xf32>
    %c0_139 = arith.constant 0 : index
    %c2_140 = arith.constant 2 : index
    %c0_141 = arith.constant 0 : index
    %c0_142 = arith.constant 0 : index
    %500 = vector.load %arg5[%c0_139, %c2_140, %c0_141, %c0_142] : memref<2x8x8x128xf32, #tpu.memory_space<vmem>>, vector<1x1x8x128xf32>
    %501 = vector.shape_cast %500 : vector<1x1x8x128xf32> to vector<8x128xf32>
    %502 = vector.shape_cast %499 : vector<8x128xf32> to vector<1x1x8x128xf32>
    tpu.vector_store %arg5[%c0_139, %c2_140, %c0_141, %c0_142], %502 {strides = array<i32>} : memref<2x8x8x128xf32, #tpu.memory_space<vmem>>, vector<1x1x8x128xf32>,
    %503 = vector.broadcast %494 : f32 to vector<8x128xf32>
    %504 = arith.subf %503, %333 : vector<8x128xf32>
    %505 = vector.broadcast %498 : f32 to vector<8x128xf32>
    %506 = arith.subf %505, %335 : vector<8x128xf32>
    %507 = arith.mulf %499, %504 : vector<8x128xf32>
    %508 = arith.mulf %499, %506 : vector<8x128xf32>
    %c0_143 = arith.constant 0 : index
    %c4_144 = arith.constant 4 : index
    %c0_145 = arith.constant 0 : index
    %c0_146 = arith.constant 0 : index
    %509 = vector.load %arg6[%c0_143, %c4_144, %c0_145, %c0_146] : memref<2x16x8x128xf32, #tpu.memory_space<vmem>>, vector<1x1x8x128xf32>
    %510 = vector.shape_cast %509 : vector<1x1x8x128xf32> to vector<8x128xf32>
    %511 = vector.shape_cast %507 : vector<8x128xf32> to vector<1x1x8x128xf32>
    tpu.vector_store %arg6[%c0_143, %c4_144, %c0_145, %c0_146], %511 {strides = array<i32>} : memref<2x16x8x128xf32, #tpu.memory_space<vmem>>, vector<1x1x8x128xf32>,
    %c0_147 = arith.constant 0 : index
    %c5_148 = arith.constant 5 : index
    %c0_149 = arith.constant 0 : index
    %c0_150 = arith.constant 0 : index
    %512 = vector.load %arg6[%c0_147, %c5_148, %c0_149, %c0_150] : memref<2x16x8x128xf32, #tpu.memory_space<vmem>>, vector<1x1x8x128xf32>
    %513 = vector.shape_cast %512 : vector<1x1x8x128xf32> to vector<8x128xf32>
    %514 = vector.shape_cast %508 : vector<8x128xf32> to vector<1x1x8x128xf32>
    tpu.vector_store %arg6[%c0_147, %c5_148, %c0_149, %c0_150], %514 {strides = array<i32>} : memref<2x16x8x128xf32, #tpu.memory_space<vmem>>, vector<1x1x8x128xf32>,
    %515 = arith.mulf %504, %507 : vector<8x128xf32>
    %516 = arith.addf %479, %515 : vector<8x128xf32>
    %517 = arith.mulf %504, %508 : vector<8x128xf32>
    %518 = arith.addf %481, %517 : vector<8x128xf32>
    %519 = arith.mulf %506, %508 : vector<8x128xf32>
    %520 = arith.addf %483, %519 : vector<8x128xf32>
    %521 = arith.mulf %507, %359 : vector<8x128xf32>
    %522 = arith.addf %485, %521 : vector<8x128xf32>
    %523 = arith.mulf %508, %359 : vector<8x128xf32>
    %524 = arith.addf %487, %523 : vector<8x128xf32>
    %525 = arith.mulf %507, %361 : vector<8x128xf32>
    %526 = arith.addf %489, %525 : vector<8x128xf32>
    %527 = arith.mulf %508, %361 : vector<8x128xf32>
    %528 = arith.addf %491, %527 : vector<8x128xf32>
    %c6_i32_151 = arith.constant 6 : i32
    %529 = arith.addi %14, %c6_i32_151 : i32
    %530 = arith.index_cast %529 : i32 to index
    %531 = memref.load %arg1[%530] : memref<32xf32, #tpu.memory_space<smem>>
    %c6_i32_152 = arith.constant 6 : i32
    %532 = arith.addi %14, %c6_i32_152 : i32
    %c1_i32_153 = arith.constant 1 : i32
    %533 = arith.addi %532, %c1_i32_153 : i32
    %534 = arith.index_cast %533 : i32 to index
    %535 = memref.load %arg1[%534] : memref<32xf32, #tpu.memory_space<smem>>
    %536 = arith.mulf %159, %331 : vector<8x128xf32>
    %c0_154 = arith.constant 0 : index
    %c3_155 = arith.constant 3 : index
    %c0_156 = arith.constant 0 : index
    %c0_157 = arith.constant 0 : index
    %537 = vector.load %arg5[%c0_154, %c3_155, %c0_156, %c0_157] : memref<2x8x8x128xf32, #tpu.memory_space<vmem>>, vector<1x1x8x128xf32>
    %538 = vector.shape_cast %537 : vector<1x1x8x128xf32> to vector<8x128xf32>
    %539 = vector.shape_cast %536 : vector<8x128xf32> to vector<1x1x8x128xf32>
    tpu.vector_store %arg5[%c0_154, %c3_155, %c0_156, %c0_157], %539 {strides = array<i32>} : memref<2x8x8x128xf32, #tpu.memory_space<vmem>>, vector<1x1x8x128xf32>,
    %540 = vector.broadcast %531 : f32 to vector<8x128xf32>
    %541 = arith.subf %540, %333 : vector<8x128xf32>
    %542 = vector.broadcast %535 : f32 to vector<8x128xf32>
    %543 = arith.subf %542, %335 : vector<8x128xf32>
    %544 = arith.mulf %536, %541 : vector<8x128xf32>
    %545 = arith.mulf %536, %543 : vector<8x128xf32>
    %c0_158 = arith.constant 0 : index
    %c6_159 = arith.constant 6 : index
    %c0_160 = arith.constant 0 : index
    %c0_161 = arith.constant 0 : index
    %546 = vector.load %arg6[%c0_158, %c6_159, %c0_160, %c0_161] : memref<2x16x8x128xf32, #tpu.memory_space<vmem>>, vector<1x1x8x128xf32>
    %547 = vector.shape_cast %546 : vector<1x1x8x128xf32> to vector<8x128xf32>
    %548 = vector.shape_cast %544 : vector<8x128xf32> to vector<1x1x8x128xf32>
    tpu.vector_store %arg6[%c0_158, %c6_159, %c0_160, %c0_161], %548 {strides = array<i32>} : memref<2x16x8x128xf32, #tpu.memory_space<vmem>>, vector<1x1x8x128xf32>,
    %c0_162 = arith.constant 0 : index
    %c7_163 = arith.constant 7 : index
    %c0_164 = arith.constant 0 : index
    %c0_165 = arith.constant 0 : index
    %549 = vector.load %arg6[%c0_162, %c7_163, %c0_164, %c0_165] : memref<2x16x8x128xf32, #tpu.memory_space<vmem>>, vector<1x1x8x128xf32>
    %550 = vector.shape_cast %549 : vector<1x1x8x128xf32> to vector<8x128xf32>
    %551 = vector.shape_cast %545 : vector<8x128xf32> to vector<1x1x8x128xf32>
    tpu.vector_store %arg6[%c0_162, %c7_163, %c0_164, %c0_165], %551 {strides = array<i32>} : memref<2x16x8x128xf32, #tpu.memory_space<vmem>>, vector<1x1x8x128xf32>,
    %552 = arith.mulf %541, %544 : vector<8x128xf32>
    %553 = arith.addf %516, %552 : vector<8x128xf32>
    %554 = arith.mulf %541, %545 : vector<8x128xf32>
    %555 = arith.addf %518, %554 : vector<8x128xf32>
    %556 = arith.mulf %543, %545 : vector<8x128xf32>
    %557 = arith.addf %520, %556 : vector<8x128xf32>
    %558 = arith.mulf %544, %369 : vector<8x128xf32>
    %559 = arith.addf %522, %558 : vector<8x128xf32>
    %560 = arith.mulf %545, %369 : vector<8x128xf32>
    %561 = arith.addf %524, %560 : vector<8x128xf32>
    %562 = arith.mulf %544, %371 : vector<8x128xf32>
    %563 = arith.addf %526, %562 : vector<8x128xf32>
    %564 = arith.mulf %545, %371 : vector<8x128xf32>
    %565 = arith.addf %528, %564 : vector<8x128xf32>
    %c8_i32_166 = arith.constant 8 : i32
    %566 = arith.addi %14, %c8_i32_166 : i32
    %567 = arith.index_cast %566 : i32 to index
    %568 = memref.load %arg1[%567] : memref<32xf32, #tpu.memory_space<smem>>
    %c8_i32_167 = arith.constant 8 : i32
    %569 = arith.addi %14, %c8_i32_167 : i32
    %c1_i32_168 = arith.constant 1 : i32
    %570 = arith.addi %569, %c1_i32_168 : i32
    %571 = arith.index_cast %570 : i32 to index
    %572 = memref.load %arg1[%571] : memref<32xf32, #tpu.memory_space<smem>>
    %573 = arith.mulf %198, %331 : vector<8x128xf32>
    %c0_169 = arith.constant 0 : index
    %c4_170 = arith.constant 4 : index
    %c0_171 = arith.constant 0 : index
    %c0_172 = arith.constant 0 : index
    %574 = vector.load %arg5[%c0_169, %c4_170, %c0_171, %c0_172] : memref<2x8x8x128xf32, #tpu.memory_space<vmem>>, vector<1x1x8x128xf32>
    %575 = vector.shape_cast %574 : vector<1x1x8x128xf32> to vector<8x128xf32>
    %576 = vector.shape_cast %573 : vector<8x128xf32> to vector<1x1x8x128xf32>
    tpu.vector_store %arg5[%c0_169, %c4_170, %c0_171, %c0_172], %576 {strides = array<i32>} : memref<2x8x8x128xf32, #tpu.memory_space<vmem>>, vector<1x1x8x128xf32>,
    %577 = vector.broadcast %568 : f32 to vector<8x128xf32>
    %578 = arith.subf %577, %333 : vector<8x128xf32>
    %579 = vector.broadcast %572 : f32 to vector<8x128xf32>
    %580 = arith.subf %579, %335 : vector<8x128xf32>
    %581 = arith.mulf %573, %578 : vector<8x128xf32>
    %582 = arith.mulf %573, %580 : vector<8x128xf32>
    %c0_173 = arith.constant 0 : index
    %c8_174 = arith.constant 8 : index
    %c0_175 = arith.constant 0 : index
    %c0_176 = arith.constant 0 : index
    %583 = vector.load %arg6[%c0_173, %c8_174, %c0_175, %c0_176] : memref<2x16x8x128xf32, #tpu.memory_space<vmem>>, vector<1x1x8x128xf32>
    %584 = vector.shape_cast %583 : vector<1x1x8x128xf32> to vector<8x128xf32>
    %585 = vector.shape_cast %581 : vector<8x128xf32> to vector<1x1x8x128xf32>
    tpu.vector_store %arg6[%c0_173, %c8_174, %c0_175, %c0_176], %585 {strides = array<i32>} : memref<2x16x8x128xf32, #tpu.memory_space<vmem>>, vector<1x1x8x128xf32>,
    %c0_177 = arith.constant 0 : index
    %c9_178 = arith.constant 9 : index
    %c0_179 = arith.constant 0 : index
    %c0_180 = arith.constant 0 : index
    %586 = vector.load %arg6[%c0_177, %c9_178, %c0_179, %c0_180] : memref<2x16x8x128xf32, #tpu.memory_space<vmem>>, vector<1x1x8x128xf32>
    %587 = vector.shape_cast %586 : vector<1x1x8x128xf32> to vector<8x128xf32>
    %588 = vector.shape_cast %582 : vector<8x128xf32> to vector<1x1x8x128xf32>
    tpu.vector_store %arg6[%c0_177, %c9_178, %c0_179, %c0_180], %588 {strides = array<i32>} : memref<2x16x8x128xf32, #tpu.memory_space<vmem>>, vector<1x1x8x128xf32>,
    %589 = arith.mulf %578, %581 : vector<8x128xf32>
    %590 = arith.addf %553, %589 : vector<8x128xf32>
    %591 = arith.mulf %578, %582 : vector<8x128xf32>
    %592 = arith.addf %555, %591 : vector<8x128xf32>
    %593 = arith.mulf %580, %582 : vector<8x128xf32>
    %594 = arith.addf %557, %593 : vector<8x128xf32>
    %595 = arith.mulf %581, %379 : vector<8x128xf32>
    %596 = arith.addf %559, %595 : vector<8x128xf32>
    %597 = arith.mulf %582, %379 : vector<8x128xf32>
    %598 = arith.addf %561, %597 : vector<8x128xf32>
    %599 = arith.mulf %581, %381 : vector<8x128xf32>
    %600 = arith.addf %563, %599 : vector<8x128xf32>
    %601 = arith.mulf %582, %381 : vector<8x128xf32>
    %602 = arith.addf %565, %601 : vector<8x128xf32>
    %c10_i32_181 = arith.constant 10 : i32
    %603 = arith.addi %14, %c10_i32_181 : i32
    %604 = arith.index_cast %603 : i32 to index
    %605 = memref.load %arg1[%604] : memref<32xf32, #tpu.memory_space<smem>>
    %c10_i32_182 = arith.constant 10 : i32
    %606 = arith.addi %14, %c10_i32_182 : i32
    %c1_i32_183 = arith.constant 1 : i32
    %607 = arith.addi %606, %c1_i32_183 : i32
    %608 = arith.index_cast %607 : i32 to index
    %609 = memref.load %arg1[%608] : memref<32xf32, #tpu.memory_space<smem>>
    %610 = arith.mulf %237, %331 : vector<8x128xf32>
    %c0_184 = arith.constant 0 : index
    %c5_185 = arith.constant 5 : index
    %c0_186 = arith.constant 0 : index
    %c0_187 = arith.constant 0 : index
    %611 = vector.load %arg5[%c0_184, %c5_185, %c0_186, %c0_187] : memref<2x8x8x128xf32, #tpu.memory_space<vmem>>, vector<1x1x8x128xf32>
    %612 = vector.shape_cast %611 : vector<1x1x8x128xf32> to vector<8x128xf32>
    %613 = vector.shape_cast %610 : vector<8x128xf32> to vector<1x1x8x128xf32>
    tpu.vector_store %arg5[%c0_184, %c5_185, %c0_186, %c0_187], %613 {strides = array<i32>} : memref<2x8x8x128xf32, #tpu.memory_space<vmem>>, vector<1x1x8x128xf32>,
    %614 = vector.broadcast %605 : f32 to vector<8x128xf32>
    %615 = arith.subf %614, %333 : vector<8x128xf32>
    %616 = vector.broadcast %609 : f32 to vector<8x128xf32>
    %617 = arith.subf %616, %335 : vector<8x128xf32>
    %618 = arith.mulf %610, %615 : vector<8x128xf32>
    %619 = arith.mulf %610, %617 : vector<8x128xf32>
    %c0_188 = arith.constant 0 : index
    %c10_189 = arith.constant 10 : index
    %c0_190 = arith.constant 0 : index
    %c0_191 = arith.constant 0 : index
    %620 = vector.load %arg6[%c0_188, %c10_189, %c0_190, %c0_191] : memref<2x16x8x128xf32, #tpu.memory_space<vmem>>, vector<1x1x8x128xf32>
    %621 = vector.shape_cast %620 : vector<1x1x8x128xf32> to vector<8x128xf32>
    %622 = vector.shape_cast %618 : vector<8x128xf32> to vector<1x1x8x128xf32>
    tpu.vector_store %arg6[%c0_188, %c10_189, %c0_190, %c0_191], %622 {strides = array<i32>} : memref<2x16x8x128xf32, #tpu.memory_space<vmem>>, vector<1x1x8x128xf32>,
    %c0_192 = arith.constant 0 : index
    %c11_193 = arith.constant 11 : index
    %c0_194 = arith.constant 0 : index
    %c0_195 = arith.constant 0 : index
    %623 = vector.load %arg6[%c0_192, %c11_193, %c0_194, %c0_195] : memref<2x16x8x128xf32, #tpu.memory_space<vmem>>, vector<1x1x8x128xf32>
    %624 = vector.shape_cast %623 : vector<1x1x8x128xf32> to vector<8x128xf32>
    %625 = vector.shape_cast %619 : vector<8x128xf32> to vector<1x1x8x128xf32>
    tpu.vector_store %arg6[%c0_192, %c11_193, %c0_194, %c0_195], %625 {strides = array<i32>} : memref<2x16x8x128xf32, #tpu.memory_space<vmem>>, vector<1x1x8x128xf32>,
    %626 = arith.mulf %615, %618 : vector<8x128xf32>
    %627 = arith.addf %590, %626 : vector<8x128xf32>
    %628 = arith.mulf %615, %619 : vector<8x128xf32>
    %629 = arith.addf %592, %628 : vector<8x128xf32>
    %630 = arith.mulf %617, %619 : vector<8x128xf32>
    %631 = arith.addf %594, %630 : vector<8x128xf32>
    %632 = arith.mulf %618, %389 : vector<8x128xf32>
    %633 = arith.addf %596, %632 : vector<8x128xf32>
    %634 = arith.mulf %619, %389 : vector<8x128xf32>
    %635 = arith.addf %598, %634 : vector<8x128xf32>
    %636 = arith.mulf %618, %391 : vector<8x128xf32>
    %637 = arith.addf %600, %636 : vector<8x128xf32>
    %638 = arith.mulf %619, %391 : vector<8x128xf32>
    %639 = arith.addf %602, %638 : vector<8x128xf32>
    %c12_i32_196 = arith.constant 12 : i32
    %640 = arith.addi %14, %c12_i32_196 : i32
    %641 = arith.index_cast %640 : i32 to index
    %642 = memref.load %arg1[%641] : memref<32xf32, #tpu.memory_space<smem>>
    %c12_i32_197 = arith.constant 12 : i32
    %643 = arith.addi %14, %c12_i32_197 : i32
    %c1_i32_198 = arith.constant 1 : i32
    %644 = arith.addi %643, %c1_i32_198 : i32
    %645 = arith.index_cast %644 : i32 to index
    %646 = memref.load %arg1[%645] : memref<32xf32, #tpu.memory_space<smem>>
    %647 = arith.mulf %276, %331 : vector<8x128xf32>
    %c0_199 = arith.constant 0 : index
    %c6_200 = arith.constant 6 : index
    %c0_201 = arith.constant 0 : index
    %c0_202 = arith.constant 0 : index
    %648 = vector.load %arg5[%c0_199, %c6_200, %c0_201, %c0_202] : memref<2x8x8x128xf32, #tpu.memory_space<vmem>>, vector<1x1x8x128xf32>
    %649 = vector.shape_cast %648 : vector<1x1x8x128xf32> to vector<8x128xf32>
    %650 = vector.shape_cast %647 : vector<8x128xf32> to vector<1x1x8x128xf32>
    tpu.vector_store %arg5[%c0_199, %c6_200, %c0_201, %c0_202], %650 {strides = array<i32>} : memref<2x8x8x128xf32, #tpu.memory_space<vmem>>, vector<1x1x8x128xf32>,
    %651 = vector.broadcast %642 : f32 to vector<8x128xf32>
    %652 = arith.subf %651, %333 : vector<8x128xf32>
    %653 = vector.broadcast %646 : f32 to vector<8x128xf32>
    %654 = arith.subf %653, %335 : vector<8x128xf32>
    %655 = arith.mulf %647, %652 : vector<8x128xf32>
    %656 = arith.mulf %647, %654 : vector<8x128xf32>
    %c0_203 = arith.constant 0 : index
    %c12_204 = arith.constant 12 : index
    %c0_205 = arith.constant 0 : index
    %c0_206 = arith.constant 0 : index
    %657 = vector.load %arg6[%c0_203, %c12_204, %c0_205, %c0_206] : memref<2x16x8x128xf32, #tpu.memory_space<vmem>>, vector<1x1x8x128xf32>
    %658 = vector.shape_cast %657 : vector<1x1x8x128xf32> to vector<8x128xf32>
    %659 = vector.shape_cast %655 : vector<8x128xf32> to vector<1x1x8x128xf32>
    tpu.vector_store %arg6[%c0_203, %c12_204, %c0_205, %c0_206], %659 {strides = array<i32>} : memref<2x16x8x128xf32, #tpu.memory_space<vmem>>, vector<1x1x8x128xf32>,
    %c0_207 = arith.constant 0 : index
    %c13_208 = arith.constant 13 : index
    %c0_209 = arith.constant 0 : index
    %c0_210 = arith.constant 0 : index
    %660 = vector.load %arg6[%c0_207, %c13_208, %c0_209, %c0_210] : memref<2x16x8x128xf32, #tpu.memory_space<vmem>>, vector<1x1x8x128xf32>
    %661 = vector.shape_cast %660 : vector<1x1x8x128xf32> to vector<8x128xf32>
    %662 = vector.shape_cast %656 : vector<8x128xf32> to vector<1x1x8x128xf32>
    tpu.vector_store %arg6[%c0_207, %c13_208, %c0_209, %c0_210], %662 {strides = array<i32>} : memref<2x16x8x128xf32, #tpu.memory_space<vmem>>, vector<1x1x8x128xf32>,
    %663 = arith.mulf %652, %655 : vector<8x128xf32>
    %664 = arith.addf %627, %663 : vector<8x128xf32>
    %665 = arith.mulf %652, %656 : vector<8x128xf32>
    %666 = arith.addf %629, %665 : vector<8x128xf32>
    %667 = arith.mulf %654, %656 : vector<8x128xf32>
    %668 = arith.addf %631, %667 : vector<8x128xf32>
    %669 = arith.mulf %655, %399 : vector<8x128xf32>
    %670 = arith.addf %633, %669 : vector<8x128xf32>
    %671 = arith.mulf %656, %399 : vector<8x128xf32>
    %672 = arith.addf %635, %671 : vector<8x128xf32>
    %673 = arith.mulf %655, %401 : vector<8x128xf32>
    %674 = arith.addf %637, %673 : vector<8x128xf32>
    %675 = arith.mulf %656, %401 : vector<8x128xf32>
    %676 = arith.addf %639, %675 : vector<8x128xf32>
    %c14_i32_211 = arith.constant 14 : i32
    %677 = arith.addi %14, %c14_i32_211 : i32
    %678 = arith.index_cast %677 : i32 to index
    %679 = memref.load %arg1[%678] : memref<32xf32, #tpu.memory_space<smem>>
    %c14_i32_212 = arith.constant 14 : i32
    %680 = arith.addi %14, %c14_i32_212 : i32
    %c1_i32_213 = arith.constant 1 : i32
    %681 = arith.addi %680, %c1_i32_213 : i32
    %682 = arith.index_cast %681 : i32 to index
    %683 = memref.load %arg1[%682] : memref<32xf32, #tpu.memory_space<smem>>
    %684 = arith.mulf %315, %331 : vector<8x128xf32>
    %c0_214 = arith.constant 0 : index
    %c7_215 = arith.constant 7 : index
    %c0_216 = arith.constant 0 : index
    %c0_217 = arith.constant 0 : index
    %685 = vector.load %arg5[%c0_214, %c7_215, %c0_216, %c0_217] : memref<2x8x8x128xf32, #tpu.memory_space<vmem>>, vector<1x1x8x128xf32>
    %686 = vector.shape_cast %685 : vector<1x1x8x128xf32> to vector<8x128xf32>
    %687 = vector.shape_cast %684 : vector<8x128xf32> to vector<1x1x8x128xf32>
    tpu.vector_store %arg5[%c0_214, %c7_215, %c0_216, %c0_217], %687 {strides = array<i32>} : memref<2x8x8x128xf32, #tpu.memory_space<vmem>>, vector<1x1x8x128xf32>,
    %688 = vector.broadcast %679 : f32 to vector<8x128xf32>
    %689 = arith.subf %688, %333 : vector<8x128xf32>
    %690 = vector.broadcast %683 : f32 to vector<8x128xf32>
    %691 = arith.subf %690, %335 : vector<8x128xf32>
    %692 = arith.mulf %684, %689 : vector<8x128xf32>
    %693 = arith.mulf %684, %691 : vector<8x128xf32>
    %c0_218 = arith.constant 0 : index
    %c14_219 = arith.constant 14 : index
    %c0_220 = arith.constant 0 : index
    %c0_221 = arith.constant 0 : index
    %694 = vector.load %arg6[%c0_218, %c14_219, %c0_220, %c0_221] : memref<2x16x8x128xf32, #tpu.memory_space<vmem>>, vector<1x1x8x128xf32>
    %695 = vector.shape_cast %694 : vector<1x1x8x128xf32> to vector<8x128xf32>
    %696 = vector.shape_cast %692 : vector<8x128xf32> to vector<1x1x8x128xf32>
    tpu.vector_store %arg6[%c0_218, %c14_219, %c0_220, %c0_221], %696 {strides = array<i32>} : memref<2x16x8x128xf32, #tpu.memory_space<vmem>>, vector<1x1x8x128xf32>,
    %c0_222 = arith.constant 0 : index
    %c15_223 = arith.constant 15 : index
    %c0_224 = arith.constant 0 : index
    %c0_225 = arith.constant 0 : index
    %697 = vector.load %arg6[%c0_222, %c15_223, %c0_224, %c0_225] : memref<2x16x8x128xf32, #tpu.memory_space<vmem>>, vector<1x1x8x128xf32>
    %698 = vector.shape_cast %697 : vector<1x1x8x128xf32> to vector<8x128xf32>
    %699 = vector.shape_cast %693 : vector<8x128xf32> to vector<1x1x8x128xf32>
    tpu.vector_store %arg6[%c0_222, %c15_223, %c0_224, %c0_225], %699 {strides = array<i32>} : memref<2x16x8x128xf32, #tpu.memory_space<vmem>>, vector<1x1x8x128xf32>,
    %700 = arith.mulf %689, %692 : vector<8x128xf32>
    %701 = arith.addf %664, %700 : vector<8x128xf32>
    %702 = arith.mulf %689, %693 : vector<8x128xf32>
    %703 = arith.addf %666, %702 : vector<8x128xf32>
    %704 = arith.mulf %691, %693 : vector<8x128xf32>
    %705 = arith.addf %668, %704 : vector<8x128xf32>
    %706 = arith.mulf %692, %409 : vector<8x128xf32>
    %707 = arith.addf %670, %706 : vector<8x128xf32>
    %708 = arith.mulf %693, %409 : vector<8x128xf32>
    %709 = arith.addf %672, %708 : vector<8x128xf32>
    %710 = arith.mulf %692, %411 : vector<8x128xf32>
    %711 = arith.addf %674, %710 : vector<8x128xf32>
    %712 = arith.mulf %693, %411 : vector<8x128xf32>
    %713 = arith.addf %676, %712 : vector<8x128xf32>
    %714 = arith.mulf %701, %705 : vector<8x128xf32>
    %715 = arith.mulf %703, %703 : vector<8x128xf32>
    %716 = arith.subf %714, %715 : vector<8x128xf32>
    %717 = tpu.reciprocal %716 {approx = true} : vector<8x128xf32> -> vector<8x128xf32>
    %718 = arith.mulf %716, %717 : vector<8x128xf32>
    %cst_226 = arith.constant 2.000000e+00 : f32
    %719 = vector.broadcast %cst_226 : f32 to vector<8x128xf32>
    %720 = arith.subf %719, %718 : vector<8x128xf32>
    %721 = arith.mulf %717, %720 : vector<8x128xf32>
    %722 = arith.subf %7, %333 : vector<8x128xf32>
    %723 = arith.subf %10, %335 : vector<8x128xf32>
    %724 = arith.mulf %722, %705 : vector<8x128xf32>
    %725 = arith.mulf %723, %703 : vector<8x128xf32>
    %726 = arith.subf %724, %725 : vector<8x128xf32>
    %727 = arith.mulf %726, %721 : vector<8x128xf32>
    %728 = arith.mulf %723, %701 : vector<8x128xf32>
    %729 = arith.mulf %722, %703 : vector<8x128xf32>
    %730 = arith.subf %728, %729 : vector<8x128xf32>
    %731 = arith.mulf %730, %721 : vector<8x128xf32>
    %732 = arith.mulf %727, %707 : vector<8x128xf32>
    %733 = arith.mulf %731, %709 : vector<8x128xf32>
    %734 = arith.addf %732, %733 : vector<8x128xf32>
    %735 = arith.addf %734, %336 : vector<8x128xf32>
    %736 = arith.mulf %727, %711 : vector<8x128xf32>
    %737 = arith.mulf %731, %713 : vector<8x128xf32>
    %738 = arith.addf %736, %737 : vector<8x128xf32>
    %739 = arith.addf %738, %337 : vector<8x128xf32>
    %cst_227 = arith.constant 0.000000e+00 : f32
    %740 = vector.broadcast %cst_227 : f32 to vector<8x128xf32>
    %741 = arith.cmpf oge, %735, %740 : vector<8x128xf32>
    %cst_228 = arith.constant 3.100000e+01 : f32
    %742 = vector.broadcast %cst_228 : f32 to vector<8x128xf32>
    %743 = arith.cmpf ole, %735, %742 : vector<8x128xf32>
    %744 = arith.andi %741, %743 : vector<8x128xi1>
    %cst_229 = arith.constant 0.000000e+00 : f32
    %745 = vector.broadcast %cst_229 : f32 to vector<8x128xf32>
    %746 = arith.select %744, %735, %745 : vector<8x128xi1>, vector<8x128xf32>
    %cst_230 = arith.constant 0.000000e+00 : f32
    %747 = vector.broadcast %cst_230 : f32 to vector<8x128xf32>
    %748 = arith.cmpf oge, %739, %747 : vector<8x128xf32>
    %cst_231 = arith.constant 3.100000e+01 : f32
    %749 = vector.broadcast %cst_231 : f32 to vector<8x128xf32>
    %750 = arith.cmpf ole, %739, %749 : vector<8x128xf32>
    %751 = arith.andi %748, %750 : vector<8x128xi1>
    %cst_232 = arith.constant 0.000000e+00 : f32
    %752 = vector.broadcast %cst_232 : f32 to vector<8x128xf32>
    %753 = arith.select %751, %739, %752 : vector<8x128xi1>, vector<8x128xf32>
    %c0_233 = arith.constant 0 : index
    %c0_234 = arith.constant 0 : index
    %c0_235 = arith.constant 0 : index
    %c0_236 = arith.constant 0 : index
    %754 = vector.load %arg3[%c0_233, %c0_234, %c0_235, %c0_236] : memref<2x2x8x128xf32, #tpu.memory_space<vmem>>, vector<1x1x8x128xf32>
    %755 = vector.shape_cast %754 : vector<1x1x8x128xf32> to vector<8x128xf32>
    %756 = vector.shape_cast %746 : vector<8x128xf32> to vector<1x1x8x128xf32>
    tpu.vector_store %arg3[%c0_233, %c0_234, %c0_235, %c0_236], %756 {strides = array<i32>} : memref<2x2x8x128xf32, #tpu.memory_space<vmem>>, vector<1x1x8x128xf32>,
    %c0_237 = arith.constant 0 : index
    %c1_238 = arith.constant 1 : index
    %c0_239 = arith.constant 0 : index
    %c0_240 = arith.constant 0 : index
    %757 = vector.load %arg3[%c0_237, %c1_238, %c0_239, %c0_240] : memref<2x2x8x128xf32, #tpu.memory_space<vmem>>, vector<1x1x8x128xf32>
    %758 = vector.shape_cast %757 : vector<1x1x8x128xf32> to vector<8x128xf32>
    %759 = vector.shape_cast %753 : vector<8x128xf32> to vector<1x1x8x128xf32>
    tpu.vector_store %arg3[%c0_237, %c1_238, %c0_239, %c0_240], %759 {strides = array<i32>} : memref<2x2x8x128xf32, #tpu.memory_space<vmem>>, vector<1x1x8x128xf32>,
    %c0_241 = arith.constant 0 : index
    %c0_242 = arith.constant 0 : index
    %c0_243 = arith.constant 0 : index
    %c0_244 = arith.constant 0 : index
    %760 = vector.load %arg4[%c0_241, %c0_242, %c0_243, %c0_244] : memref<2x4x8x128xf32, #tpu.memory_space<vmem>>, vector<1x1x8x128xf32>
    %761 = vector.shape_cast %760 : vector<1x1x8x128xf32> to vector<8x128xf32>
    %762 = vector.shape_cast %701 : vector<8x128xf32> to vector<1x1x8x128xf32>
    tpu.vector_store %arg4[%c0_241, %c0_242, %c0_243, %c0_244], %762 {strides = array<i32>} : memref<2x4x8x128xf32, #tpu.memory_space<vmem>>, vector<1x1x8x128xf32>,
    %c0_245 = arith.constant 0 : index
    %c1_246 = arith.constant 1 : index
    %c0_247 = arith.constant 0 : index
    %c0_248 = arith.constant 0 : index
    %763 = vector.load %arg4[%c0_245, %c1_246, %c0_247, %c0_248] : memref<2x4x8x128xf32, #tpu.memory_space<vmem>>, vector<1x1x8x128xf32>
    %764 = vector.shape_cast %763 : vector<1x1x8x128xf32> to vector<8x128xf32>
    %765 = vector.shape_cast %703 : vector<8x128xf32> to vector<1x1x8x128xf32>
    tpu.vector_store %arg4[%c0_245, %c1_246, %c0_247, %c0_248], %765 {strides = array<i32>} : memref<2x4x8x128xf32, #tpu.memory_space<vmem>>, vector<1x1x8x128xf32>,
    %c0_249 = arith.constant 0 : index
    %c2_250 = arith.constant 2 : index
    %c0_251 = arith.constant 0 : index
    %c0_252 = arith.constant 0 : index
    %766 = vector.load %arg4[%c0_249, %c2_250, %c0_251, %c0_252] : memref<2x4x8x128xf32, #tpu.memory_space<vmem>>, vector<1x1x8x128xf32>
    %767 = vector.shape_cast %766 : vector<1x1x8x128xf32> to vector<8x128xf32>
    %768 = vector.shape_cast %703 : vector<8x128xf32> to vector<1x1x8x128xf32>
    tpu.vector_store %arg4[%c0_249, %c2_250, %c0_251, %c0_252], %768 {strides = array<i32>} : memref<2x4x8x128xf32, #tpu.memory_space<vmem>>, vector<1x1x8x128xf32>,
    %c0_253 = arith.constant 0 : index
    %c3_254 = arith.constant 3 : index
    %c0_255 = arith.constant 0 : index
    %c0_256 = arith.constant 0 : index
    %769 = vector.load %arg4[%c0_253, %c3_254, %c0_255, %c0_256] : memref<2x4x8x128xf32, #tpu.memory_space<vmem>>, vector<1x1x8x128xf32>
    %770 = vector.shape_cast %769 : vector<1x1x8x128xf32> to vector<8x128xf32>
    %771 = vector.shape_cast %705 : vector<8x128xf32> to vector<1x1x8x128xf32>
    tpu.vector_store %arg4[%c0_253, %c3_254, %c0_255, %c0_256], %771 {strides = array<i32>} : memref<2x4x8x128xf32, #tpu.memory_space<vmem>>, vector<1x1x8x128xf32>,
    %c2_i32_257 = arith.constant 2 : i32
    %772 = arith.muli %arg0, %c2_i32_257 : i32
    %c1_i32_258 = arith.constant 1 : i32
    %773 = arith.addi %772, %c1_i32_258 : i32
    %c16_i32_259 = arith.constant 16 : i32
    %774 = arith.muli %773, %c16_i32_259 : i32
    %c0_i32_260 = arith.constant 0 : i32
    %775 = arith.addi %774, %c0_i32_260 : i32
    %776 = arith.index_cast %775 : i32 to index
    %777 = memref.load %arg1[%776] : memref<32xf32, #tpu.memory_space<smem>>
    %c0_i32_261 = arith.constant 0 : i32
    %778 = arith.addi %774, %c0_i32_261 : i32
    %c1_i32_262 = arith.constant 1 : i32
    %779 = arith.addi %778, %c1_i32_262 : i32
    %780 = arith.index_cast %779 : i32 to index
    %781 = memref.load %arg1[%780] : memref<32xf32, #tpu.memory_space<smem>>
    %c0_i32_263 = arith.constant 0 : i32
    %782 = arith.addi %774, %c0_i32_263 : i32
    %783 = arith.index_cast %782 : i32 to index
    %784 = memref.load %arg2[%783] : memref<32xf32, #tpu.memory_space<smem>>
    %c0_i32_264 = arith.constant 0 : i32
    %785 = arith.addi %774, %c0_i32_264 : i32
    %c1_i32_265 = arith.constant 1 : i32
    %786 = arith.addi %785, %c1_i32_265 : i32
    %787 = arith.index_cast %786 : i32 to index
    %788 = memref.load %arg2[%787] : memref<32xf32, #tpu.memory_space<smem>>
    %789 = vector.broadcast %777 : f32 to vector<8x128xf32>
    %790 = arith.subf %789, %7 : vector<8x128xf32>
    %791 = vector.broadcast %781 : f32 to vector<8x128xf32>
    %792 = arith.subf %791, %10 : vector<8x128xf32>
    %793 = arith.mulf %790, %790 : vector<8x128xf32>
    %794 = arith.mulf %792, %792 : vector<8x128xf32>
    %795 = arith.addf %793, %794 : vector<8x128xf32>
    %cst_266 = arith.constant 9.99999993E-9 : f32
    %796 = vector.broadcast %cst_266 : f32 to vector<8x128xf32>
    %797 = arith.addf %795, %796 : vector<8x128xf32>
    %798 = tpu.reciprocal %797 {approx = true} : vector<8x128xf32> -> vector<8x128xf32>
    %799 = arith.mulf %797, %798 : vector<8x128xf32>
    %cst_267 = arith.constant 2.000000e+00 : f32
    %800 = vector.broadcast %cst_267 : f32 to vector<8x128xf32>
    %801 = arith.subf %800, %799 : vector<8x128xf32>
    %802 = arith.mulf %798, %801 : vector<8x128xf32>
    %803 = arith.addf %11, %802 : vector<8x128xf32>
    %804 = arith.mulf %802, %790 : vector<8x128xf32>
    %805 = arith.addf %11, %804 : vector<8x128xf32>
    %806 = arith.mulf %802, %792 : vector<8x128xf32>
    %807 = arith.addf %11, %806 : vector<8x128xf32>
    %808 = vector.broadcast %784 : f32 to vector<8x128xf32>
    %809 = arith.mulf %802, %808 : vector<8x128xf32>
    %810 = arith.addf %11, %809 : vector<8x128xf32>
    %811 = vector.broadcast %788 : f32 to vector<8x128xf32>
    %812 = arith.mulf %802, %811 : vector<8x128xf32>
    %813 = arith.addf %11, %812 : vector<8x128xf32>
    %c2_i32_268 = arith.constant 2 : i32
    %814 = arith.addi %774, %c2_i32_268 : i32
    %815 = arith.index_cast %814 : i32 to index
    %816 = memref.load %arg1[%815] : memref<32xf32, #tpu.memory_space<smem>>
    %c2_i32_269 = arith.constant 2 : i32
    %817 = arith.addi %774, %c2_i32_269 : i32
    %c1_i32_270 = arith.constant 1 : i32
    %818 = arith.addi %817, %c1_i32_270 : i32
    %819 = arith.index_cast %818 : i32 to index
    %820 = memref.load %arg1[%819] : memref<32xf32, #tpu.memory_space<smem>>
    %c2_i32_271 = arith.constant 2 : i32
    %821 = arith.addi %774, %c2_i32_271 : i32
    %822 = arith.index_cast %821 : i32 to index
    %823 = memref.load %arg2[%822] : memref<32xf32, #tpu.memory_space<smem>>
    %c2_i32_272 = arith.constant 2 : i32
    %824 = arith.addi %774, %c2_i32_272 : i32
    %c1_i32_273 = arith.constant 1 : i32
    %825 = arith.addi %824, %c1_i32_273 : i32
    %826 = arith.index_cast %825 : i32 to index
    %827 = memref.load %arg2[%826] : memref<32xf32, #tpu.memory_space<smem>>
    %828 = vector.broadcast %816 : f32 to vector<8x128xf32>
    %829 = arith.subf %828, %7 : vector<8x128xf32>
    %830 = vector.broadcast %820 : f32 to vector<8x128xf32>
    %831 = arith.subf %830, %10 : vector<8x128xf32>
    %832 = arith.mulf %829, %829 : vector<8x128xf32>
    %833 = arith.mulf %831, %831 : vector<8x128xf32>
    %834 = arith.addf %832, %833 : vector<8x128xf32>
    %cst_274 = arith.constant 9.99999993E-9 : f32
    %835 = vector.broadcast %cst_274 : f32 to vector<8x128xf32>
    %836 = arith.addf %834, %835 : vector<8x128xf32>
    %837 = tpu.reciprocal %836 {approx = true} : vector<8x128xf32> -> vector<8x128xf32>
    %838 = arith.mulf %836, %837 : vector<8x128xf32>
    %cst_275 = arith.constant 2.000000e+00 : f32
    %839 = vector.broadcast %cst_275 : f32 to vector<8x128xf32>
    %840 = arith.subf %839, %838 : vector<8x128xf32>
    %841 = arith.mulf %837, %840 : vector<8x128xf32>
    %842 = arith.addf %803, %841 : vector<8x128xf32>
    %843 = arith.mulf %841, %829 : vector<8x128xf32>
    %844 = arith.addf %805, %843 : vector<8x128xf32>
    %845 = arith.mulf %841, %831 : vector<8x128xf32>
    %846 = arith.addf %807, %845 : vector<8x128xf32>
    %847 = vector.broadcast %823 : f32 to vector<8x128xf32>
    %848 = arith.mulf %841, %847 : vector<8x128xf32>
    %849 = arith.addf %810, %848 : vector<8x128xf32>
    %850 = vector.broadcast %827 : f32 to vector<8x128xf32>
    %851 = arith.mulf %841, %850 : vector<8x128xf32>
    %852 = arith.addf %813, %851 : vector<8x128xf32>
    %c4_i32_276 = arith.constant 4 : i32
    %853 = arith.addi %774, %c4_i32_276 : i32
    %854 = arith.index_cast %853 : i32 to index
    %855 = memref.load %arg1[%854] : memref<32xf32, #tpu.memory_space<smem>>
    %c4_i32_277 = arith.constant 4 : i32
    %856 = arith.addi %774, %c4_i32_277 : i32
    %c1_i32_278 = arith.constant 1 : i32
    %857 = arith.addi %856, %c1_i32_278 : i32
    %858 = arith.index_cast %857 : i32 to index
    %859 = memref.load %arg1[%858] : memref<32xf32, #tpu.memory_space<smem>>
    %c4_i32_279 = arith.constant 4 : i32
    %860 = arith.addi %774, %c4_i32_279 : i32
    %861 = arith.index_cast %860 : i32 to index
    %862 = memref.load %arg2[%861] : memref<32xf32, #tpu.memory_space<smem>>
    %c4_i32_280 = arith.constant 4 : i32
    %863 = arith.addi %774, %c4_i32_280 : i32
    %c1_i32_281 = arith.constant 1 : i32
    %864 = arith.addi %863, %c1_i32_281 : i32
    %865 = arith.index_cast %864 : i32 to index
    %866 = memref.load %arg2[%865] : memref<32xf32, #tpu.memory_space<smem>>
    %867 = vector.broadcast %855 : f32 to vector<8x128xf32>
    %868 = arith.subf %867, %7 : vector<8x128xf32>
    %869 = vector.broadcast %859 : f32 to vector<8x128xf32>
    %870 = arith.subf %869, %10 : vector<8x128xf32>
    %871 = arith.mulf %868, %868 : vector<8x128xf32>
    %872 = arith.mulf %870, %870 : vector<8x128xf32>
    %873 = arith.addf %871, %872 : vector<8x128xf32>
    %cst_282 = arith.constant 9.99999993E-9 : f32
    %874 = vector.broadcast %cst_282 : f32 to vector<8x128xf32>
    %875 = arith.addf %873, %874 : vector<8x128xf32>
    %876 = tpu.reciprocal %875 {approx = true} : vector<8x128xf32> -> vector<8x128xf32>
    %877 = arith.mulf %875, %876 : vector<8x128xf32>
    %cst_283 = arith.constant 2.000000e+00 : f32
    %878 = vector.broadcast %cst_283 : f32 to vector<8x128xf32>
    %879 = arith.subf %878, %877 : vector<8x128xf32>
    %880 = arith.mulf %876, %879 : vector<8x128xf32>
    %881 = arith.addf %842, %880 : vector<8x128xf32>
    %882 = arith.mulf %880, %868 : vector<8x128xf32>
    %883 = arith.addf %844, %882 : vector<8x128xf32>
    %884 = arith.mulf %880, %870 : vector<8x128xf32>
    %885 = arith.addf %846, %884 : vector<8x128xf32>
    %886 = vector.broadcast %862 : f32 to vector<8x128xf32>
    %887 = arith.mulf %880, %886 : vector<8x128xf32>
    %888 = arith.addf %849, %887 : vector<8x128xf32>
    %889 = vector.broadcast %866 : f32 to vector<8x128xf32>
    %890 = arith.mulf %880, %889 : vector<8x128xf32>
    %891 = arith.addf %852, %890 : vector<8x128xf32>
    %c6_i32_284 = arith.constant 6 : i32
    %892 = arith.addi %774, %c6_i32_284 : i32
    %893 = arith.index_cast %892 : i32 to index
    %894 = memref.load %arg1[%893] : memref<32xf32, #tpu.memory_space<smem>>
    %c6_i32_285 = arith.constant 6 : i32
    %895 = arith.addi %774, %c6_i32_285 : i32
    %c1_i32_286 = arith.constant 1 : i32
    %896 = arith.addi %895, %c1_i32_286 : i32
    %897 = arith.index_cast %896 : i32 to index
    %898 = memref.load %arg1[%897] : memref<32xf32, #tpu.memory_space<smem>>
    %c6_i32_287 = arith.constant 6 : i32
    %899 = arith.addi %774, %c6_i32_287 : i32
    %900 = arith.index_cast %899 : i32 to index
    %901 = memref.load %arg2[%900] : memref<32xf32, #tpu.memory_space<smem>>
    %c6_i32_288 = arith.constant 6 : i32
    %902 = arith.addi %774, %c6_i32_288 : i32
    %c1_i32_289 = arith.constant 1 : i32
    %903 = arith.addi %902, %c1_i32_289 : i32
    %904 = arith.index_cast %903 : i32 to index
    %905 = memref.load %arg2[%904] : memref<32xf32, #tpu.memory_space<smem>>
    %906 = vector.broadcast %894 : f32 to vector<8x128xf32>
    %907 = arith.subf %906, %7 : vector<8x128xf32>
    %908 = vector.broadcast %898 : f32 to vector<8x128xf32>
    %909 = arith.subf %908, %10 : vector<8x128xf32>
    %910 = arith.mulf %907, %907 : vector<8x128xf32>
    %911 = arith.mulf %909, %909 : vector<8x128xf32>
    %912 = arith.addf %910, %911 : vector<8x128xf32>
    %cst_290 = arith.constant 9.99999993E-9 : f32
    %913 = vector.broadcast %cst_290 : f32 to vector<8x128xf32>
    %914 = arith.addf %912, %913 : vector<8x128xf32>
    %915 = tpu.reciprocal %914 {approx = true} : vector<8x128xf32> -> vector<8x128xf32>
    %916 = arith.mulf %914, %915 : vector<8x128xf32>
    %cst_291 = arith.constant 2.000000e+00 : f32
    %917 = vector.broadcast %cst_291 : f32 to vector<8x128xf32>
    %918 = arith.subf %917, %916 : vector<8x128xf32>
    %919 = arith.mulf %915, %918 : vector<8x128xf32>
    %920 = arith.addf %881, %919 : vector<8x128xf32>
    %921 = arith.mulf %919, %907 : vector<8x128xf32>
    %922 = arith.addf %883, %921 : vector<8x128xf32>
    %923 = arith.mulf %919, %909 : vector<8x128xf32>
    %924 = arith.addf %885, %923 : vector<8x128xf32>
    %925 = vector.broadcast %901 : f32 to vector<8x128xf32>
    %926 = arith.mulf %919, %925 : vector<8x128xf32>
    %927 = arith.addf %888, %926 : vector<8x128xf32>
    %928 = vector.broadcast %905 : f32 to vector<8x128xf32>
    %929 = arith.mulf %919, %928 : vector<8x128xf32>
    %930 = arith.addf %891, %929 : vector<8x128xf32>
    %c8_i32_292 = arith.constant 8 : i32
    %931 = arith.addi %774, %c8_i32_292 : i32
    %932 = arith.index_cast %931 : i32 to index
    %933 = memref.load %arg1[%932] : memref<32xf32, #tpu.memory_space<smem>>
    %c8_i32_293 = arith.constant 8 : i32
    %934 = arith.addi %774, %c8_i32_293 : i32
    %c1_i32_294 = arith.constant 1 : i32
    %935 = arith.addi %934, %c1_i32_294 : i32
    %936 = arith.index_cast %935 : i32 to index
    %937 = memref.load %arg1[%936] : memref<32xf32, #tpu.memory_space<smem>>
    %c8_i32_295 = arith.constant 8 : i32
    %938 = arith.addi %774, %c8_i32_295 : i32
    %939 = arith.index_cast %938 : i32 to index
    %940 = memref.load %arg2[%939] : memref<32xf32, #tpu.memory_space<smem>>
    %c8_i32_296 = arith.constant 8 : i32
    %941 = arith.addi %774, %c8_i32_296 : i32
    %c1_i32_297 = arith.constant 1 : i32
    %942 = arith.addi %941, %c1_i32_297 : i32
    %943 = arith.index_cast %942 : i32 to index
    %944 = memref.load %arg2[%943] : memref<32xf32, #tpu.memory_space<smem>>
    %945 = vector.broadcast %933 : f32 to vector<8x128xf32>
    %946 = arith.subf %945, %7 : vector<8x128xf32>
    %947 = vector.broadcast %937 : f32 to vector<8x128xf32>
    %948 = arith.subf %947, %10 : vector<8x128xf32>
    %949 = arith.mulf %946, %946 : vector<8x128xf32>
    %950 = arith.mulf %948, %948 : vector<8x128xf32>
    %951 = arith.addf %949, %950 : vector<8x128xf32>
    %cst_298 = arith.constant 9.99999993E-9 : f32
    %952 = vector.broadcast %cst_298 : f32 to vector<8x128xf32>
    %953 = arith.addf %951, %952 : vector<8x128xf32>
    %954 = tpu.reciprocal %953 {approx = true} : vector<8x128xf32> -> vector<8x128xf32>
    %955 = arith.mulf %953, %954 : vector<8x128xf32>
    %cst_299 = arith.constant 2.000000e+00 : f32
    %956 = vector.broadcast %cst_299 : f32 to vector<8x128xf32>
    %957 = arith.subf %956, %955 : vector<8x128xf32>
    %958 = arith.mulf %954, %957 : vector<8x128xf32>
    %959 = arith.addf %920, %958 : vector<8x128xf32>
    %960 = arith.mulf %958, %946 : vector<8x128xf32>
    %961 = arith.addf %922, %960 : vector<8x128xf32>
    %962 = arith.mulf %958, %948 : vector<8x128xf32>
    %963 = arith.addf %924, %962 : vector<8x128xf32>
    %964 = vector.broadcast %940 : f32 to vector<8x128xf32>
    %965 = arith.mulf %958, %964 : vector<8x128xf32>
    %966 = arith.addf %927, %965 : vector<8x128xf32>
    %967 = vector.broadcast %944 : f32 to vector<8x128xf32>
    %968 = arith.mulf %958, %967 : vector<8x128xf32>
    %969 = arith.addf %930, %968 : vector<8x128xf32>
    %c10_i32_300 = arith.constant 10 : i32
    %970 = arith.addi %774, %c10_i32_300 : i32
    %971 = arith.index_cast %970 : i32 to index
    %972 = memref.load %arg1[%971] : memref<32xf32, #tpu.memory_space<smem>>
    %c10_i32_301 = arith.constant 10 : i32
    %973 = arith.addi %774, %c10_i32_301 : i32
    %c1_i32_302 = arith.constant 1 : i32
    %974 = arith.addi %973, %c1_i32_302 : i32
    %975 = arith.index_cast %974 : i32 to index
    %976 = memref.load %arg1[%975] : memref<32xf32, #tpu.memory_space<smem>>
    %c10_i32_303 = arith.constant 10 : i32
    %977 = arith.addi %774, %c10_i32_303 : i32
    %978 = arith.index_cast %977 : i32 to index
    %979 = memref.load %arg2[%978] : memref<32xf32, #tpu.memory_space<smem>>
    %c10_i32_304 = arith.constant 10 : i32
    %980 = arith.addi %774, %c10_i32_304 : i32
    %c1_i32_305 = arith.constant 1 : i32
    %981 = arith.addi %980, %c1_i32_305 : i32
    %982 = arith.index_cast %981 : i32 to index
    %983 = memref.load %arg2[%982] : memref<32xf32, #tpu.memory_space<smem>>
    %984 = vector.broadcast %972 : f32 to vector<8x128xf32>
    %985 = arith.subf %984, %7 : vector<8x128xf32>
    %986 = vector.broadcast %976 : f32 to vector<8x128xf32>
    %987 = arith.subf %986, %10 : vector<8x128xf32>
    %988 = arith.mulf %985, %985 : vector<8x128xf32>
    %989 = arith.mulf %987, %987 : vector<8x128xf32>
    %990 = arith.addf %988, %989 : vector<8x128xf32>
    %cst_306 = arith.constant 9.99999993E-9 : f32
    %991 = vector.broadcast %cst_306 : f32 to vector<8x128xf32>
    %992 = arith.addf %990, %991 : vector<8x128xf32>
    %993 = tpu.reciprocal %992 {approx = true} : vector<8x128xf32> -> vector<8x128xf32>
    %994 = arith.mulf %992, %993 : vector<8x128xf32>
    %cst_307 = arith.constant 2.000000e+00 : f32
    %995 = vector.broadcast %cst_307 : f32 to vector<8x128xf32>
    %996 = arith.subf %995, %994 : vector<8x128xf32>
    %997 = arith.mulf %993, %996 : vector<8x128xf32>
    %998 = arith.addf %959, %997 : vector<8x128xf32>
    %999 = arith.mulf %997, %985 : vector<8x128xf32>
    %1000 = arith.addf %961, %999 : vector<8x128xf32>
    %1001 = arith.mulf %997, %987 : vector<8x128xf32>
    %1002 = arith.addf %963, %1001 : vector<8x128xf32>
    %1003 = vector.broadcast %979 : f32 to vector<8x128xf32>
    %1004 = arith.mulf %997, %1003 : vector<8x128xf32>
    %1005 = arith.addf %966, %1004 : vector<8x128xf32>
    %1006 = vector.broadcast %983 : f32 to vector<8x128xf32>
    %1007 = arith.mulf %997, %1006 : vector<8x128xf32>
    %1008 = arith.addf %969, %1007 : vector<8x128xf32>
    %c12_i32_308 = arith.constant 12 : i32
    %1009 = arith.addi %774, %c12_i32_308 : i32
    %1010 = arith.index_cast %1009 : i32 to index
    %1011 = memref.load %arg1[%1010] : memref<32xf32, #tpu.memory_space<smem>>
    %c12_i32_309 = arith.constant 12 : i32
    %1012 = arith.addi %774, %c12_i32_309 : i32
    %c1_i32_310 = arith.constant 1 : i32
    %1013 = arith.addi %1012, %c1_i32_310 : i32
    %1014 = arith.index_cast %1013 : i32 to index
    %1015 = memref.load %arg1[%1014] : memref<32xf32, #tpu.memory_space<smem>>
    %c12_i32_311 = arith.constant 12 : i32
    %1016 = arith.addi %774, %c12_i32_311 : i32
    %1017 = arith.index_cast %1016 : i32 to index
    %1018 = memref.load %arg2[%1017] : memref<32xf32, #tpu.memory_space<smem>>
    %c12_i32_312 = arith.constant 12 : i32
    %1019 = arith.addi %774, %c12_i32_312 : i32
    %c1_i32_313 = arith.constant 1 : i32
    %1020 = arith.addi %1019, %c1_i32_313 : i32
    %1021 = arith.index_cast %1020 : i32 to index
    %1022 = memref.load %arg2[%1021] : memref<32xf32, #tpu.memory_space<smem>>
    %1023 = vector.broadcast %1011 : f32 to vector<8x128xf32>
    %1024 = arith.subf %1023, %7 : vector<8x128xf32>
    %1025 = vector.broadcast %1015 : f32 to vector<8x128xf32>
    %1026 = arith.subf %1025, %10 : vector<8x128xf32>
    %1027 = arith.mulf %1024, %1024 : vector<8x128xf32>
    %1028 = arith.mulf %1026, %1026 : vector<8x128xf32>
    %1029 = arith.addf %1027, %1028 : vector<8x128xf32>
    %cst_314 = arith.constant 9.99999993E-9 : f32
    %1030 = vector.broadcast %cst_314 : f32 to vector<8x128xf32>
    %1031 = arith.addf %1029, %1030 : vector<8x128xf32>
    %1032 = tpu.reciprocal %1031 {approx = true} : vector<8x128xf32> -> vector<8x128xf32>
    %1033 = arith.mulf %1031, %1032 : vector<8x128xf32>
    %cst_315 = arith.constant 2.000000e+00 : f32
    %1034 = vector.broadcast %cst_315 : f32 to vector<8x128xf32>
    %1035 = arith.subf %1034, %1033 : vector<8x128xf32>
    %1036 = arith.mulf %1032, %1035 : vector<8x128xf32>
    %1037 = arith.addf %998, %1036 : vector<8x128xf32>
    %1038 = arith.mulf %1036, %1024 : vector<8x128xf32>
    %1039 = arith.addf %1000, %1038 : vector<8x128xf32>
    %1040 = arith.mulf %1036, %1026 : vector<8x128xf32>
    %1041 = arith.addf %1002, %1040 : vector<8x128xf32>
    %1042 = vector.broadcast %1018 : f32 to vector<8x128xf32>
    %1043 = arith.mulf %1036, %1042 : vector<8x128xf32>
    %1044 = arith.addf %1005, %1043 : vector<8x128xf32>
    %1045 = vector.broadcast %1022 : f32 to vector<8x128xf32>
    %1046 = arith.mulf %1036, %1045 : vector<8x128xf32>
    %1047 = arith.addf %1008, %1046 : vector<8x128xf32>
    %c14_i32_316 = arith.constant 14 : i32
    %1048 = arith.addi %774, %c14_i32_316 : i32
    %1049 = arith.index_cast %1048 : i32 to index
    %1050 = memref.load %arg1[%1049] : memref<32xf32, #tpu.memory_space<smem>>
    %c14_i32_317 = arith.constant 14 : i32
    %1051 = arith.addi %774, %c14_i32_317 : i32
    %c1_i32_318 = arith.constant 1 : i32
    %1052 = arith.addi %1051, %c1_i32_318 : i32
    %1053 = arith.index_cast %1052 : i32 to index
    %1054 = memref.load %arg1[%1053] : memref<32xf32, #tpu.memory_space<smem>>
    %c14_i32_319 = arith.constant 14 : i32
    %1055 = arith.addi %774, %c14_i32_319 : i32
    %1056 = arith.index_cast %1055 : i32 to index
    %1057 = memref.load %arg2[%1056] : memref<32xf32, #tpu.memory_space<smem>>
    %c14_i32_320 = arith.constant 14 : i32
    %1058 = arith.addi %774, %c14_i32_320 : i32
    %c1_i32_321 = arith.constant 1 : i32
    %1059 = arith.addi %1058, %c1_i32_321 : i32
    %1060 = arith.index_cast %1059 : i32 to index
    %1061 = memref.load %arg2[%1060] : memref<32xf32, #tpu.memory_space<smem>>
    %1062 = vector.broadcast %1050 : f32 to vector<8x128xf32>
    %1063 = arith.subf %1062, %7 : vector<8x128xf32>
    %1064 = vector.broadcast %1054 : f32 to vector<8x128xf32>
    %1065 = arith.subf %1064, %10 : vector<8x128xf32>
    %1066 = arith.mulf %1063, %1063 : vector<8x128xf32>
    %1067 = arith.mulf %1065, %1065 : vector<8x128xf32>
    %1068 = arith.addf %1066, %1067 : vector<8x128xf32>
    %cst_322 = arith.constant 9.99999993E-9 : f32
    %1069 = vector.broadcast %cst_322 : f32 to vector<8x128xf32>
    %1070 = arith.addf %1068, %1069 : vector<8x128xf32>
    %1071 = tpu.reciprocal %1070 {approx = true} : vector<8x128xf32> -> vector<8x128xf32>
    %1072 = arith.mulf %1070, %1071 : vector<8x128xf32>
    %cst_323 = arith.constant 2.000000e+00 : f32
    %1073 = vector.broadcast %cst_323 : f32 to vector<8x128xf32>
    %1074 = arith.subf %1073, %1072 : vector<8x128xf32>
    %1075 = arith.mulf %1071, %1074 : vector<8x128xf32>
    %1076 = arith.addf %1037, %1075 : vector<8x128xf32>
    %1077 = arith.mulf %1075, %1063 : vector<8x128xf32>
    %1078 = arith.addf %1039, %1077 : vector<8x128xf32>
    %1079 = arith.mulf %1075, %1065 : vector<8x128xf32>
    %1080 = arith.addf %1041, %1079 : vector<8x128xf32>
    %1081 = vector.broadcast %1057 : f32 to vector<8x128xf32>
    %1082 = arith.mulf %1075, %1081 : vector<8x128xf32>
    %1083 = arith.addf %1044, %1082 : vector<8x128xf32>
    %1084 = vector.broadcast %1061 : f32 to vector<8x128xf32>
    %1085 = arith.mulf %1075, %1084 : vector<8x128xf32>
    %1086 = arith.addf %1047, %1085 : vector<8x128xf32>
    %1087 = tpu.reciprocal %1076 {approx = true} : vector<8x128xf32> -> vector<8x128xf32>
    %1088 = arith.mulf %1076, %1087 : vector<8x128xf32>
    %cst_324 = arith.constant 2.000000e+00 : f32
    %1089 = vector.broadcast %cst_324 : f32 to vector<8x128xf32>
    %1090 = arith.subf %1089, %1088 : vector<8x128xf32>
    %1091 = arith.mulf %1087, %1090 : vector<8x128xf32>
    %1092 = arith.mulf %1078, %1091 : vector<8x128xf32>
    %1093 = arith.addf %7, %1092 : vector<8x128xf32>
    %1094 = arith.mulf %1080, %1091 : vector<8x128xf32>
    %1095 = arith.addf %10, %1094 : vector<8x128xf32>
    %1096 = arith.mulf %1083, %1091 : vector<8x128xf32>
    %1097 = arith.mulf %1086, %1091 : vector<8x128xf32>
    %1098 = vector.broadcast %784 : f32 to vector<8x128xf32>
    %1099 = arith.subf %1098, %1096 : vector<8x128xf32>
    %1100 = vector.broadcast %788 : f32 to vector<8x128xf32>
    %1101 = arith.subf %1100, %1097 : vector<8x128xf32>
    %c1_325 = arith.constant 1 : index
    %c0_326 = arith.constant 0 : index
    %c0_327 = arith.constant 0 : index
    %c0_328 = arith.constant 0 : index
    %1102 = vector.load %arg7[%c1_325, %c0_326, %c0_327, %c0_328] : memref<2x16x8x128xf32, #tpu.memory_space<vmem>>, vector<1x1x8x128xf32>
    %1103 = vector.shape_cast %1102 : vector<1x1x8x128xf32> to vector<8x128xf32>
    %1104 = vector.shape_cast %1099 : vector<8x128xf32> to vector<1x1x8x128xf32>
    tpu.vector_store %arg7[%c1_325, %c0_326, %c0_327, %c0_328], %1104 {strides = array<i32>} : memref<2x16x8x128xf32, #tpu.memory_space<vmem>>, vector<1x1x8x128xf32>,
    %c1_329 = arith.constant 1 : index
    %c1_330 = arith.constant 1 : index
    %c0_331 = arith.constant 0 : index
    %c0_332 = arith.constant 0 : index
    %1105 = vector.load %arg7[%c1_329, %c1_330, %c0_331, %c0_332] : memref<2x16x8x128xf32, #tpu.memory_space<vmem>>, vector<1x1x8x128xf32>
    %1106 = vector.shape_cast %1105 : vector<1x1x8x128xf32> to vector<8x128xf32>
    %1107 = vector.shape_cast %1101 : vector<8x128xf32> to vector<1x1x8x128xf32>
    tpu.vector_store %arg7[%c1_329, %c1_330, %c0_331, %c0_332], %1107 {strides = array<i32>} : memref<2x16x8x128xf32, #tpu.memory_space<vmem>>, vector<1x1x8x128xf32>,
    %1108 = vector.broadcast %823 : f32 to vector<8x128xf32>
    %1109 = arith.subf %1108, %1096 : vector<8x128xf32>
    %1110 = vector.broadcast %827 : f32 to vector<8x128xf32>
    %1111 = arith.subf %1110, %1097 : vector<8x128xf32>
    %c1_333 = arith.constant 1 : index
    %c2_334 = arith.constant 2 : index
    %c0_335 = arith.constant 0 : index
    %c0_336 = arith.constant 0 : index
    %1112 = vector.load %arg7[%c1_333, %c2_334, %c0_335, %c0_336] : memref<2x16x8x128xf32, #tpu.memory_space<vmem>>, vector<1x1x8x128xf32>
    %1113 = vector.shape_cast %1112 : vector<1x1x8x128xf32> to vector<8x128xf32>
    %1114 = vector.shape_cast %1109 : vector<8x128xf32> to vector<1x1x8x128xf32>
    tpu.vector_store %arg7[%c1_333, %c2_334, %c0_335, %c0_336], %1114 {strides = array<i32>} : memref<2x16x8x128xf32, #tpu.memory_space<vmem>>, vector<1x1x8x128xf32>,
    %c1_337 = arith.constant 1 : index
    %c3_338 = arith.constant 3 : index
    %c0_339 = arith.constant 0 : index
    %c0_340 = arith.constant 0 : index
    %1115 = vector.load %arg7[%c1_337, %c3_338, %c0_339, %c0_340] : memref<2x16x8x128xf32, #tpu.memory_space<vmem>>, vector<1x1x8x128xf32>
    %1116 = vector.shape_cast %1115 : vector<1x1x8x128xf32> to vector<8x128xf32>
    %1117 = vector.shape_cast %1111 : vector<8x128xf32> to vector<1x1x8x128xf32>
    tpu.vector_store %arg7[%c1_337, %c3_338, %c0_339, %c0_340], %1117 {strides = array<i32>} : memref<2x16x8x128xf32, #tpu.memory_space<vmem>>, vector<1x1x8x128xf32>,
    %1118 = vector.broadcast %862 : f32 to vector<8x128xf32>
    %1119 = arith.subf %1118, %1096 : vector<8x128xf32>
    %1120 = vector.broadcast %866 : f32 to vector<8x128xf32>
    %1121 = arith.subf %1120, %1097 : vector<8x128xf32>
    %c1_341 = arith.constant 1 : index
    %c4_342 = arith.constant 4 : index
    %c0_343 = arith.constant 0 : index
    %c0_344 = arith.constant 0 : index
    %1122 = vector.load %arg7[%c1_341, %c4_342, %c0_343, %c0_344] : memref<2x16x8x128xf32, #tpu.memory_space<vmem>>, vector<1x1x8x128xf32>
    %1123 = vector.shape_cast %1122 : vector<1x1x8x128xf32> to vector<8x128xf32>
    %1124 = vector.shape_cast %1119 : vector<8x128xf32> to vector<1x1x8x128xf32>
    tpu.vector_store %arg7[%c1_341, %c4_342, %c0_343, %c0_344], %1124 {strides = array<i32>} : memref<2x16x8x128xf32, #tpu.memory_space<vmem>>, vector<1x1x8x128xf32>,
    %c1_345 = arith.constant 1 : index
    %c5_346 = arith.constant 5 : index
    %c0_347 = arith.constant 0 : index
    %c0_348 = arith.constant 0 : index
    %1125 = vector.load %arg7[%c1_345, %c5_346, %c0_347, %c0_348] : memref<2x16x8x128xf32, #tpu.memory_space<vmem>>, vector<1x1x8x128xf32>
    %1126 = vector.shape_cast %1125 : vector<1x1x8x128xf32> to vector<8x128xf32>
    %1127 = vector.shape_cast %1121 : vector<8x128xf32> to vector<1x1x8x128xf32>
    tpu.vector_store %arg7[%c1_345, %c5_346, %c0_347, %c0_348], %1127 {strides = array<i32>} : memref<2x16x8x128xf32, #tpu.memory_space<vmem>>, vector<1x1x8x128xf32>,
    %1128 = vector.broadcast %901 : f32 to vector<8x128xf32>
    %1129 = arith.subf %1128, %1096 : vector<8x128xf32>
    %1130 = vector.broadcast %905 : f32 to vector<8x128xf32>
    %1131 = arith.subf %1130, %1097 : vector<8x128xf32>
    %c1_349 = arith.constant 1 : index
    %c6_350 = arith.constant 6 : index
    %c0_351 = arith.constant 0 : index
    %c0_352 = arith.constant 0 : index
    %1132 = vector.load %arg7[%c1_349, %c6_350, %c0_351, %c0_352] : memref<2x16x8x128xf32, #tpu.memory_space<vmem>>, vector<1x1x8x128xf32>
    %1133 = vector.shape_cast %1132 : vector<1x1x8x128xf32> to vector<8x128xf32>
    %1134 = vector.shape_cast %1129 : vector<8x128xf32> to vector<1x1x8x128xf32>
    tpu.vector_store %arg7[%c1_349, %c6_350, %c0_351, %c0_352], %1134 {strides = array<i32>} : memref<2x16x8x128xf32, #tpu.memory_space<vmem>>, vector<1x1x8x128xf32>,
    %c1_353 = arith.constant 1 : index
    %c7_354 = arith.constant 7 : index
    %c0_355 = arith.constant 0 : index
    %c0_356 = arith.constant 0 : index
    %1135 = vector.load %arg7[%c1_353, %c7_354, %c0_355, %c0_356] : memref<2x16x8x128xf32, #tpu.memory_space<vmem>>, vector<1x1x8x128xf32>
    %1136 = vector.shape_cast %1135 : vector<1x1x8x128xf32> to vector<8x128xf32>
    %1137 = vector.shape_cast %1131 : vector<8x128xf32> to vector<1x1x8x128xf32>
    tpu.vector_store %arg7[%c1_353, %c7_354, %c0_355, %c0_356], %1137 {strides = array<i32>} : memref<2x16x8x128xf32, #tpu.memory_space<vmem>>, vector<1x1x8x128xf32>,
    %1138 = vector.broadcast %940 : f32 to vector<8x128xf32>
    %1139 = arith.subf %1138, %1096 : vector<8x128xf32>
    %1140 = vector.broadcast %944 : f32 to vector<8x128xf32>
    %1141 = arith.subf %1140, %1097 : vector<8x128xf32>
    %c1_357 = arith.constant 1 : index
    %c8_358 = arith.constant 8 : index
    %c0_359 = arith.constant 0 : index
    %c0_360 = arith.constant 0 : index
    %1142 = vector.load %arg7[%c1_357, %c8_358, %c0_359, %c0_360] : memref<2x16x8x128xf32, #tpu.memory_space<vmem>>, vector<1x1x8x128xf32>
    %1143 = vector.shape_cast %1142 : vector<1x1x8x128xf32> to vector<8x128xf32>
    %1144 = vector.shape_cast %1139 : vector<8x128xf32> to vector<1x1x8x128xf32>
    tpu.vector_store %arg7[%c1_357, %c8_358, %c0_359, %c0_360], %1144 {strides = array<i32>} : memref<2x16x8x128xf32, #tpu.memory_space<vmem>>, vector<1x1x8x128xf32>,
    %c1_361 = arith.constant 1 : index
    %c9_362 = arith.constant 9 : index
    %c0_363 = arith.constant 0 : index
    %c0_364 = arith.constant 0 : index
    %1145 = vector.load %arg7[%c1_361, %c9_362, %c0_363, %c0_364] : memref<2x16x8x128xf32, #tpu.memory_space<vmem>>, vector<1x1x8x128xf32>
    %1146 = vector.shape_cast %1145 : vector<1x1x8x128xf32> to vector<8x128xf32>
    %1147 = vector.shape_cast %1141 : vector<8x128xf32> to vector<1x1x8x128xf32>
    tpu.vector_store %arg7[%c1_361, %c9_362, %c0_363, %c0_364], %1147 {strides = array<i32>} : memref<2x16x8x128xf32, #tpu.memory_space<vmem>>, vector<1x1x8x128xf32>,
    %1148 = vector.broadcast %979 : f32 to vector<8x128xf32>
    %1149 = arith.subf %1148, %1096 : vector<8x128xf32>
    %1150 = vector.broadcast %983 : f32 to vector<8x128xf32>
    %1151 = arith.subf %1150, %1097 : vector<8x128xf32>
    %c1_365 = arith.constant 1 : index
    %c10_366 = arith.constant 10 : index
    %c0_367 = arith.constant 0 : index
    %c0_368 = arith.constant 0 : index
    %1152 = vector.load %arg7[%c1_365, %c10_366, %c0_367, %c0_368] : memref<2x16x8x128xf32, #tpu.memory_space<vmem>>, vector<1x1x8x128xf32>
    %1153 = vector.shape_cast %1152 : vector<1x1x8x128xf32> to vector<8x128xf32>
    %1154 = vector.shape_cast %1149 : vector<8x128xf32> to vector<1x1x8x128xf32>
    tpu.vector_store %arg7[%c1_365, %c10_366, %c0_367, %c0_368], %1154 {strides = array<i32>} : memref<2x16x8x128xf32, #tpu.memory_space<vmem>>, vector<1x1x8x128xf32>,
    %c1_369 = arith.constant 1 : index
    %c11_370 = arith.constant 11 : index
    %c0_371 = arith.constant 0 : index
    %c0_372 = arith.constant 0 : index
    %1155 = vector.load %arg7[%c1_369, %c11_370, %c0_371, %c0_372] : memref<2x16x8x128xf32, #tpu.memory_space<vmem>>, vector<1x1x8x128xf32>
    %1156 = vector.shape_cast %1155 : vector<1x1x8x128xf32> to vector<8x128xf32>
    %1157 = vector.shape_cast %1151 : vector<8x128xf32> to vector<1x1x8x128xf32>
    tpu.vector_store %arg7[%c1_369, %c11_370, %c0_371, %c0_372], %1157 {strides = array<i32>} : memref<2x16x8x128xf32, #tpu.memory_space<vmem>>, vector<1x1x8x128xf32>,
    %1158 = vector.broadcast %1018 : f32 to vector<8x128xf32>
    %1159 = arith.subf %1158, %1096 : vector<8x128xf32>
    %1160 = vector.broadcast %1022 : f32 to vector<8x128xf32>
    %1161 = arith.subf %1160, %1097 : vector<8x128xf32>
    %c1_373 = arith.constant 1 : index
    %c12_374 = arith.constant 12 : index
    %c0_375 = arith.constant 0 : index
    %c0_376 = arith.constant 0 : index
    %1162 = vector.load %arg7[%c1_373, %c12_374, %c0_375, %c0_376] : memref<2x16x8x128xf32, #tpu.memory_space<vmem>>, vector<1x1x8x128xf32>
    %1163 = vector.shape_cast %1162 : vector<1x1x8x128xf32> to vector<8x128xf32>
    %1164 = vector.shape_cast %1159 : vector<8x128xf32> to vector<1x1x8x128xf32>
    tpu.vector_store %arg7[%c1_373, %c12_374, %c0_375, %c0_376], %1164 {strides = array<i32>} : memref<2x16x8x128xf32, #tpu.memory_space<vmem>>, vector<1x1x8x128xf32>,
    %c1_377 = arith.constant 1 : index
    %c13_378 = arith.constant 13 : index
    %c0_379 = arith.constant 0 : index
    %c0_380 = arith.constant 0 : index
    %1165 = vector.load %arg7[%c1_377, %c13_378, %c0_379, %c0_380] : memref<2x16x8x128xf32, #tpu.memory_space<vmem>>, vector<1x1x8x128xf32>
    %1166 = vector.shape_cast %1165 : vector<1x1x8x128xf32> to vector<8x128xf32>
    %1167 = vector.shape_cast %1161 : vector<8x128xf32> to vector<1x1x8x128xf32>
    tpu.vector_store %arg7[%c1_377, %c13_378, %c0_379, %c0_380], %1167 {strides = array<i32>} : memref<2x16x8x128xf32, #tpu.memory_space<vmem>>, vector<1x1x8x128xf32>,
    %1168 = vector.broadcast %1057 : f32 to vector<8x128xf32>
    %1169 = arith.subf %1168, %1096 : vector<8x128xf32>
    %1170 = vector.broadcast %1061 : f32 to vector<8x128xf32>
    %1171 = arith.subf %1170, %1097 : vector<8x128xf32>
    %c1_381 = arith.constant 1 : index
    %c14_382 = arith.constant 14 : index
    %c0_383 = arith.constant 0 : index
    %c0_384 = arith.constant 0 : index
    %1172 = vector.load %arg7[%c1_381, %c14_382, %c0_383, %c0_384] : memref<2x16x8x128xf32, #tpu.memory_space<vmem>>, vector<1x1x8x128xf32>
    %1173 = vector.shape_cast %1172 : vector<1x1x8x128xf32> to vector<8x128xf32>
    %1174 = vector.shape_cast %1169 : vector<8x128xf32> to vector<1x1x8x128xf32>
    tpu.vector_store %arg7[%c1_381, %c14_382, %c0_383, %c0_384], %1174 {strides = array<i32>} : memref<2x16x8x128xf32, #tpu.memory_space<vmem>>, vector<1x1x8x128xf32>,
    %c1_385 = arith.constant 1 : index
    %c15_386 = arith.constant 15 : index
    %c0_387 = arith.constant 0 : index
    %c0_388 = arith.constant 0 : index
    %1175 = vector.load %arg7[%c1_385, %c15_386, %c0_387, %c0_388] : memref<2x16x8x128xf32, #tpu.memory_space<vmem>>, vector<1x1x8x128xf32>
    %1176 = vector.shape_cast %1175 : vector<1x1x8x128xf32> to vector<8x128xf32>
    %1177 = vector.shape_cast %1171 : vector<8x128xf32> to vector<1x1x8x128xf32>
    tpu.vector_store %arg7[%c1_385, %c15_386, %c0_387, %c0_388], %1177 {strides = array<i32>} : memref<2x16x8x128xf32, #tpu.memory_space<vmem>>, vector<1x1x8x128xf32>,
    %c0_i32_389 = arith.constant 0 : i32
    %1178 = arith.addi %774, %c0_i32_389 : i32
    %1179 = arith.index_cast %1178 : i32 to index
    %1180 = memref.load %arg1[%1179] : memref<32xf32, #tpu.memory_space<smem>>
    %c0_i32_390 = arith.constant 0 : i32
    %1181 = arith.addi %774, %c0_i32_390 : i32
    %c1_i32_391 = arith.constant 1 : i32
    %1182 = arith.addi %1181, %c1_i32_391 : i32
    %1183 = arith.index_cast %1182 : i32 to index
    %1184 = memref.load %arg1[%1183] : memref<32xf32, #tpu.memory_space<smem>>
    %1185 = arith.mulf %802, %1091 : vector<8x128xf32>
    %c1_392 = arith.constant 1 : index
    %c0_393 = arith.constant 0 : index
    %c0_394 = arith.constant 0 : index
    %c0_395 = arith.constant 0 : index
    %1186 = vector.load %arg5[%c1_392, %c0_393, %c0_394, %c0_395] : memref<2x8x8x128xf32, #tpu.memory_space<vmem>>, vector<1x1x8x128xf32>
    %1187 = vector.shape_cast %1186 : vector<1x1x8x128xf32> to vector<8x128xf32>
    %1188 = vector.shape_cast %1185 : vector<8x128xf32> to vector<1x1x8x128xf32>
    tpu.vector_store %arg5[%c1_392, %c0_393, %c0_394, %c0_395], %1188 {strides = array<i32>} : memref<2x8x8x128xf32, #tpu.memory_space<vmem>>, vector<1x1x8x128xf32>,
    %1189 = vector.broadcast %1180 : f32 to vector<8x128xf32>
    %1190 = arith.subf %1189, %1093 : vector<8x128xf32>
    %1191 = vector.broadcast %1184 : f32 to vector<8x128xf32>
    %1192 = arith.subf %1191, %1095 : vector<8x128xf32>
    %1193 = arith.mulf %1185, %1190 : vector<8x128xf32>
    %1194 = arith.mulf %1185, %1192 : vector<8x128xf32>
    %c1_396 = arith.constant 1 : index
    %c0_397 = arith.constant 0 : index
    %c0_398 = arith.constant 0 : index
    %c0_399 = arith.constant 0 : index
    %1195 = vector.load %arg6[%c1_396, %c0_397, %c0_398, %c0_399] : memref<2x16x8x128xf32, #tpu.memory_space<vmem>>, vector<1x1x8x128xf32>
    %1196 = vector.shape_cast %1195 : vector<1x1x8x128xf32> to vector<8x128xf32>
    %1197 = vector.shape_cast %1193 : vector<8x128xf32> to vector<1x1x8x128xf32>
    tpu.vector_store %arg6[%c1_396, %c0_397, %c0_398, %c0_399], %1197 {strides = array<i32>} : memref<2x16x8x128xf32, #tpu.memory_space<vmem>>, vector<1x1x8x128xf32>,
    %c1_400 = arith.constant 1 : index
    %c1_401 = arith.constant 1 : index
    %c0_402 = arith.constant 0 : index
    %c0_403 = arith.constant 0 : index
    %1198 = vector.load %arg6[%c1_400, %c1_401, %c0_402, %c0_403] : memref<2x16x8x128xf32, #tpu.memory_space<vmem>>, vector<1x1x8x128xf32>
    %1199 = vector.shape_cast %1198 : vector<1x1x8x128xf32> to vector<8x128xf32>
    %1200 = vector.shape_cast %1194 : vector<8x128xf32> to vector<1x1x8x128xf32>
    tpu.vector_store %arg6[%c1_400, %c1_401, %c0_402, %c0_403], %1200 {strides = array<i32>} : memref<2x16x8x128xf32, #tpu.memory_space<vmem>>, vector<1x1x8x128xf32>,
    %1201 = arith.mulf %1190, %1193 : vector<8x128xf32>
    %1202 = arith.addf %11, %1201 : vector<8x128xf32>
    %1203 = arith.mulf %1190, %1194 : vector<8x128xf32>
    %1204 = arith.addf %11, %1203 : vector<8x128xf32>
    %1205 = arith.mulf %1192, %1194 : vector<8x128xf32>
    %1206 = arith.addf %11, %1205 : vector<8x128xf32>
    %1207 = arith.mulf %1193, %1099 : vector<8x128xf32>
    %1208 = arith.addf %11, %1207 : vector<8x128xf32>
    %1209 = arith.mulf %1194, %1099 : vector<8x128xf32>
    %1210 = arith.addf %11, %1209 : vector<8x128xf32>
    %1211 = arith.mulf %1193, %1101 : vector<8x128xf32>
    %1212 = arith.addf %11, %1211 : vector<8x128xf32>
    %1213 = arith.mulf %1194, %1101 : vector<8x128xf32>
    %1214 = arith.addf %11, %1213 : vector<8x128xf32>
    %c2_i32_404 = arith.constant 2 : i32
    %1215 = arith.addi %774, %c2_i32_404 : i32
    %1216 = arith.index_cast %1215 : i32 to index
    %1217 = memref.load %arg1[%1216] : memref<32xf32, #tpu.memory_space<smem>>
    %c2_i32_405 = arith.constant 2 : i32
    %1218 = arith.addi %774, %c2_i32_405 : i32
    %c1_i32_406 = arith.constant 1 : i32
    %1219 = arith.addi %1218, %c1_i32_406 : i32
    %1220 = arith.index_cast %1219 : i32 to index
    %1221 = memref.load %arg1[%1220] : memref<32xf32, #tpu.memory_space<smem>>
    %1222 = arith.mulf %841, %1091 : vector<8x128xf32>
    %c1_407 = arith.constant 1 : index
    %c1_408 = arith.constant 1 : index
    %c0_409 = arith.constant 0 : index
    %c0_410 = arith.constant 0 : index
    %1223 = vector.load %arg5[%c1_407, %c1_408, %c0_409, %c0_410] : memref<2x8x8x128xf32, #tpu.memory_space<vmem>>, vector<1x1x8x128xf32>
    %1224 = vector.shape_cast %1223 : vector<1x1x8x128xf32> to vector<8x128xf32>
    %1225 = vector.shape_cast %1222 : vector<8x128xf32> to vector<1x1x8x128xf32>
    tpu.vector_store %arg5[%c1_407, %c1_408, %c0_409, %c0_410], %1225 {strides = array<i32>} : memref<2x8x8x128xf32, #tpu.memory_space<vmem>>, vector<1x1x8x128xf32>,
    %1226 = vector.broadcast %1217 : f32 to vector<8x128xf32>
    %1227 = arith.subf %1226, %1093 : vector<8x128xf32>
    %1228 = vector.broadcast %1221 : f32 to vector<8x128xf32>
    %1229 = arith.subf %1228, %1095 : vector<8x128xf32>
    %1230 = arith.mulf %1222, %1227 : vector<8x128xf32>
    %1231 = arith.mulf %1222, %1229 : vector<8x128xf32>
    %c1_411 = arith.constant 1 : index
    %c2_412 = arith.constant 2 : index
    %c0_413 = arith.constant 0 : index
    %c0_414 = arith.constant 0 : index
    %1232 = vector.load %arg6[%c1_411, %c2_412, %c0_413, %c0_414] : memref<2x16x8x128xf32, #tpu.memory_space<vmem>>, vector<1x1x8x128xf32>
    %1233 = vector.shape_cast %1232 : vector<1x1x8x128xf32> to vector<8x128xf32>
    %1234 = vector.shape_cast %1230 : vector<8x128xf32> to vector<1x1x8x128xf32>
    tpu.vector_store %arg6[%c1_411, %c2_412, %c0_413, %c0_414], %1234 {strides = array<i32>} : memref<2x16x8x128xf32, #tpu.memory_space<vmem>>, vector<1x1x8x128xf32>,
    %c1_415 = arith.constant 1 : index
    %c3_416 = arith.constant 3 : index
    %c0_417 = arith.constant 0 : index
    %c0_418 = arith.constant 0 : index
    %1235 = vector.load %arg6[%c1_415, %c3_416, %c0_417, %c0_418] : memref<2x16x8x128xf32, #tpu.memory_space<vmem>>, vector<1x1x8x128xf32>
    %1236 = vector.shape_cast %1235 : vector<1x1x8x128xf32> to vector<8x128xf32>
    %1237 = vector.shape_cast %1231 : vector<8x128xf32> to vector<1x1x8x128xf32>
    tpu.vector_store %arg6[%c1_415, %c3_416, %c0_417, %c0_418], %1237 {strides = array<i32>} : memref<2x16x8x128xf32, #tpu.memory_space<vmem>>, vector<1x1x8x128xf32>,
    %1238 = arith.mulf %1227, %1230 : vector<8x128xf32>
    %1239 = arith.addf %1202, %1238 : vector<8x128xf32>
    %1240 = arith.mulf %1227, %1231 : vector<8x128xf32>
    %1241 = arith.addf %1204, %1240 : vector<8x128xf32>
    %1242 = arith.mulf %1229, %1231 : vector<8x128xf32>
    %1243 = arith.addf %1206, %1242 : vector<8x128xf32>
    %1244 = arith.mulf %1230, %1109 : vector<8x128xf32>
    %1245 = arith.addf %1208, %1244 : vector<8x128xf32>
    %1246 = arith.mulf %1231, %1109 : vector<8x128xf32>
    %1247 = arith.addf %1210, %1246 : vector<8x128xf32>
    %1248 = arith.mulf %1230, %1111 : vector<8x128xf32>
    %1249 = arith.addf %1212, %1248 : vector<8x128xf32>
    %1250 = arith.mulf %1231, %1111 : vector<8x128xf32>
    %1251 = arith.addf %1214, %1250 : vector<8x128xf32>
    %c4_i32_419 = arith.constant 4 : i32
    %1252 = arith.addi %774, %c4_i32_419 : i32
    %1253 = arith.index_cast %1252 : i32 to index
    %1254 = memref.load %arg1[%1253] : memref<32xf32, #tpu.memory_space<smem>>
    %c4_i32_420 = arith.constant 4 : i32
    %1255 = arith.addi %774, %c4_i32_420 : i32
    %c1_i32_421 = arith.constant 1 : i32
    %1256 = arith.addi %1255, %c1_i32_421 : i32
    %1257 = arith.index_cast %1256 : i32 to index
    %1258 = memref.load %arg1[%1257] : memref<32xf32, #tpu.memory_space<smem>>
    %1259 = arith.mulf %880, %1091 : vector<8x128xf32>
    %c1_422 = arith.constant 1 : index
    %c2_423 = arith.constant 2 : index
    %c0_424 = arith.constant 0 : index
    %c0_425 = arith.constant 0 : index
    %1260 = vector.load %arg5[%c1_422, %c2_423, %c0_424, %c0_425] : memref<2x8x8x128xf32, #tpu.memory_space<vmem>>, vector<1x1x8x128xf32>
    %1261 = vector.shape_cast %1260 : vector<1x1x8x128xf32> to vector<8x128xf32>
    %1262 = vector.shape_cast %1259 : vector<8x128xf32> to vector<1x1x8x128xf32>
    tpu.vector_store %arg5[%c1_422, %c2_423, %c0_424, %c0_425], %1262 {strides = array<i32>} : memref<2x8x8x128xf32, #tpu.memory_space<vmem>>, vector<1x1x8x128xf32>,
    %1263 = vector.broadcast %1254 : f32 to vector<8x128xf32>
    %1264 = arith.subf %1263, %1093 : vector<8x128xf32>
    %1265 = vector.broadcast %1258 : f32 to vector<8x128xf32>
    %1266 = arith.subf %1265, %1095 : vector<8x128xf32>
    %1267 = arith.mulf %1259, %1264 : vector<8x128xf32>
    %1268 = arith.mulf %1259, %1266 : vector<8x128xf32>
    %c1_426 = arith.constant 1 : index
    %c4_427 = arith.constant 4 : index
    %c0_428 = arith.constant 0 : index
    %c0_429 = arith.constant 0 : index
    %1269 = vector.load %arg6[%c1_426, %c4_427, %c0_428, %c0_429] : memref<2x16x8x128xf32, #tpu.memory_space<vmem>>, vector<1x1x8x128xf32>
    %1270 = vector.shape_cast %1269 : vector<1x1x8x128xf32> to vector<8x128xf32>
    %1271 = vector.shape_cast %1267 : vector<8x128xf32> to vector<1x1x8x128xf32>
    tpu.vector_store %arg6[%c1_426, %c4_427, %c0_428, %c0_429], %1271 {strides = array<i32>} : memref<2x16x8x128xf32, #tpu.memory_space<vmem>>, vector<1x1x8x128xf32>,
    %c1_430 = arith.constant 1 : index
    %c5_431 = arith.constant 5 : index
    %c0_432 = arith.constant 0 : index
    %c0_433 = arith.constant 0 : index
    %1272 = vector.load %arg6[%c1_430, %c5_431, %c0_432, %c0_433] : memref<2x16x8x128xf32, #tpu.memory_space<vmem>>, vector<1x1x8x128xf32>
    %1273 = vector.shape_cast %1272 : vector<1x1x8x128xf32> to vector<8x128xf32>
    %1274 = vector.shape_cast %1268 : vector<8x128xf32> to vector<1x1x8x128xf32>
    tpu.vector_store %arg6[%c1_430, %c5_431, %c0_432, %c0_433], %1274 {strides = array<i32>} : memref<2x16x8x128xf32, #tpu.memory_space<vmem>>, vector<1x1x8x128xf32>,
    %1275 = arith.mulf %1264, %1267 : vector<8x128xf32>
    %1276 = arith.addf %1239, %1275 : vector<8x128xf32>
    %1277 = arith.mulf %1264, %1268 : vector<8x128xf32>
    %1278 = arith.addf %1241, %1277 : vector<8x128xf32>
    %1279 = arith.mulf %1266, %1268 : vector<8x128xf32>
    %1280 = arith.addf %1243, %1279 : vector<8x128xf32>
    %1281 = arith.mulf %1267, %1119 : vector<8x128xf32>
    %1282 = arith.addf %1245, %1281 : vector<8x128xf32>
    %1283 = arith.mulf %1268, %1119 : vector<8x128xf32>
    %1284 = arith.addf %1247, %1283 : vector<8x128xf32>
    %1285 = arith.mulf %1267, %1121 : vector<8x128xf32>
    %1286 = arith.addf %1249, %1285 : vector<8x128xf32>
    %1287 = arith.mulf %1268, %1121 : vector<8x128xf32>
    %1288 = arith.addf %1251, %1287 : vector<8x128xf32>
    %c6_i32_434 = arith.constant 6 : i32
    %1289 = arith.addi %774, %c6_i32_434 : i32
    %1290 = arith.index_cast %1289 : i32 to index
    %1291 = memref.load %arg1[%1290] : memref<32xf32, #tpu.memory_space<smem>>
    %c6_i32_435 = arith.constant 6 : i32
    %1292 = arith.addi %774, %c6_i32_435 : i32
    %c1_i32_436 = arith.constant 1 : i32
    %1293 = arith.addi %1292, %c1_i32_436 : i32
    %1294 = arith.index_cast %1293 : i32 to index
    %1295 = memref.load %arg1[%1294] : memref<32xf32, #tpu.memory_space<smem>>
    %1296 = arith.mulf %919, %1091 : vector<8x128xf32>
    %c1_437 = arith.constant 1 : index
    %c3_438 = arith.constant 3 : index
    %c0_439 = arith.constant 0 : index
    %c0_440 = arith.constant 0 : index
    %1297 = vector.load %arg5[%c1_437, %c3_438, %c0_439, %c0_440] : memref<2x8x8x128xf32, #tpu.memory_space<vmem>>, vector<1x1x8x128xf32>
    %1298 = vector.shape_cast %1297 : vector<1x1x8x128xf32> to vector<8x128xf32>
    %1299 = vector.shape_cast %1296 : vector<8x128xf32> to vector<1x1x8x128xf32>
    tpu.vector_store %arg5[%c1_437, %c3_438, %c0_439, %c0_440], %1299 {strides = array<i32>} : memref<2x8x8x128xf32, #tpu.memory_space<vmem>>, vector<1x1x8x128xf32>,
    %1300 = vector.broadcast %1291 : f32 to vector<8x128xf32>
    %1301 = arith.subf %1300, %1093 : vector<8x128xf32>
    %1302 = vector.broadcast %1295 : f32 to vector<8x128xf32>
    %1303 = arith.subf %1302, %1095 : vector<8x128xf32>
    %1304 = arith.mulf %1296, %1301 : vector<8x128xf32>
    %1305 = arith.mulf %1296, %1303 : vector<8x128xf32>
    %c1_441 = arith.constant 1 : index
    %c6_442 = arith.constant 6 : index
    %c0_443 = arith.constant 0 : index
    %c0_444 = arith.constant 0 : index
    %1306 = vector.load %arg6[%c1_441, %c6_442, %c0_443, %c0_444] : memref<2x16x8x128xf32, #tpu.memory_space<vmem>>, vector<1x1x8x128xf32>
    %1307 = vector.shape_cast %1306 : vector<1x1x8x128xf32> to vector<8x128xf32>
    %1308 = vector.shape_cast %1304 : vector<8x128xf32> to vector<1x1x8x128xf32>
    tpu.vector_store %arg6[%c1_441, %c6_442, %c0_443, %c0_444], %1308 {strides = array<i32>} : memref<2x16x8x128xf32, #tpu.memory_space<vmem>>, vector<1x1x8x128xf32>,
    %c1_445 = arith.constant 1 : index
    %c7_446 = arith.constant 7 : index
    %c0_447 = arith.constant 0 : index
    %c0_448 = arith.constant 0 : index
    %1309 = vector.load %arg6[%c1_445, %c7_446, %c0_447, %c0_448] : memref<2x16x8x128xf32, #tpu.memory_space<vmem>>, vector<1x1x8x128xf32>
    %1310 = vector.shape_cast %1309 : vector<1x1x8x128xf32> to vector<8x128xf32>
    %1311 = vector.shape_cast %1305 : vector<8x128xf32> to vector<1x1x8x128xf32>
    tpu.vector_store %arg6[%c1_445, %c7_446, %c0_447, %c0_448], %1311 {strides = array<i32>} : memref<2x16x8x128xf32, #tpu.memory_space<vmem>>, vector<1x1x8x128xf32>,
    %1312 = arith.mulf %1301, %1304 : vector<8x128xf32>
    %1313 = arith.addf %1276, %1312 : vector<8x128xf32>
    %1314 = arith.mulf %1301, %1305 : vector<8x128xf32>
    %1315 = arith.addf %1278, %1314 : vector<8x128xf32>
    %1316 = arith.mulf %1303, %1305 : vector<8x128xf32>
    %1317 = arith.addf %1280, %1316 : vector<8x128xf32>
    %1318 = arith.mulf %1304, %1129 : vector<8x128xf32>
    %1319 = arith.addf %1282, %1318 : vector<8x128xf32>
    %1320 = arith.mulf %1305, %1129 : vector<8x128xf32>
    %1321 = arith.addf %1284, %1320 : vector<8x128xf32>
    %1322 = arith.mulf %1304, %1131 : vector<8x128xf32>
    %1323 = arith.addf %1286, %1322 : vector<8x128xf32>
    %1324 = arith.mulf %1305, %1131 : vector<8x128xf32>
    %1325 = arith.addf %1288, %1324 : vector<8x128xf32>
    %c8_i32_449 = arith.constant 8 : i32
    %1326 = arith.addi %774, %c8_i32_449 : i32
    %1327 = arith.index_cast %1326 : i32 to index
    %1328 = memref.load %arg1[%1327] : memref<32xf32, #tpu.memory_space<smem>>
    %c8_i32_450 = arith.constant 8 : i32
    %1329 = arith.addi %774, %c8_i32_450 : i32
    %c1_i32_451 = arith.constant 1 : i32
    %1330 = arith.addi %1329, %c1_i32_451 : i32
    %1331 = arith.index_cast %1330 : i32 to index
    %1332 = memref.load %arg1[%1331] : memref<32xf32, #tpu.memory_space<smem>>
    %1333 = arith.mulf %958, %1091 : vector<8x128xf32>
    %c1_452 = arith.constant 1 : index
    %c4_453 = arith.constant 4 : index
    %c0_454 = arith.constant 0 : index
    %c0_455 = arith.constant 0 : index
    %1334 = vector.load %arg5[%c1_452, %c4_453, %c0_454, %c0_455] : memref<2x8x8x128xf32, #tpu.memory_space<vmem>>, vector<1x1x8x128xf32>
    %1335 = vector.shape_cast %1334 : vector<1x1x8x128xf32> to vector<8x128xf32>
    %1336 = vector.shape_cast %1333 : vector<8x128xf32> to vector<1x1x8x128xf32>
    tpu.vector_store %arg5[%c1_452, %c4_453, %c0_454, %c0_455], %1336 {strides = array<i32>} : memref<2x8x8x128xf32, #tpu.memory_space<vmem>>, vector<1x1x8x128xf32>,
    %1337 = vector.broadcast %1328 : f32 to vector<8x128xf32>
    %1338 = arith.subf %1337, %1093 : vector<8x128xf32>
    %1339 = vector.broadcast %1332 : f32 to vector<8x128xf32>
    %1340 = arith.subf %1339, %1095 : vector<8x128xf32>
    %1341 = arith.mulf %1333, %1338 : vector<8x128xf32>
    %1342 = arith.mulf %1333, %1340 : vector<8x128xf32>
    %c1_456 = arith.constant 1 : index
    %c8_457 = arith.constant 8 : index
    %c0_458 = arith.constant 0 : index
    %c0_459 = arith.constant 0 : index
    %1343 = vector.load %arg6[%c1_456, %c8_457, %c0_458, %c0_459] : memref<2x16x8x128xf32, #tpu.memory_space<vmem>>, vector<1x1x8x128xf32>
    %1344 = vector.shape_cast %1343 : vector<1x1x8x128xf32> to vector<8x128xf32>
    %1345 = vector.shape_cast %1341 : vector<8x128xf32> to vector<1x1x8x128xf32>
    tpu.vector_store %arg6[%c1_456, %c8_457, %c0_458, %c0_459], %1345 {strides = array<i32>} : memref<2x16x8x128xf32, #tpu.memory_space<vmem>>, vector<1x1x8x128xf32>,
    %c1_460 = arith.constant 1 : index
    %c9_461 = arith.constant 9 : index
    %c0_462 = arith.constant 0 : index
    %c0_463 = arith.constant 0 : index
    %1346 = vector.load %arg6[%c1_460, %c9_461, %c0_462, %c0_463] : memref<2x16x8x128xf32, #tpu.memory_space<vmem>>, vector<1x1x8x128xf32>
    %1347 = vector.shape_cast %1346 : vector<1x1x8x128xf32> to vector<8x128xf32>
    %1348 = vector.shape_cast %1342 : vector<8x128xf32> to vector<1x1x8x128xf32>
    tpu.vector_store %arg6[%c1_460, %c9_461, %c0_462, %c0_463], %1348 {strides = array<i32>} : memref<2x16x8x128xf32, #tpu.memory_space<vmem>>, vector<1x1x8x128xf32>,
    %1349 = arith.mulf %1338, %1341 : vector<8x128xf32>
    %1350 = arith.addf %1313, %1349 : vector<8x128xf32>
    %1351 = arith.mulf %1338, %1342 : vector<8x128xf32>
    %1352 = arith.addf %1315, %1351 : vector<8x128xf32>
    %1353 = arith.mulf %1340, %1342 : vector<8x128xf32>
    %1354 = arith.addf %1317, %1353 : vector<8x128xf32>
    %1355 = arith.mulf %1341, %1139 : vector<8x128xf32>
    %1356 = arith.addf %1319, %1355 : vector<8x128xf32>
    %1357 = arith.mulf %1342, %1139 : vector<8x128xf32>
    %1358 = arith.addf %1321, %1357 : vector<8x128xf32>
    %1359 = arith.mulf %1341, %1141 : vector<8x128xf32>
    %1360 = arith.addf %1323, %1359 : vector<8x128xf32>
    %1361 = arith.mulf %1342, %1141 : vector<8x128xf32>
    %1362 = arith.addf %1325, %1361 : vector<8x128xf32>
    %c10_i32_464 = arith.constant 10 : i32
    %1363 = arith.addi %774, %c10_i32_464 : i32
    %1364 = arith.index_cast %1363 : i32 to index
    %1365 = memref.load %arg1[%1364] : memref<32xf32, #tpu.memory_space<smem>>
    %c10_i32_465 = arith.constant 10 : i32
    %1366 = arith.addi %774, %c10_i32_465 : i32
    %c1_i32_466 = arith.constant 1 : i32
    %1367 = arith.addi %1366, %c1_i32_466 : i32
    %1368 = arith.index_cast %1367 : i32 to index
    %1369 = memref.load %arg1[%1368] : memref<32xf32, #tpu.memory_space<smem>>
    %1370 = arith.mulf %997, %1091 : vector<8x128xf32>
    %c1_467 = arith.constant 1 : index
    %c5_468 = arith.constant 5 : index
    %c0_469 = arith.constant 0 : index
    %c0_470 = arith.constant 0 : index
    %1371 = vector.load %arg5[%c1_467, %c5_468, %c0_469, %c0_470] : memref<2x8x8x128xf32, #tpu.memory_space<vmem>>, vector<1x1x8x128xf32>
    %1372 = vector.shape_cast %1371 : vector<1x1x8x128xf32> to vector<8x128xf32>
    %1373 = vector.shape_cast %1370 : vector<8x128xf32> to vector<1x1x8x128xf32>
    tpu.vector_store %arg5[%c1_467, %c5_468, %c0_469, %c0_470], %1373 {strides = array<i32>} : memref<2x8x8x128xf32, #tpu.memory_space<vmem>>, vector<1x1x8x128xf32>,
    %1374 = vector.broadcast %1365 : f32 to vector<8x128xf32>
    %1375 = arith.subf %1374, %1093 : vector<8x128xf32>
    %1376 = vector.broadcast %1369 : f32 to vector<8x128xf32>
    %1377 = arith.subf %1376, %1095 : vector<8x128xf32>
    %1378 = arith.mulf %1370, %1375 : vector<8x128xf32>
    %1379 = arith.mulf %1370, %1377 : vector<8x128xf32>
    %c1_471 = arith.constant 1 : index
    %c10_472 = arith.constant 10 : index
    %c0_473 = arith.constant 0 : index
    %c0_474 = arith.constant 0 : index
    %1380 = vector.load %arg6[%c1_471, %c10_472, %c0_473, %c0_474] : memref<2x16x8x128xf32, #tpu.memory_space<vmem>>, vector<1x1x8x128xf32>
    %1381 = vector.shape_cast %1380 : vector<1x1x8x128xf32> to vector<8x128xf32>
    %1382 = vector.shape_cast %1378 : vector<8x128xf32> to vector<1x1x8x128xf32>
    tpu.vector_store %arg6[%c1_471, %c10_472, %c0_473, %c0_474], %1382 {strides = array<i32>} : memref<2x16x8x128xf32, #tpu.memory_space<vmem>>, vector<1x1x8x128xf32>,
    %c1_475 = arith.constant 1 : index
    %c11_476 = arith.constant 11 : index
    %c0_477 = arith.constant 0 : index
    %c0_478 = arith.constant 0 : index
    %1383 = vector.load %arg6[%c1_475, %c11_476, %c0_477, %c0_478] : memref<2x16x8x128xf32, #tpu.memory_space<vmem>>, vector<1x1x8x128xf32>
    %1384 = vector.shape_cast %1383 : vector<1x1x8x128xf32> to vector<8x128xf32>
    %1385 = vector.shape_cast %1379 : vector<8x128xf32> to vector<1x1x8x128xf32>
    tpu.vector_store %arg6[%c1_475, %c11_476, %c0_477, %c0_478], %1385 {strides = array<i32>} : memref<2x16x8x128xf32, #tpu.memory_space<vmem>>, vector<1x1x8x128xf32>,
    %1386 = arith.mulf %1375, %1378 : vector<8x128xf32>
    %1387 = arith.addf %1350, %1386 : vector<8x128xf32>
    %1388 = arith.mulf %1375, %1379 : vector<8x128xf32>
    %1389 = arith.addf %1352, %1388 : vector<8x128xf32>
    %1390 = arith.mulf %1377, %1379 : vector<8x128xf32>
    %1391 = arith.addf %1354, %1390 : vector<8x128xf32>
    %1392 = arith.mulf %1378, %1149 : vector<8x128xf32>
    %1393 = arith.addf %1356, %1392 : vector<8x128xf32>
    %1394 = arith.mulf %1379, %1149 : vector<8x128xf32>
    %1395 = arith.addf %1358, %1394 : vector<8x128xf32>
    %1396 = arith.mulf %1378, %1151 : vector<8x128xf32>
    %1397 = arith.addf %1360, %1396 : vector<8x128xf32>
    %1398 = arith.mulf %1379, %1151 : vector<8x128xf32>
    %1399 = arith.addf %1362, %1398 : vector<8x128xf32>
    %c12_i32_479 = arith.constant 12 : i32
    %1400 = arith.addi %774, %c12_i32_479 : i32
    %1401 = arith.index_cast %1400 : i32 to index
    %1402 = memref.load %arg1[%1401] : memref<32xf32, #tpu.memory_space<smem>>
    %c12_i32_480 = arith.constant 12 : i32
    %1403 = arith.addi %774, %c12_i32_480 : i32
    %c1_i32_481 = arith.constant 1 : i32
    %1404 = arith.addi %1403, %c1_i32_481 : i32
    %1405 = arith.index_cast %1404 : i32 to index
    %1406 = memref.load %arg1[%1405] : memref<32xf32, #tpu.memory_space<smem>>
    %1407 = arith.mulf %1036, %1091 : vector<8x128xf32>
    %c1_482 = arith.constant 1 : index
    %c6_483 = arith.constant 6 : index
    %c0_484 = arith.constant 0 : index
    %c0_485 = arith.constant 0 : index
    %1408 = vector.load %arg5[%c1_482, %c6_483, %c0_484, %c0_485] : memref<2x8x8x128xf32, #tpu.memory_space<vmem>>, vector<1x1x8x128xf32>
    %1409 = vector.shape_cast %1408 : vector<1x1x8x128xf32> to vector<8x128xf32>
    %1410 = vector.shape_cast %1407 : vector<8x128xf32> to vector<1x1x8x128xf32>
    tpu.vector_store %arg5[%c1_482, %c6_483, %c0_484, %c0_485], %1410 {strides = array<i32>} : memref<2x8x8x128xf32, #tpu.memory_space<vmem>>, vector<1x1x8x128xf32>,
    %1411 = vector.broadcast %1402 : f32 to vector<8x128xf32>
    %1412 = arith.subf %1411, %1093 : vector<8x128xf32>
    %1413 = vector.broadcast %1406 : f32 to vector<8x128xf32>
    %1414 = arith.subf %1413, %1095 : vector<8x128xf32>
    %1415 = arith.mulf %1407, %1412 : vector<8x128xf32>
    %1416 = arith.mulf %1407, %1414 : vector<8x128xf32>
    %c1_486 = arith.constant 1 : index
    %c12_487 = arith.constant 12 : index
    %c0_488 = arith.constant 0 : index
    %c0_489 = arith.constant 0 : index
    %1417 = vector.load %arg6[%c1_486, %c12_487, %c0_488, %c0_489] : memref<2x16x8x128xf32, #tpu.memory_space<vmem>>, vector<1x1x8x128xf32>
    %1418 = vector.shape_cast %1417 : vector<1x1x8x128xf32> to vector<8x128xf32>
    %1419 = vector.shape_cast %1415 : vector<8x128xf32> to vector<1x1x8x128xf32>
    tpu.vector_store %arg6[%c1_486, %c12_487, %c0_488, %c0_489], %1419 {strides = array<i32>} : memref<2x16x8x128xf32, #tpu.memory_space<vmem>>, vector<1x1x8x128xf32>,
    %c1_490 = arith.constant 1 : index
    %c13_491 = arith.constant 13 : index
    %c0_492 = arith.constant 0 : index
    %c0_493 = arith.constant 0 : index
    %1420 = vector.load %arg6[%c1_490, %c13_491, %c0_492, %c0_493] : memref<2x16x8x128xf32, #tpu.memory_space<vmem>>, vector<1x1x8x128xf32>
    %1421 = vector.shape_cast %1420 : vector<1x1x8x128xf32> to vector<8x128xf32>
    %1422 = vector.shape_cast %1416 : vector<8x128xf32> to vector<1x1x8x128xf32>
    tpu.vector_store %arg6[%c1_490, %c13_491, %c0_492, %c0_493], %1422 {strides = array<i32>} : memref<2x16x8x128xf32, #tpu.memory_space<vmem>>, vector<1x1x8x128xf32>,
    %1423 = arith.mulf %1412, %1415 : vector<8x128xf32>
    %1424 = arith.addf %1387, %1423 : vector<8x128xf32>
    %1425 = arith.mulf %1412, %1416 : vector<8x128xf32>
    %1426 = arith.addf %1389, %1425 : vector<8x128xf32>
    %1427 = arith.mulf %1414, %1416 : vector<8x128xf32>
    %1428 = arith.addf %1391, %1427 : vector<8x128xf32>
    %1429 = arith.mulf %1415, %1159 : vector<8x128xf32>
    %1430 = arith.addf %1393, %1429 : vector<8x128xf32>
    %1431 = arith.mulf %1416, %1159 : vector<8x128xf32>
    %1432 = arith.addf %1395, %1431 : vector<8x128xf32>
    %1433 = arith.mulf %1415, %1161 : vector<8x128xf32>
    %1434 = arith.addf %1397, %1433 : vector<8x128xf32>
    %1435 = arith.mulf %1416, %1161 : vector<8x128xf32>
    %1436 = arith.addf %1399, %1435 : vector<8x128xf32>
    %c14_i32_494 = arith.constant 14 : i32
    %1437 = arith.addi %774, %c14_i32_494 : i32
    %1438 = arith.index_cast %1437 : i32 to index
    %1439 = memref.load %arg1[%1438] : memref<32xf32, #tpu.memory_space<smem>>
    %c14_i32_495 = arith.constant 14 : i32
    %1440 = arith.addi %774, %c14_i32_495 : i32
    %c1_i32_496 = arith.constant 1 : i32
    %1441 = arith.addi %1440, %c1_i32_496 : i32
    %1442 = arith.index_cast %1441 : i32 to index
    %1443 = memref.load %arg1[%1442] : memref<32xf32, #tpu.memory_space<smem>>
    %1444 = arith.mulf %1075, %1091 : vector<8x128xf32>
    %c1_497 = arith.constant 1 : index
    %c7_498 = arith.constant 7 : index
    %c0_499 = arith.constant 0 : index
    %c0_500 = arith.constant 0 : index
    %1445 = vector.load %arg5[%c1_497, %c7_498, %c0_499, %c0_500] : memref<2x8x8x128xf32, #tpu.memory_space<vmem>>, vector<1x1x8x128xf32>
    %1446 = vector.shape_cast %1445 : vector<1x1x8x128xf32> to vector<8x128xf32>
    %1447 = vector.shape_cast %1444 : vector<8x128xf32> to vector<1x1x8x128xf32>
    tpu.vector_store %arg5[%c1_497, %c7_498, %c0_499, %c0_500], %1447 {strides = array<i32>} : memref<2x8x8x128xf32, #tpu.memory_space<vmem>>, vector<1x1x8x128xf32>,
    %1448 = vector.broadcast %1439 : f32 to vector<8x128xf32>
    %1449 = arith.subf %1448, %1093 : vector<8x128xf32>
    %1450 = vector.broadcast %1443 : f32 to vector<8x128xf32>
    %1451 = arith.subf %1450, %1095 : vector<8x128xf32>
    %1452 = arith.mulf %1444, %1449 : vector<8x128xf32>
    %1453 = arith.mulf %1444, %1451 : vector<8x128xf32>
    %c1_501 = arith.constant 1 : index
    %c14_502 = arith.constant 14 : index
    %c0_503 = arith.constant 0 : index
    %c0_504 = arith.constant 0 : index
    %1454 = vector.load %arg6[%c1_501, %c14_502, %c0_503, %c0_504] : memref<2x16x8x128xf32, #tpu.memory_space<vmem>>, vector<1x1x8x128xf32>
    %1455 = vector.shape_cast %1454 : vector<1x1x8x128xf32> to vector<8x128xf32>
    %1456 = vector.shape_cast %1452 : vector<8x128xf32> to vector<1x1x8x128xf32>
    tpu.vector_store %arg6[%c1_501, %c14_502, %c0_503, %c0_504], %1456 {strides = array<i32>} : memref<2x16x8x128xf32, #tpu.memory_space<vmem>>, vector<1x1x8x128xf32>,
    %c1_505 = arith.constant 1 : index
    %c15_506 = arith.constant 15 : index
    %c0_507 = arith.constant 0 : index
    %c0_508 = arith.constant 0 : index
    %1457 = vector.load %arg6[%c1_505, %c15_506, %c0_507, %c0_508] : memref<2x16x8x128xf32, #tpu.memory_space<vmem>>, vector<1x1x8x128xf32>
    %1458 = vector.shape_cast %1457 : vector<1x1x8x128xf32> to vector<8x128xf32>
    %1459 = vector.shape_cast %1453 : vector<8x128xf32> to vector<1x1x8x128xf32>
    tpu.vector_store %arg6[%c1_505, %c15_506, %c0_507, %c0_508], %1459 {strides = array<i32>} : memref<2x16x8x128xf32, #tpu.memory_space<vmem>>, vector<1x1x8x128xf32>,
    %1460 = arith.mulf %1449, %1452 : vector<8x128xf32>
    %1461 = arith.addf %1424, %1460 : vector<8x128xf32>
    %1462 = arith.mulf %1449, %1453 : vector<8x128xf32>
    %1463 = arith.addf %1426, %1462 : vector<8x128xf32>
    %1464 = arith.mulf %1451, %1453 : vector<8x128xf32>
    %1465 = arith.addf %1428, %1464 : vector<8x128xf32>
    %1466 = arith.mulf %1452, %1169 : vector<8x128xf32>
    %1467 = arith.addf %1430, %1466 : vector<8x128xf32>
    %1468 = arith.mulf %1453, %1169 : vector<8x128xf32>
    %1469 = arith.addf %1432, %1468 : vector<8x128xf32>
    %1470 = arith.mulf %1452, %1171 : vector<8x128xf32>
    %1471 = arith.addf %1434, %1470 : vector<8x128xf32>
    %1472 = arith.mulf %1453, %1171 : vector<8x128xf32>
    %1473 = arith.addf %1436, %1472 : vector<8x128xf32>
    %1474 = arith.mulf %1461, %1465 : vector<8x128xf32>
    %1475 = arith.mulf %1463, %1463 : vector<8x128xf32>
    %1476 = arith.subf %1474, %1475 : vector<8x128xf32>
    %1477 = tpu.reciprocal %1476 {approx = true} : vector<8x128xf32> -> vector<8x128xf32>
    %1478 = arith.mulf %1476, %1477 : vector<8x128xf32>
    %cst_509 = arith.constant 2.000000e+00 : f32
    %1479 = vector.broadcast %cst_509 : f32 to vector<8x128xf32>
    %1480 = arith.subf %1479, %1478 : vector<8x128xf32>
    %1481 = arith.mulf %1477, %1480 : vector<8x128xf32>
    %1482 = arith.subf %7, %1093 : vector<8x128xf32>
    %1483 = arith.subf %10, %1095 : vector<8x128xf32>
    %1484 = arith.mulf %1482, %1465 : vector<8x128xf32>
    %1485 = arith.mulf %1483, %1463 : vector<8x128xf32>
    %1486 = arith.subf %1484, %1485 : vector<8x128xf32>
    %1487 = arith.mulf %1486, %1481 : vector<8x128xf32>
    %1488 = arith.mulf %1483, %1461 : vector<8x128xf32>
    %1489 = arith.mulf %1482, %1463 : vector<8x128xf32>
    %1490 = arith.subf %1488, %1489 : vector<8x128xf32>
    %1491 = arith.mulf %1490, %1481 : vector<8x128xf32>
    %1492 = arith.mulf %1487, %1467 : vector<8x128xf32>
    %1493 = arith.mulf %1491, %1469 : vector<8x128xf32>
    %1494 = arith.addf %1492, %1493 : vector<8x128xf32>
    %1495 = arith.addf %1494, %1096 : vector<8x128xf32>
    %1496 = arith.mulf %1487, %1471 : vector<8x128xf32>
    %1497 = arith.mulf %1491, %1473 : vector<8x128xf32>
    %1498 = arith.addf %1496, %1497 : vector<8x128xf32>
    %1499 = arith.addf %1498, %1097 : vector<8x128xf32>
    %cst_510 = arith.constant 0.000000e+00 : f32
    %1500 = vector.broadcast %cst_510 : f32 to vector<8x128xf32>
    %1501 = arith.cmpf oge, %1495, %1500 : vector<8x128xf32>
    %cst_511 = arith.constant 3.100000e+01 : f32
    %1502 = vector.broadcast %cst_511 : f32 to vector<8x128xf32>
    %1503 = arith.cmpf ole, %1495, %1502 : vector<8x128xf32>
    %1504 = arith.andi %1501, %1503 : vector<8x128xi1>
    %cst_512 = arith.constant 0.000000e+00 : f32
    %1505 = vector.broadcast %cst_512 : f32 to vector<8x128xf32>
    %1506 = arith.select %1504, %1495, %1505 : vector<8x128xi1>, vector<8x128xf32>
    %cst_513 = arith.constant 0.000000e+00 : f32
    %1507 = vector.broadcast %cst_513 : f32 to vector<8x128xf32>
    %1508 = arith.cmpf oge, %1499, %1507 : vector<8x128xf32>
    %cst_514 = arith.constant 3.100000e+01 : f32
    %1509 = vector.broadcast %cst_514 : f32 to vector<8x128xf32>
    %1510 = arith.cmpf ole, %1499, %1509 : vector<8x128xf32>
    %1511 = arith.andi %1508, %1510 : vector<8x128xi1>
    %cst_515 = arith.constant 0.000000e+00 : f32
    %1512 = vector.broadcast %cst_515 : f32 to vector<8x128xf32>
    %1513 = arith.select %1511, %1499, %1512 : vector<8x128xi1>, vector<8x128xf32>
    %c1_516 = arith.constant 1 : index
    %c0_517 = arith.constant 0 : index
    %c0_518 = arith.constant 0 : index
    %c0_519 = arith.constant 0 : index
    %1514 = vector.load %arg3[%c1_516, %c0_517, %c0_518, %c0_519] : memref<2x2x8x128xf32, #tpu.memory_space<vmem>>, vector<1x1x8x128xf32>
    %1515 = vector.shape_cast %1514 : vector<1x1x8x128xf32> to vector<8x128xf32>
    %1516 = vector.shape_cast %1506 : vector<8x128xf32> to vector<1x1x8x128xf32>
    tpu.vector_store %arg3[%c1_516, %c0_517, %c0_518, %c0_519], %1516 {strides = array<i32>} : memref<2x2x8x128xf32, #tpu.memory_space<vmem>>, vector<1x1x8x128xf32>,
    %c1_520 = arith.constant 1 : index
    %c1_521 = arith.constant 1 : index
    %c0_522 = arith.constant 0 : index
    %c0_523 = arith.constant 0 : index
    %1517 = vector.load %arg3[%c1_520, %c1_521, %c0_522, %c0_523] : memref<2x2x8x128xf32, #tpu.memory_space<vmem>>, vector<1x1x8x128xf32>
    %1518 = vector.shape_cast %1517 : vector<1x1x8x128xf32> to vector<8x128xf32>
    %1519 = vector.shape_cast %1513 : vector<8x128xf32> to vector<1x1x8x128xf32>
    tpu.vector_store %arg3[%c1_520, %c1_521, %c0_522, %c0_523], %1519 {strides = array<i32>} : memref<2x2x8x128xf32, #tpu.memory_space<vmem>>, vector<1x1x8x128xf32>,
    %c1_524 = arith.constant 1 : index
    %c0_525 = arith.constant 0 : index
    %c0_526 = arith.constant 0 : index
    %c0_527 = arith.constant 0 : index
    %1520 = vector.load %arg4[%c1_524, %c0_525, %c0_526, %c0_527] : memref<2x4x8x128xf32, #tpu.memory_space<vmem>>, vector<1x1x8x128xf32>
    %1521 = vector.shape_cast %1520 : vector<1x1x8x128xf32> to vector<8x128xf32>
    %1522 = vector.shape_cast %1461 : vector<8x128xf32> to vector<1x1x8x128xf32>
    tpu.vector_store %arg4[%c1_524, %c0_525, %c0_526, %c0_527], %1522 {strides = array<i32>} : memref<2x4x8x128xf32, #tpu.memory_space<vmem>>, vector<1x1x8x128xf32>,
    %c1_528 = arith.constant 1 : index
    %c1_529 = arith.constant 1 : index
    %c0_530 = arith.constant 0 : index
    %c0_531 = arith.constant 0 : index
    %1523 = vector.load %arg4[%c1_528, %c1_529, %c0_530, %c0_531] : memref<2x4x8x128xf32, #tpu.memory_space<vmem>>, vector<1x1x8x128xf32>
    %1524 = vector.shape_cast %1523 : vector<1x1x8x128xf32> to vector<8x128xf32>
    %1525 = vector.shape_cast %1463 : vector<8x128xf32> to vector<1x1x8x128xf32>
    tpu.vector_store %arg4[%c1_528, %c1_529, %c0_530, %c0_531], %1525 {strides = array<i32>} : memref<2x4x8x128xf32, #tpu.memory_space<vmem>>, vector<1x1x8x128xf32>,
    %c1_532 = arith.constant 1 : index
    %c2_533 = arith.constant 2 : index
    %c0_534 = arith.constant 0 : index
    %c0_535 = arith.constant 0 : index
    %1526 = vector.load %arg4[%c1_532, %c2_533, %c0_534, %c0_535] : memref<2x4x8x128xf32, #tpu.memory_space<vmem>>, vector<1x1x8x128xf32>
    %1527 = vector.shape_cast %1526 : vector<1x1x8x128xf32> to vector<8x128xf32>
    %1528 = vector.shape_cast %1463 : vector<8x128xf32> to vector<1x1x8x128xf32>
    tpu.vector_store %arg4[%c1_532, %c2_533, %c0_534, %c0_535], %1528 {strides = array<i32>} : memref<2x4x8x128xf32, #tpu.memory_space<vmem>>, vector<1x1x8x128xf32>,
    %c1_536 = arith.constant 1 : index
    %c3_537 = arith.constant 3 : index
    %c0_538 = arith.constant 0 : index
    %c0_539 = arith.constant 0 : index
    %1529 = vector.load %arg4[%c1_536, %c3_537, %c0_538, %c0_539] : memref<2x4x8x128xf32, #tpu.memory_space<vmem>>, vector<1x1x8x128xf32>
    %1530 = vector.shape_cast %1529 : vector<1x1x8x128xf32> to vector<8x128xf32>
    %1531 = vector.shape_cast %1465 : vector<8x128xf32> to vector<1x1x8x128xf32>
    tpu.vector_store %arg4[%c1_536, %c3_537, %c0_538, %c0_539], %1531 {strides = array<i32>} : memref<2x4x8x128xf32, #tpu.memory_space<vmem>>, vector<1x1x8x128xf32>,
    return
  }
  func.func @transform_0(%arg0: i32) -> i32 {
    %c0_i32 = arith.constant 0 : i32
    %c0_i32_0 = arith.constant 0 : i32
    return %c0_i32 : i32
  }
  func.func @transform_1(%arg0: i32) -> i32 {
    %c0_i32 = arith.constant 0 : i32
    %c0_i32_0 = arith.constant 0 : i32
    return %c0_i32 : i32
  }
  func.func @transform_2(%arg0: i32) -> (i32, i32, i32, i32) {
    %c0_i32 = arith.constant 0 : i32
    %c0_i32_0 = arith.constant 0 : i32
    %c0_i32_1 = arith.constant 0 : i32
    %c0_i32_2 = arith.constant 0 : i32
    return %arg0, %c0_i32, %c0_i32_0, %c0_i32_1 : i32, i32, i32, i32
  }
  func.func @transform_3(%arg0: i32) -> (i32, i32, i32, i32) {
    %c0_i32 = arith.constant 0 : i32
    %c0_i32_0 = arith.constant 0 : i32
    %c0_i32_1 = arith.constant 0 : i32
    %c0_i32_2 = arith.constant 0 : i32
    return %arg0, %c0_i32, %c0_i32_0, %c0_i32_1 : i32, i32, i32, i32
  }
  func.func @transform_4(%arg0: i32) -> (i32, i32, i32, i32) {
    %c0_i32 = arith.constant 0 : i32
    %c0_i32_0 = arith.constant 0 : i32
    %c0_i32_1 = arith.constant 0 : i32
    %c0_i32_2 = arith.constant 0 : i32
    return %arg0, %c0_i32, %c0_i32_0, %c0_i32_1 : i32, i32, i32, i32
  }
  func.func @transform_5(%arg0: i32) -> (i32, i32, i32, i32) {
    %c0_i32 = arith.constant 0 : i32
    %c0_i32_0 = arith.constant 0 : i32
    %c0_i32_1 = arith.constant 0 : i32
    %c0_i32_2 = arith.constant 0 : i32
    return %arg0, %c0_i32, %c0_i32_0, %c0_i32_1 : i32, i32, i32, i32
  }
  func.func @transform_6(%arg0: i32) -> (i32, i32, i32, i32) {
    %c0_i32 = arith.constant 0 : i32
    %c0_i32_0 = arith.constant 0 : i32
    %c0_i32_1 = arith.constant 0 : i32
    %c0_i32_2 = arith.constant 0 : i32
    return %arg0, %c0_i32, %c0_i32_0, %c0_i32_1 : i32, i32, i32, i32
  }
}

</mosaic_0001>

<bundles_post_ra>
// kernel: tpu_custom_call.1
= control target key start
LH: loop header
LB: loop body
LE: loop exit
PB: predicated region body
PF: predicated region fallthrough
CT: control target
= control target key end

     0   :  { %s2928_s0 = inlined_call_operand.hbm [shape: f32[32], index: 0, kind: input, shape index: {}]   ;;  %s2929_s1 = inlined_call_operand.hbm [shape: f32[32], index: 1, kind: input, shape index: {}]   ;;  %s2930_s2 = inlined_call_operand.hbm [shape: f32[2,2,8,128], index: 2, kind: output, shape index: {0}]   ;;  %s2931_s3 = inlined_call_operand.hbm [shape: f32[2,4,8,128], index: 3, kind: output, shape index: {1}]   ;;  %s2932_s4 = inlined_call_operand.hbm [shape: f32[2,8,8,128], index: 4, kind: output, shape index: {2}]   ;;  %s2933_s5 = inlined_call_operand.hbm [shape: f32[2,16,8,128], index: 5, kind: output, shape index: {3}]   ;;  %s2934_s6 = inlined_call_operand.hbm [shape: f32[2,16,8,128], index: 6, kind: output, shape index: {4}]  }
   0x1   :  { %3046 = sst [smem:[#allocation52_spill]] %s2930_s2 }
   0x2   :  { %3047 = sst [smem:[#allocation53_spill]] %s2931_s3 }
   0x3   :  { %3048 = sst [smem:[#allocation54_spill]] %s2932_s4 }
   0x4   :  { %3049 = sst [smem:[#allocation55_spill]] %s2933_s5 }
   0x5   :  { %3050 = sst [smem:[#allocation56_spill]] %s2934_s6 }
   0x6   :  { %12 = vsyncpa [#allocation4], 0 }
   0x7   :  { %13 = vsyncpa [#allocation6], 0 }
   0x8   :  { %14 = vsyncpa [#allocation3], 0 }
   0x9   :  { %15 = vsyncpa [#allocation9], 0 }
   0xa   :  { %16 = vsyncpa [#allocation12], 0  ;;  %s22_s23 = sshll.u32 %s2928_s0, 4  ;;  %s31_s26 = sshll.u32 %s2929_s1, 4  ;;  %s23_s23 = int_to_ptr.hbm [resolvable:$true] %s22_s23  ;;  %s32_s26 = int_to_ptr.hbm [resolvable:$true] %s31_s26 }
   0xb   :  { %s1571_s27 = smov [#allocation2]   ;;  %s1572_s28 = smov [#allocation5]  }
   0xc   :  { %25 = dma.hbm_to_smem %s23_s23, 16, %s1571_s27, [#allocation4]  }
   0xd   :  { %34 = dma.hbm_to_smem %s32_s26, 16, %s1572_s28, [#allocation6]  }
   0xe   :  { %1561 = dma.done.wait [#allocation4], 16  }
   0xf   :  { %1562 = vsyncadd [#allocation4], 4294967280 }
  0x10   :  { %1563 = dma.done.wait [#allocation6], 16  }
  0x11   :  { %1564 = vsyncadd [#allocation6], 4294967280 }
  0x12   :  { %43 = sfence }
  0x13   :  { %v44_v0 = vlaneseq  ;;  %s1621_s29 = sld [smem:[#allocation2]] }
  0x14   :  { %s1623_s0 = sld [smem:[#allocation2 + $0x1]] }
  0x15   :  { %v45_v1 = vshrl.u32 %v44_v0, 7  ;;  %v48_v2 = vand.u32 127, %v44_v0  ;;  %s1625_s1 = sld [smem:[#allocation2 + $0x2]] }
  0x16   :  { %s1627_s30 = sld [smem:[#allocation2 + $0x3]] }
  0x17   :  { %v46_v3 = vmul.u32 128, %v45_v1  ;;  %s1629_s7 = sld [smem:[#allocation2 + $0x4]] }
  0x18   :  { %s1631_s8 = sld [smem:[#allocation2 + $0x5]] }
  0x19   :  { %v49_v4 = vadd.s32 %v48_v2, %v46_v3  ;;  %s1633_s9 = sld [smem:[#allocation2 + $0x6]]  ;;  %v60_v7 = vstv %s1621_s29 }
  0x1a   :  { %s1635_s10 = sld [smem:[#allocation2 + $0x7]]  ;;  %v62_v8 = vstv %s1623_s0 }
  0x1b   :  { %v50_v5 = vand.u32 31, %v49_v4  ;;  %v52_v6 = vshra.s32 %v49_v4, 5  ;;  %s1637_s11 = sld [smem:[#allocation2 + $0x8]]  ;;  %v89_v9 = vstv %s1625_s1 }
  0x1c   :  { %v91_v10 = vstv %s1627_s30  ;;  %s1643_s12 = sld [smem:[#allocation2 + $0x9]] }
  0x1d   :  { %v1645_v11 = vcvt.s32.f32 %v50_v5  ;;  %v1647_v12 = vcvt.s32.f32 %v52_v6  ;;  %v118_v13 = vstv %s1629_s7  ;;  %s1650_s13 = sld [smem:[#allocation2 + $0xa]] }
  0x1e   :  { %v120_v14 = vstv %s1631_s8  ;;  %s1653_s14 = sld [smem:[#allocation2 + $0xb]] }
  0x1f   :  { %v1658_v15 = vsub.f32 %v60_v7, %v1645_v11  ;;  %v1663_v16 = vsub.f32 %v62_v8, %v1647_v12  ;;  %v1668_v17 = vsub.f32 %v89_v9, %v1645_v11  ;;  %v1673_v18 = vsub.f32 %v91_v10, %v1647_v12  ;;  %s1675_s15 = sld [smem:[#allocation2 + $0xc]] }
  0x20   :  { %v1680_v19 = vsub.f32 %v118_v13, %v1645_v11  ;;  %v1685_v20 = vsub.f32 %v120_v14, %v1647_v12  ;;  %v147_v21 = vstv %s1633_s9  ;;  %v149_v22 = vstv %s1635_s10  ;;  %s1697_s16 = sld [smem:[#allocation2 + $0xd]] }
  0x21   :  { %v64_v23 = vmul.f32 %v1658_v15, %v1658_v15  ;;  %v65_v24 = vmul.f32 %v1663_v16, %v1663_v16  ;;  %v93_v25 = vmul.f32 %v1668_v17, %v1668_v17  ;;  %v94_v26 = vmul.f32 %v1673_v18, %v1673_v18  ;;  %s1713_s17 = sld [smem:[#allocation2 + $0xe]] }
  0x22   :  { %v122_v27 = vmul.f32 %v1680_v19, %v1680_v19  ;;  %v123_v28 = vmul.f32 %v1685_v20, %v1685_v20  ;;  %v1706_v29 = vsub.f32 %v147_v21, %v1645_v11  ;;  %v1711_v30 = vsub.f32 %v149_v22, %v1647_v12  ;;  %s1717_s18 = sld [smem:[#allocation2 + $0xf]] }
  0x23   :  { %v66_v31 = vadd.f32 %v65_v24, %v64_v23  ;;  %v95_v32 = vadd.f32 %v94_v26, %v93_v25  ;;  %v2958_v33 = vstv %s1637_s11  ;;  %v2957_v34 = vstv %s1643_s12  ;;  %s1728_s19 = sld [smem:[#allocation2 + $0x10]] }
  0x24   :  { %v124_v35 = vadd.f32 %v123_v28, %v122_v27  ;;  %v151_v36 = vmul.f32 %v1706_v29, %v1706_v29  ;;  %v152_v37 = vmul.f32 %v1711_v30, %v1711_v30  ;;  %v1726_v38 = vsub.f32 %v2958_v33, %v1645_v11  ;;  %s1736_s20 = sld [smem:[#allocation2 + $0x11]] }
  0x25   :  { %v67_v39 = vadd.f32 1e-08, %v66_v31  ;;  %v96_v40 = vadd.f32 1e-08, %v95_v32  ;;  %v1733_v41 = vsub.f32 %v2957_v34, %v1647_v12  ;;  %v2956_v42 = vstv %s1650_s13  ;;  %s1749_s21 = sld [smem:[#allocation2 + $0x12]] }
  0x26   :  { %v125_v43 = vadd.f32 1e-08, %v124_v35  ;;  %v153_v44 = vadd.f32 %v152_v37, %v151_v36  ;;  %v180_v45 = vmul.f32 %v1726_v38, %v1726_v38  ;;  %v1743_v46 = vsub.f32 %v2956_v42, %v1645_v11  ;;  %s1817_s22 = sld [smem:[#allocation2 + $0x13]] }
  0x27   :  { %1377 = vrcp.f32 %v67_v39  ;;  %v181_v47 = vmul.f32 %v1733_v41, %v1733_v41  ;;  %v2955_v48 = vstv %s1653_s14  ;;  %v2954_v49 = vstv %s1675_s15  ;;  %s1825_s23 = sld [smem:[#allocation2 + $0x14]] }
  0x28   :  { %1379 = vrcp.f32 %v96_v40  ;;  %v154_v50 = vadd.f32 1e-08, %v153_v44  ;;  %v1754_v51 = vsub.f32 %v2955_v48, %v1647_v12  ;;  %v209_v52 = vmul.f32 %v1743_v46, %v1743_v46  ;;  %s1847_s24 = sld [smem:[#allocation2 + $0x15]] }
  0x29   :  { %1381 = vrcp.f32 %v125_v43  ;;  %v182_v53 = vadd.f32 %v181_v47, %v180_v45  ;;  %v1761_v54 = vsub.f32 %v2954_v49, %v1645_v11  ;;  %v2953_v55 = vstv %s1697_s16  ;;  %s1854_s25 = sld [smem:[#allocation2 + $0x16]] }
  0x2a   :  { %1383 = vrcp.f32 %v154_v50  ;;  %v210_v56 = vmul.f32 %v1754_v51, %v1754_v51  ;;  %v1769_v57 = vsub.f32 %v2953_v55, %v1647_v12  ;;  %v2952_v58 = vstv %s1713_s17  ;;  %s1862_s26 = sld [smem:[#allocation2 + $0x17]] }
  0x2b   :  { %v183_v59 = vadd.f32 1e-08, %v182_v53  ;;  %v238_v60 = vmul.f32 %v1761_v54, %v1761_v54  ;;  %v1777_v61 = vsub.f32 %v2952_v58, %v1645_v11  ;;  %v2951_v62 = vstv %s1717_s18  ;;  %s1866_s27 = sld [smem:[#allocation2 + $0x18]] }
  0x2c   :  { %v211_v63 = vadd.f32 %v210_v56, %v209_v52  ;;  %v239_v0 = vmul.f32 %v1769_v57, %v1769_v57  ;;  %v1785_v1 = vsub.f32 %v2951_v62, %v1647_v12  ;;  %v2949_v2 = vstv %s1728_s19  ;;  %s1878_s28 = sld [smem:[#allocation2 + $0x19]] }
  0x2d   :  { %v1378_v3 = vpop.eup %1377  ;;  %1385 = vrcp.f32 %v183_v59  ;;  %v267_v4 = vmul.f32 %v1777_v61, %v1777_v61  ;;  %v1793_v5 = vsub.f32 %v2949_v2, %v1645_v11  ;;  %v2935_v6 = vstv %s1736_s20  ;;  %s1889_s2 = sld [smem:[#allocation2 + $0x1a]] }
  0x2e   :  { %v1380_v23 = vpop.eup %1379  ;;  %v69_v24 = vmul.f32 %v1378_v3, %v67_v39  ;;  %v212_v25 = vadd.f32 1e-08, %v211_v63  ;;  %v240_v26 = vadd.f32 %v239_v0, %v238_v60  ;;  %v268_v27 = vmul.f32 %v1785_v1, %v1785_v1  ;;  %s1894_s6 = sld [smem:[#allocation2 + $0x1b]] }
  0x2f   :  { %v1382_v28 = vpop.eup %1381  ;;  %v98_v31 = vmul.f32 %v1380_v23, %v96_v40  ;;  %v1801_v32 = vsub.f32 %v2935_v6, %v1647_v12  ;;  %v628_v35 = vmul.f32 %v1793_v5, %v1793_v5  ;;  %v2947_v36 = vstv %s1749_s21  ;;  %s1899_s4 = sld [smem:[#allocation2 + $0x1c]] }
  0x30   :  { %v1384_v37 = vpop.eup %1383  ;;  %v70_v44 = vsub.f32 2.0, %v69_v24  ;;  %v127_v45 = vmul.f32 %v1382_v28, %v125_v43  ;;  %1387 = vrcp.f32 %v212_v25  ;;  %v241_v39 = vadd.f32 1e-08, %v240_v26  ;;  %3057 = sst [smem:[#allocation25_spill]] %s1862_s26 }
  0x31   :  { %v99_v47 = vsub.f32 2.0, %v98_v31  ;;  %v156_v52 = vmul.f32 %v1384_v37, %v154_v50  ;;  %v269_v53 = vadd.f32 %v268_v27, %v267_v4  ;;  %v629_v40 = vmul.f32 %v1801_v32, %v1801_v32  ;;  %s1913_s3 = sld [smem:[#allocation2 + $0x1d]] }
  0x32   :  { %v1808_v56 = vmul.f32 %v1378_v3, %v70_v44  ;;  %v128_v60 = vsub.f32 2.0, %v127_v45  ;;  %1389 = vrcp.f32 %v241_v39  ;;  %v1813_v63 = vsub.f32 %v2947_v36, %v1645_v11  ;;  %s1929_s5 = sld [smem:[#allocation2 + $0x1e]] }
  0x33   :  { %v1386_v0 = vpop.eup %1385  ;;  %v1815_v6 = vmul.f32 %v1380_v23, %v99_v47  ;;  %v157_v43 = vsub.f32 2.0, %v156_v52  ;;  %v270_v24 = vadd.f32 1e-08, %v269_v53  ;;  %v630_v26 = vadd.f32 %v629_v40, %v628_v35  ;;  %s2252_s29 = sld [smem:[#allocation5]] }
  0x34   :  { %3051 = vst [vmem:[#allocation19_spill] sm:$0xff] %v1808_v56  ;;  %v73_v50 = vmul.f32 %v1808_v56, %v1658_v15  ;;  %v75_v3 = vmul.f32 %v1808_v56, %v1663_v16  ;;  %v1823_v4 = vmul.f32 %v1382_v28, %v128_v60  ;;  %v185_v27 = vmul.f32 %v1386_v0, %v183_v59  ;;  %s2254_s0 = sld [smem:[#allocation5 + $0x2]] }
  0x35   :  { %3052 = vst [vmem:[#allocation20_spill] sm:$0xff] %v1815_v6  ;;  %v101_v23 = vadd.f32 %v1815_v6, %v1808_v56  ;;  %v102_v31 = vmul.f32 %v1815_v6, %v1668_v17  ;;  %v104_v35 = vmul.f32 %v1815_v6, %v1673_v18  ;;  %v1833_v44 = vmul.f32 %v1384_v37, %v157_v43  ;;  %s2258_s1 = sld [smem:[#allocation5 + $0x4]] }
  0x36   :  { %3053 = vst [vmem:[#allocation21_spill] sm:$0xff] %v1823_v4  ;;  %v1388_v15 = vpop.eup %1387  ;;  %v131_v16 = vmul.f32 %v1823_v4, %v1680_v19  ;;  %v133_v59 = vmul.f32 %v1823_v4, %v1685_v20  ;;  %v186_v28 = vsub.f32 2.0, %v185_v27  ;;  %1391 = vrcp.f32 %v270_v24  ;;  %s2262_s30 = sld [smem:[#allocation5 + $0x6]] }
  0x37   :  { %3054 = vst [vmem:[#allocation22_spill] sm:$0xff] %v1833_v44  ;;  %v103_v45 = vadd.f32 %v102_v31, %v73_v50  ;;  %v105_v47 = vadd.f32 %v104_v35, %v75_v3  ;;  %v130_v52 = vadd.f32 %v1823_v4, %v101_v23  ;;  %v160_v17 = vmul.f32 %v1833_v44, %v1706_v29  ;;  %s2265_s7 = sld [smem:[#allocation5 + $0x8]] }
  0x38   :  { %v1390_v53 = vpop.eup %1389  ;;  %v162_v18 = vmul.f32 %v1833_v44, %v1711_v30  ;;  %v1844_v37 = vmul.f32 %v1386_v0, %v186_v28  ;;  %v214_v40 = vmul.f32 %v1388_v15, %v212_v25  ;;  %v631_v19 = vadd.f32 1e-08, %v630_v26  ;;  %s2271_s8 = sld [smem:[#allocation5 + $0xa]] }
  0x39   :  { %v132_v60 = vadd.f32 %v131_v16, %v103_v45  ;;  %v134_v20 = vadd.f32 %v133_v59, %v105_v47  ;;  %v159_v43 = vadd.f32 %v1833_v44, %v130_v52  ;;  %v243_v50 = vmul.f32 %v1390_v53, %v241_v39  ;;  %3088 = sst [smem:[#allocation46_spill]] %s2252_s29 }
  0x3a   :  { %3055 = vst [vmem:[#allocation23_spill] sm:$0xff] %v1844_v37  ;;  %v189_v29 = vmul.f32 %v1844_v37, %v1726_v38  ;;  %v191_v3 = vmul.f32 %v1844_v37, %v1733_v41  ;;  %v215_v30 = vsub.f32 2.0, %v214_v40  ;;  %1393 = vrcp.f32 %v631_v19  ;;  %3089 = sst [smem:[#allocation47_spill]] %s2254_s0 }
  0x3b   :  { %v161_v0 = vadd.f32 %v160_v17, %v132_v60  ;;  %v163_v25 = vadd.f32 %v162_v18, %v134_v20  ;;  %v188_v26 = vadd.f32 %v1844_v37, %v159_v43  ;;  %v244_v27 = vsub.f32 2.0, %v243_v50  ;;  %s2273_s9 = sld [smem:[#allocation5 + $0x1]] }
  0x3c   :  { %v1392_v23 = vpop.eup %1391  ;;  %v1856_v39 = vmul.f32 %v1388_v15, %v215_v30  ;;  %v2946_v31 = vstv %s1817_s22  ;;  %v657_v38 = vmul.f32 %v1813_v63, %v1813_v63  ;;  %v2945_v35 = vstv %s1825_s23  ;;  %s2277_s10 = sld [smem:[#allocation5 + $0x3]] }
  0x3d   :  { %v190_v41 = vadd.f32 %v189_v29, %v161_v0  ;;  %v192_v16 = vadd.f32 %v191_v3, %v163_v25  ;;  %v1864_v59 = vmul.f32 %v1390_v53, %v244_v27  ;;  %v272_v28 = vmul.f32 %v1392_v23, %v270_v24 }
  0x3e   :  { %3056 = vst [vmem:[#allocation24_spill] sm:$0xff] %v1856_v39  ;;  %v217_v45 = vadd.f32 %v1856_v39, %v188_v26  ;;  %v218_v15 = vmul.f32 %v1856_v39, %v1743_v46  ;;  %v220_v47 = vmul.f32 %v1856_v39, %v1754_v51  ;;  %v1876_v52 = vsub.f32 %v2946_v31, %v1647_v12 }
  0x3f   :  { %3058 = vst [vmem:[#allocation26_spill] sm:$0xff] %v1864_v59  ;;  %v247_v24 = vmul.f32 %v1864_v59, %v1761_v54  ;;  %v249_v17 = vmul.f32 %v1864_v59, %v1769_v57  ;;  %v273_v53 = vsub.f32 2.0, %v272_v28  ;;  %v1887_v46 = vsub.f32 %v2945_v35, %v1645_v11 }
  0x40   :  { %v1394_v51 = vpop.eup %1393  ;;  %v219_v18 = vadd.f32 %v218_v15, %v190_v41  ;;  %v221_v40 = vadd.f32 %v220_v47, %v192_v16  ;;  %v246_v60 = vadd.f32 %v1864_v59, %v217_v45  ;;  %v658_v20 = vmul.f32 %v1876_v52, %v1876_v52 }
  0x41   :  { %v1896_v54 = vmul.f32 %v1392_v23, %v273_v53  ;;  %v633_v57 = vmul.f32 %v1394_v51, %v631_v19  ;;  %v2942_v43 = vstv %s1847_s24  ;;  %v686_v30 = vmul.f32 %v1887_v46, %v1887_v46  ;;  %3093 = sst [smem:[#allocation48_spill]] %s2273_s9 }
  0x42   :  { %v248_v50 = vadd.f32 %v247_v24, %v219_v18  ;;  %v659_v29 = vadd.f32 %v658_v20, %v657_v38  ;;  %v1904_v3 = vsub.f32 %v2942_v43, %v1647_v12  ;;  %v250_v0 = vadd.f32 %v249_v17, %v221_v40  ;;  %3095 = sst [smem:[#allocation49_spill]] %s2277_s10 }
  0x43   :  { %3059 = vst [vmem:[#allocation27_spill] sm:$0xff] %v1896_v54  ;;  %v275_v25 = vadd.f32 %v1896_v54, %v246_v60  ;;  %v276_v19 = vmul.f32 %v1896_v54, %v1777_v61  ;;  %v278_v26 = vmul.f32 %v1896_v54, %v1785_v1  ;;  %v2941_v38 = vstv %s1854_s25 }
  0x44   :  { %v660_v27 = vadd.f32 1e-08, %v659_v29  ;;  %v687_v23 = vmul.f32 %v1904_v3, %v1904_v3  ;;  %v2940_v41 = vstv %s1862_s26  ;;  %v634_v16 = vsub.f32 2.0, %v633_v57  ;;  %s1950_s26 = sld [smem:[#allocation2 + $0x1f]] }
  0x45   :  { %1395 = vrcp.f32 %v275_v25  ;;  %v1922_v1 = vsub.f32 %v2941_v38, %v1645_v11  ;;  %v1927_v28 = vsub.f32 %v2940_v41, %v1647_v12  ;;  %v277_v45 = vadd.f32 %v276_v19, %v248_v50 }
  0x46   :  { %1397 = vrcp.f32 %v660_v27  ;;  %v688_v61 = vadd.f32 %v687_v23, %v686_v30  ;;  %v279_v15 = vadd.f32 %v278_v26, %v250_v0  ;;  %v2938_v47 = vstv %s1866_s27 }
  0x47   :  { %v2937_v24 = vstv %s1878_s28  ;;  %v715_v53 = vmul.f32 %v1922_v1, %v1922_v1  ;;  %v716_v18 = vmul.f32 %v1927_v28, %v1927_v28  ;;  %v1940_v40 = vsub.f32 %v2938_v47, %v1645_v11 }
  0x48   :  { %v689_v17 = vadd.f32 1e-08, %v688_v61  ;;  %v1945_v60 = vsub.f32 %v2937_v24, %v1647_v12  ;;  %v2939_v20 = vstv %s1889_s2  ;;  %v2943_v57 = vstv %s1894_s6 }
  0x49   :  { %v2944_v50 = vstv %s1899_s4  ;;  %v717_v29 = vadd.f32 %v716_v18, %v715_v53  ;;  %v744_v30 = vmul.f32 %v1940_v40, %v1940_v40  ;;  %v1957_v0 = vsub.f32 %v2939_v20, %v1645_v11 }
  0x4a   :  { %3060 = vst [vmem:[#allocation28_spill] sm:$0xff] %v1945_v60  ;;  %1399 = vrcp.f32 %v689_v17  ;;  %v745_v26 = vmul.f32 %v1945_v60, %v1945_v60  ;;  %v1964_v23 = vsub.f32 %v2943_v57, %v1647_v12  ;;  %v1969_v61 = vsub.f32 %v2944_v50, %v1645_v11 }
  0x4b   :  { %3061 = vst [vmem:[#allocation29_spill] sm:$0xff] %v1957_v0  ;;  %v1396_v19 = vpop.eup %1395  ;;  %v2948_v53 = vstv %s1913_s3  ;;  %v1972_v47 = vadd.f32 1e-08, %v717_v29  ;;  %v773_v20 = vmul.f32 %v1957_v0, %v1957_v0  ;;  %v1985_v29 = vmul.f32 %v1394_v51, %v634_v16 }
  0x4c   :  { %3062 = vst [vmem:[#allocation30_spill] sm:$0xff] %v1964_v23  ;;  %v1398_v18 = vpop.eup %1397  ;;  %v287_v24 = vmul.f32 %v1396_v19, %v275_v25  ;;  %v1979_v41 = vsub.f32 %v2948_v53, %v1647_v12  ;;  %v746_v43 = vadd.f32 %v745_v26, %v744_v30  ;;  %v774_v57 = vmul.f32 %v1964_v23, %v1964_v23 }
  0x4d   :  { %3063 = vst [vmem:[#allocation31_spill] sm:$0xff] %v1969_v61  ;;  %v662_v38 = vmul.f32 %v1398_v18, %v660_v27  ;;  %v802_v50 = vmul.f32 %v1969_v61, %v1969_v61  ;;  %v2950_v31 = vstv %s1929_s5  ;;  %v1998_v2 = vmul.f32 %v1985_v29, %v1793_v5 }
  0x4e   :  { %3064 = vst [vmem:[#allocation32_spill] sm:$0xff] %v1979_v41  ;;  %v288_v25 = vsub.f32 2.0, %v287_v24  ;;  %v803_v35 = vmul.f32 %v1979_v41, %v1979_v41  ;;  %v1990_v53 = vadd.f32 1e-08, %v746_v43  ;;  %v775_v27 = vadd.f32 %v774_v57, %v773_v20 }
  0x4f   :  { %3065 = vst [vmem:[#allocation33_spill] sm:$0xff] %v1985_v29  ;;  %v663_v36 = vsub.f32 2.0, %v662_v38  ;;  %v2002_v51 = vmul.f32 %v1985_v29, %v1801_v32  ;;  %1401 = vrcp.f32 %v1972_v47  ;;  %v2012_v43 = vsub.f32 %v2950_v31, %v1645_v11 }
  0x50   :  { %v1992_v30 = vpop.eup %1399  ;;  %v1994_v26 = vmul.f32 %v1396_v19, %v288_v25  ;;  %v2007_v38 = vadd.f32 %v803_v35, %v802_v50  ;;  %1403 = vrcp.f32 %v1990_v53 }
  0x51   :  { %v2005_v16 = vmul.f32 %v1398_v18, %v663_v36  ;;  %v2020_v32 = vmul.f32 %v1992_v30, %v689_v17 }
  0x52   :  { %3066 = vst [vmem:[#allocation34_spill] sm:$0xff] %v1994_v26  ;;  %v290_v20 = vmul.f32 %v1994_v26, %v277_v45  ;;  %v345_v5 = vmul.f32 %v1994_v26, %v1808_v56  ;;  %v292_v57 = vmul.f32 %v1994_v26, %v279_v15  ;;  %v372_v36 = vmul.f32 %v1994_v26, %v1815_v6 }
  0x53   :  { %3067 = vst [vmem:[#allocation35_spill] sm:$0xff] %v2005_v16  ;;  %v401_v35 = vmul.f32 %v1994_v26, %v1823_v4  ;;  %v2027_v45 = vadd.f32 1e-08, %v775_v27  ;;  %v430_v17 = vmul.f32 %v1994_v26, %v1833_v44  ;;  %v459_v19 = vmul.f32 %v1994_v26, %v1844_v37 }
  0x54   :  { %v2030_v50 = vadd.f32 %v290_v20, %v1645_v11  ;;  %346 = vst [vmem:[#allocation10] sm:$0xff] %v345_v5  ;;  %v2033_v15 = vadd.f32 %v292_v57, %v1647_v12  ;;  %v488_v18 = vmul.f32 %v1994_v26, %v1856_v39  ;;  %v2043_v25 = vmul.f32 %v1994_v26, %v1864_v59 }
  0x55   :  { %374 = vst [vmem:[#allocation10 + $0x8] sm:$0xff] %v372_v36  ;;  %v2047_v27 = vmul.f32 %v1994_v26, %v1896_v54  ;;  %v2051_v20 = vadd.f32 %v2005_v16, %v1985_v29  ;;  %v2053_v57 = vpop.eup %1401  ;;  %v3074_v39 = vstv %s1643_s12  ;;  %v3076_v37 = vstv %s1653_s14  ;;  %s2286_s12 = sld [smem:[#allocation5 + $0x5]] }
  0x56   :  { %v348_v31 = vsub.f32 %v60_v7, %v2030_v50  ;;  %v350_v24 = vsub.f32 %v62_v8, %v2033_v15  ;;  %v376_v62 = vsub.f32 %v89_v9, %v2030_v50  ;;  %v378_v58 = vsub.f32 %v91_v10, %v2033_v15  ;;  %403 = vst [vmem:[#allocation10 + $0x10] sm:$0xff] %v401_v35  ;;  %s2292_s14 = sld [smem:[#allocation5 + $0x9]] }
  0x57   :  { %v405_v55 = vsub.f32 %v118_v13, %v2030_v50  ;;  %v2073_v49 = vsub.f32 %v120_v14, %v2033_v15  ;;  %v434_v7 = vsub.f32 %v147_v21, %v2030_v50  ;;  %432 = vst [vmem:[#allocation10 + $0x18] sm:$0xff] %v430_v17  ;;  %v2081_v8 = vsub.f32 %v149_v22, %v2033_v15  ;;  %v2091_v13 = vpop.eup %1403 }
  0x58   :  { %v2083_v9 = vmul.f32 %v348_v31, %v345_v5  ;;  %v2085_v48 = vmul.f32 %v350_v24, %v345_v5  ;;  %v2087_v10 = vmul.f32 %v376_v62, %v372_v36  ;;  %v2089_v42 = vmul.f32 %v378_v58, %v372_v36  ;;  %461 = vst [vmem:[#allocation10 + $0x20] sm:$0xff] %v459_v19 }
  0x59   :  { %v2093_v14 = vmul.f32 %v405_v55, %v401_v35  ;;  %v2096_v21 = vmul.f32 %v2073_v49, %v401_v35  ;;  %v2098_v34 = vmul.f32 %v434_v7, %v430_v17  ;;  %v2101_v22 = vmul.f32 %v2081_v8, %v430_v17  ;;  %490 = vst [vmem:[#allocation10 + $0x28] sm:$0xff] %v488_v18 }
  0x5a   :  { %3068 = vst [vmem:[#allocation36_spill] sm:$0xff] %v2083_v9  ;;  %v356_v5 = vmul.f32 %v2083_v9, %v348_v31  ;;  %v358_v36 = vmul.f32 %v2085_v48, %v348_v31  ;;  %v360_v35 = vmul.f32 %v2085_v48, %v350_v24  ;;  %v385_v33 = vmul.f32 %v2087_v10, %v376_v62 }
  0x5b   :  { %3069 = vst [vmem:[#allocation37_spill] sm:$0xff] %v2085_v48  ;;  %v387_v17 = vmul.f32 %v2089_v42, %v376_v62  ;;  %v389_v26 = vmul.f32 %v2089_v42, %v378_v58  ;;  %v414_v54 = vmul.f32 %v2093_v14, %v405_v55  ;;  %v445_v31 = vmul.f32 %v2101_v22, %v434_v7  ;;  %3098 = sst [smem:[#allocation50_spill]] %s2286_s12 }
  0x5c   :  { %3070 = vst [vmem:[#allocation38_spill] sm:$0xff] %v2087_v10  ;;  %v3073_v24 = vstv %s1637_s11  ;;  %v465_v29 = vsub.f32 %v3074_v39, %v2033_v15  ;;  %v494_v44 = vsub.f32 %v3076_v37, %v2033_v15  ;;  %v3078_v4 = vstv %s1697_s16  ;;  %s2280_s11 = sld [smem:[#allocation5 + $0xc]] }
  0x5d   :  { %3071 = vst [vmem:[#allocation39_spill] sm:$0xff] %v2089_v42  ;;  %v463_v59 = vsub.f32 %v3073_v24, %v2030_v50  ;;  %v388_v58 = vadd.f32 %v387_v17, %v358_v36  ;;  %v523_v6 = vsub.f32 %v3078_v4, %v2033_v15  ;;  %v3079_v36 = vstv %s1713_s17  ;;  %s2300_s16 = sld [smem:[#allocation5 + $0xb]] }
  0x5e   :  { %3072 = vst [vmem:[#allocation40_spill] sm:$0xff] %v2093_v14  ;;  %v2137_v39 = vmul.f32 %v465_v29, %v459_v19  ;;  %v550_v17 = vsub.f32 %v3079_v36, %v2030_v50  ;;  %v3080_v36 = vstv %s1717_s18  ;;  %v386_v41 = vadd.f32 %v385_v33, %v356_v5  ;;  %s2307_s17 = sld [smem:[#allocation5 + $0xd]] }
  0x5f   :  { %353 = vst [vmem:[#allocation11] sm:$0xff] %v2083_v9  ;;  %v416_v9 = vmul.f32 %v2096_v21, %v405_v55  ;;  %v3077_v55 = vstv %s1675_s15  ;;  %v2135_v24 = vmul.f32 %v463_v59, %v459_v19  ;;  %v2151_v4 = vmul.f32 %v523_v6, %v2043_v25  ;;  %s2295_s15 = sld [smem:[#allocation5 + $0x10]] }
  0x60   :  { %355 = vst [vmem:[#allocation11 + $0x8] sm:$0xff] %v2085_v48  ;;  %v3075_v48 = vstv %s1650_s13  ;;  %v474_v19 = vmul.f32 %v2137_v39, %v463_v59  ;;  %v552_v56 = vsub.f32 %v3080_v36, %v2033_v15  ;;  %v666_v61 = vmul.f32 %v2005_v16, %v1813_v63  ;;  %s2290_s13 = sld [smem:[#allocation5 + $0x7]] }
  0x61   :  { %382 = vst [vmem:[#allocation11 + $0x10] sm:$0xff] %v2087_v10  ;;  %v492_v62 = vsub.f32 %v3075_v48, %v2030_v50  ;;  %v521_v10 = vsub.f32 %v3077_v55, %v2030_v50  ;;  %v417_v37 = vadd.f32 %v416_v9, %v388_v58  ;;  %v443_v58 = vmul.f32 %v2098_v34, %v434_v7  ;;  %s2319_s18 = sld [smem:[#allocation5 + $0x12]] }
  0x62   :  { %384 = vst [vmem:[#allocation11 + $0x18] sm:$0xff] %v2089_v42  ;;  %v2145_v42 = vmul.f32 %v494_v44, %v488_v18  ;;  %v2168_v23 = vmul.f32 %v552_v56, %v2047_v27  ;;  %v415_v0 = vadd.f32 %v414_v54, %v386_v41  ;;  %v472_v60 = vmul.f32 %v2135_v24, %v463_v59 }
  0x63   :  { %411 = vst [vmem:[#allocation11 + $0x20] sm:$0xff] %v2093_v14  ;;  %v2139_v48 = vmul.f32 %v492_v62, %v488_v18  ;;  %v2148_v55 = vmul.f32 %v521_v10, %v2043_v25  ;;  %v2156_v14 = vmul.f32 %v550_v17, %v2047_v27  ;;  %v446_v18 = vadd.f32 %v445_v31, %v417_v37 }
  0x64   :  { %413 = vst [vmem:[#allocation11 + $0x28] sm:$0xff] %v2096_v21  ;;  %v503_v9 = vmul.f32 %v2145_v42, %v492_v62  ;;  %v668_v33 = vmul.f32 %v2005_v16, %v1876_v52  ;;  %v532_v31 = vmul.f32 %v2151_v4, %v521_v10  ;;  %v692_v63 = vsub.f32 2.0, %v2020_v32 }
  0x65   :  { %440 = vst [vmem:[#allocation11 + $0x30] sm:$0xff] %v2098_v34  ;;  %v475_v5 = vadd.f32 %v474_v19, %v446_v18  ;;  %v501_v7 = vmul.f32 %v2139_v48, %v492_v62  ;;  %v444_v37 = vadd.f32 %v443_v58, %v415_v0  ;;  %v530_v36 = vmul.f32 %v2148_v55, %v521_v10 }
  0x66   :  { %442 = vst [vmem:[#allocation11 + $0x38] sm:$0xff] %v2101_v22  ;;  %v559_v54 = vmul.f32 %v2156_v14, %v550_v17  ;;  %v390_v59 = vadd.f32 %v389_v26, %v360_v35  ;;  %v561_v41 = vmul.f32 %v2168_v23, %v550_v17  ;;  %v418_v19 = vmul.f32 %v2096_v21, %v2073_v49 }
  0x67   :  { %469 = vst [vmem:[#allocation11 + $0x40] sm:$0xff] %v2135_v24  ;;  %v504_v52 = vadd.f32 %v503_v9, %v475_v5  ;;  %v447_v62 = vmul.f32 %v2101_v22, %v2081_v8  ;;  %v473_v32 = vadd.f32 %v472_v60, %v444_v37  ;;  %v580_v0 = vsub.f32 %v1645_v11, %v2030_v50 }
  0x68   :  { %471 = vst [vmem:[#allocation11 + $0x48] sm:$0xff] %v2137_v39  ;;  %v581_v26 = vsub.f32 %v1647_v12, %v2033_v15  ;;  %v476_v10 = vmul.f32 %v2137_v39, %v465_v29  ;;  %v419_v17 = vadd.f32 %v418_v19, %v390_v59  ;;  %v505_v49 = vmul.f32 %v2145_v42, %v494_v44 }
  0x69   :  { %498 = vst [vmem:[#allocation11 + $0x50] sm:$0xff] %v2139_v48  ;;  %v533_v35 = vadd.f32 %v532_v31, %v504_v52  ;;  %v534_v18 = vmul.f32 %v2151_v4, %v523_v6  ;;  %v502_v8 = vadd.f32 %v501_v7, %v473_v32  ;;  %v2197_v60 = vmul.f32 %v1992_v30, %v692_v63 }
  0x6a   :  { %500 = vst [vmem:[#allocation11 + $0x58] sm:$0xff] %v2145_v42  ;;  %v720_v50 = vmul.f32 %v2053_v57, %v1972_v47  ;;  %v749_v29 = vmul.f32 %v2091_v13, %v1990_v53  ;;  %1405 = vrcp.f32 %v2027_v45  ;;  %v805_v6 = vadd.f32 1e-08, %v2007_v38 }
  0x6b   :  { %527 = vst [vmem:[#allocation11 + $0x60] sm:$0xff] %v2148_v55  ;;  %v562_v15 = vadd.f32 %v561_v41, %v533_v35  ;;  %v531_v44 = vadd.f32 %v530_v36, %v502_v8  ;;  %v667_v30 = vadd.f32 %v666_v61, %v1998_v2  ;;  %v669_v9 = vadd.f32 %v668_v33, %v2002_v51 }
  0x6c   :  { %519 = vst [vmem:[#allocation10 + $0x30] sm:$0xff] %v2043_v25  ;;  %v448_v25 = vadd.f32 %v447_v62, %v419_v17  ;;  %v695_v47 = vmul.f32 %v2197_v60, %v1887_v46  ;;  %v697_v38 = vmul.f32 %v2197_v60, %v1904_v3  ;;  %v563_v2 = vmul.f32 %v2168_v23, %v552_v56 }
  0x6d   :  { %529 = vst [vmem:[#allocation11 + $0x68] sm:$0xff] %v2151_v4  ;;  %v2212_v53 = vmul.f32 %v580_v0, %v562_v15  ;;  %v2214_v5 = vmul.f32 %v581_v26, %v562_v15  ;;  %v721_v61 = vsub.f32 2.0, %v720_v50  ;;  %v750_v33 = vsub.f32 2.0, %v749_v29 }
  0x6e   :  { %3081 = vst [vmem:[#allocation41_spill] sm:$0xff] %v2197_v60  ;;  %v477_v58 = vadd.f32 %v476_v10, %v448_v25  ;;  %1407 = vrcp.f32 %v805_v6  ;;  %v3083_v46 = vstv %s1950_s26  ;;  %v694_v63 = vadd.f32 %v2197_v60, %v2051_v20 }
  0x6f   :  { %556 = vst [vmem:[#allocation11 + $0x70] sm:$0xff] %v2156_v14  ;;  %v2222_v31 = vsub.f32 %v3083_v46, %v1647_v12  ;;  %v2229_v3 = vmul.f32 %v2053_v57, %v721_v61  ;;  %v831_v56 = vmul.f32 %v2012_v43, %v2012_v43  ;;  %v698_v59 = vadd.f32 %v697_v38, %v669_v9  ;;  %v3092_v38 = vld [vmem:[#allocation30_spill] sm:$0xff] }
  0x70   :  { %548 = vst [vmem:[#allocation10 + $0x38] sm:$0xff] %v2047_v27  ;;  %v560_v27 = vadd.f32 %v559_v54, %v531_v44  ;;  %v506_v51 = vadd.f32 %v505_v49, %v477_v58  ;;  %v1406_v37 = vpop.eup %1405  ;;  %v696_v54 = vadd.f32 %v695_v47, %v667_v30  ;;  %v2242_v57 = vmul.f32 %v2091_v13, %v750_v33  ;;  %v3091_v47 = vld [vmem:[#allocation29_spill] sm:$0xff] }
  0x71   :  { %558 = vst [vmem:[#allocation11 + $0x78] sm:$0xff] %v2168_v23  ;;  %v832_v52 = vmul.f32 %v2222_v31, %v2222_v31  ;;  %v724_v19 = vmul.f32 %v2229_v3, %v1922_v1  ;;  %v726_v20 = vmul.f32 %v2229_v3, %v1927_v28  ;;  %v574_v32 = vmul.f32 %v562_v15, %v562_v15  ;;  %v3087_v1 = vld [vmem:[#allocation28_spill] sm:$0xff] }
  0x72   :  { %3082 = vst [vmem:[#allocation42_spill] sm:$0xff] %v2212_v53  ;;  %v2224_v7 = vmul.f32 %v581_v26, %v560_v27  ;;  %v535_v36 = vadd.f32 %v534_v18, %v506_v51  ;;  %v778_v26 = vmul.f32 %v1406_v37, %v2027_v45  ;;  %v723_v10 = vadd.f32 %v2229_v3, %v694_v63  ;;  %v3096_v63 = vld [vmem:[#allocation31_spill] sm:$0xff] }
  0x73   :  { %611 = vst [vmem:[#allocation8 + $0x8] sm:$0xff] %v562_v15  ;;  %v753_v35 = vmul.f32 %v2242_v57, %v1940_v40  ;;  %v833_v17 = vadd.f32 %v832_v52, %v831_v56  ;;  %v755_v28 = vmul.f32 %v2242_v57, %v3087_v1  ;;  %v725_v50 = vadd.f32 %v724_v19, %v696_v54  ;;  %v3101_v1 = vld [vmem:[#allocation20_spill] sm:$0xff] }
  0x74   :  { %613 = vst [vmem:[#allocation8 + $0x10] sm:$0xff] %v562_v15  ;;  %v564_v62 = vadd.f32 %v563_v2, %v535_v36  ;;  %v1408_v49 = vpop.eup %1407  ;;  %v779_v13 = vsub.f32 2.0, %v778_v26  ;;  %v727_v29 = vadd.f32 %v726_v20, %v698_v59  ;;  %v752_v30 = vadd.f32 %v2242_v57, %v723_v10 }
  0x75   :  { %3084 = vst [vmem:[#allocation43_spill] sm:$0xff] %v2224_v7  ;;  %v807_v45 = vmul.f32 %v1408_v49, %v805_v6  ;;  %v834_v15 = vadd.f32 1e-08, %v833_v17  ;;  %v754_v6 = vadd.f32 %v753_v35, %v725_v50  ;;  %v3020_v10 = vstv %s2252_s29  ;;  %s2339_s29 = sld [smem:[#allocation5 + $0xf]] }
  0x76   :  { %609 = vst [vmem:[#allocation8] sm:$0xff] %v560_v27  ;;  %v573_v18 = vmul.f32 %v564_v62, %v560_v27  ;;  %v2248_v8 = vmul.f32 %v580_v0, %v564_v62  ;;  %v2260_v0 = vmul.f32 %v1406_v37, %v779_v13  ;;  %v756_v9 = vadd.f32 %v755_v28, %v727_v29  ;;  %v3097_v37 = vld [vmem:[#allocation32_spill] sm:$0xff] }
  0x77   :  { %3085 = vst [vmem:[#allocation44_spill] sm:$0xff] %v2229_v3  ;;  %v808_v44 = vsub.f32 2.0, %v807_v45  ;;  %1409 = vrcp.f32 %v834_v15  ;;  %v3019_v35 = vstv %s2254_s0  ;;  %v3016_v17 = vstv %s2273_s9  ;;  %s2327_s0 = sld [smem:[#allocation5 + $0x14]] }
  0x78   :  { %3086 = vst [vmem:[#allocation45_spill] sm:$0xff] %v2242_v57  ;;  %v575_v25 = vsub.f32 %v573_v18, %v574_v32  ;;  %v782_v58 = vmul.f32 %v2260_v0, %v3091_v47  ;;  %v784_v27 = vmul.f32 %v2260_v0, %v3092_v38  ;;  %v781_v61 = vadd.f32 %v2260_v0, %v752_v30  ;;  %v3102_v30 = vld [vmem:[#allocation21_spill] sm:$0xff]  ;;  %s2332_s9 = sld [smem:[#allocation5 + $0xe]] }
  0x79   :  { %615 = vst [vmem:[#allocation8 + $0x18] sm:$0xff] %v564_v62  ;;  %v2275_v2 = vmul.f32 %v1408_v49, %v808_v44  ;;  %v3100_v49 = vld [vmem:[#allocation19_spill] sm:$0xff]  ;;  %v107_v28 = vmul.f32 %v3019_v35, %v3101_v1  ;;  %v3015_v50 = vstv %s2277_s10  ;;  %s2351_s10 = sld [smem:[#allocation5 + $0x16]] }
  0x7a   :  { %3090 = vst [vmem:[#allocation28_spill] sm:$0xff] %v2260_v0  ;;  %1411 = vrcp.f32 %v575_v25  ;;  %v783_v33 = vadd.f32 %v782_v58, %v754_v6  ;;  %v785_v46 = vadd.f32 %v784_v27, %v756_v9  ;;  %v78_v18 = vmul.f32 %v3020_v10, %v3100_v49  ;;  %v3103_v27 = vld [vmem:[#allocation22_spill] sm:$0xff] }
  0x7b   :  { %3094 = vst [vmem:[#allocation29_spill] sm:$0xff] %v2275_v2  ;;  %v811_v56 = vmul.f32 %v2275_v2, %v3096_v63  ;;  %v813_v36 = vmul.f32 %v2275_v2, %v3097_v37  ;;  %v810_v52 = vadd.f32 %v2275_v2, %v781_v61  ;;  %v81_v13 = vmul.f32 %v3016_v17, %v3100_v49 }
  0x7c   :  { %v108_v44 = vadd.f32 %v107_v28, %v78_v18  ;;  %v3014_v9 = vstv %s2286_s12  ;;  %v3017_v58 = vstv %s2262_s30  ;;  %v3013_v63 = vstv %s2290_s13  ;;  %s2367_s12 = sld [smem:[#allocation5 + $0x18]] }
  0x7d   :  { %v1410_v51 = vpop.eup %1409  ;;  %v812_v62 = vadd.f32 %v811_v56, %v783_v33  ;;  %v814_v32 = vadd.f32 %v813_v36, %v785_v46  ;;  %v165_v61 = vmul.f32 %v3017_v58, %v3103_v27  ;;  %v139_v33 = vmul.f32 %v3014_v9, %v3102_v30 }
  0x7e   :  { %v836_v59 = vmul.f32 %v1410_v51, %v834_v15  ;;  %v3011_v46 = vstv %s2265_s7  ;;  %v3010_v56 = vstv %s2292_s14  ;;  %v2999_v37 = vstv %s2295_s15 }
  0x7f   :  { %3104 = sst [smem:[#allocation51_spill]] %s2351_s10  ;;  %v3000_v18 = vstv %s2300_s16 }
  0x80   :  { %v2288_v54 = vpop.eup %1411  ;;  %v837_v19 = vsub.f32 2.0, %v836_v59  ;;  %v3105_v59 = vld [vmem:[#allocation23_spill] sm:$0xff] }
  0x81   :  { %v2298_v20 = vmul.f32 %v2288_v54, %v575_v25  ;;  %v3018_v25 = vstv %s2258_s1  ;;  %v197_v49 = vmul.f32 %v3010_v56, %v3105_v59 }
  0x82   :  { %v2302_v26 = vmul.f32 %v1410_v51, %v837_v19  ;;  %v136_v6 = vmul.f32 %v3018_v25, %v3102_v30 }
  0x84   :  { %3099 = vst [vmem:[#allocation30_spill] sm:$0xff] %v2302_v26  ;;  %v839_v29 = vadd.f32 %v2302_v26, %v810_v52  ;;  %v840_v45 = vmul.f32 %v2302_v26, %v2012_v43  ;;  %v842_v15 = vmul.f32 %v2302_v26, %v2222_v31  ;;  %v110_v43 = vmul.f32 %v3015_v50, %v3101_v1  ;;  %v3106_v1 = vld [vmem:[#allocation33_spill] sm:$0xff] }
  0x85   :  { %v137_v38 = vadd.f32 %v136_v6, %v108_v44  ;;  %v194_v52 = vmul.f32 %v3011_v46, %v3105_v59  ;;  %v642_v28 = vmul.f32 %v2999_v37, %v3106_v1  ;;  %v3108_v59 = vld [vmem:[#allocation26_spill] sm:$0xff]  ;;  %v3009_v37 = vstv %s2332_s9 }
  0x86   :  { %v841_v31 = vadd.f32 %v840_v45, %v812_v62  ;;  %v843_v47 = vadd.f32 %v842_v15, %v814_v32  ;;  %1413 = vrcp.f32 %v839_v29  ;;  %v111_v51 = vadd.f32 %v110_v43, %v81_v13  ;;  %v3107_v45 = vld [vmem:[#allocation24_spill] sm:$0xff] }
  0x87   :  { %v166_v36 = vadd.f32 %v165_v61, %v137_v38  ;;  %v168_v62 = vmul.f32 %v3013_v63, %v3103_v27  ;;  %v3003_v32 = vstv %s2271_s8  ;;  %v226_v30 = vmul.f32 %v3000_v18, %v3107_v45  ;;  %v3109_v18 = vld [vmem:[#allocation27_spill] sm:$0xff] }
  0x88   :  { %v140_v19 = vadd.f32 %v139_v33, %v111_v51  ;;  %v223_v15 = vmul.f32 %v3003_v32, %v3107_v45  ;;  %v3001_v43 = vstv %s2280_s11  ;;  %v3002_v38 = vstv %s2307_s17 }
  0x89   :  { %v195_v13 = vadd.f32 %v194_v52, %v166_v36  ;;  %v3004_v27 = vstv %s2319_s18  ;;  %v3007_v61 = vstv %s2327_s0  ;;  %v252_v36 = vmul.f32 %v3001_v43, %v3108_v59 }
  0x8a   :  { %v169_v44 = vadd.f32 %v168_v62, %v140_v19  ;;  %v255_v19 = vmul.f32 %v3002_v38, %v3108_v59  ;;  %v3008_v62 = vstv %s2339_s29  ;;  %v671_v45 = vmul.f32 %v3004_v27, %v2005_v16 }
  0x8b   :  { %v224_v33 = vadd.f32 %v223_v15, %v195_v13  ;;  %v284_v32 = vmul.f32 %v3008_v62, %v3109_v18  ;;  %v3114_v43 = vstv %s1736_s20  ;;  %s3136_s20 = sld [smem:[#allocation55_spill]] }
  0x8c   :  { %v1414_v6 = vpop.eup %1413  ;;  %v198_v52 = vadd.f32 %v197_v49, %v169_v44  ;;  %v672_v15 = vadd.f32 %v671_v45, %v642_v28  ;;  %v700_v49 = vmul.f32 %v3007_v61, %v2197_v60  ;;  %v3006_v44 = vstv %s2351_s10  ;;  %s3111_s10 = sld [smem:[#allocation25_spill]] }
  0x8d   :  { %v851_v51 = vmul.f32 %v1414_v6, %v839_v29  ;;  %v253_v40 = vadd.f32 %v252_v36, %v224_v33  ;;  %v281_v29 = vmul.f32 %v3009_v37, %v3109_v18  ;;  %v729_v33 = vmul.f32 %v3006_v44, %v2229_v3 }
  0x8e   :  { %v227_v13 = vadd.f32 %v226_v30, %v198_v52  ;;  %v3012_v36 = vstv %s2367_s12  ;;  %v3113_v44 = vstv %s1728_s19  ;;  %v3115_v37 = vstv %s1749_s21  ;;  %s3153_s19 = sld [smem:[#allocation54_spill]] }
  0x8f   :  { %v852_v41 = vsub.f32 2.0, %v851_v51  ;;  %v282_v38 = vadd.f32 %v281_v29, %v253_v40  ;;  %v701_v51 = vadd.f32 %v700_v49, %v672_v15 }
  0x90   :  { %v256_v27 = vadd.f32 %v255_v19, %v227_v13  ;;  %v3112_v13 = vld [vmem:[#allocation34_spill] sm:$0xff] }
  0x91   :  { %v2398_v59 = vmul.f32 %v1414_v6, %v852_v41  ;;  %v2436_v15 = vmul.f32 %v3112_v13, %v282_v38  ;;  %v3116_v38 = vstv %s1817_s22  ;;  %s1230_s21 = sshll.u32 %s3136_s20, 4  ;;  %s3138_s22 = sld [smem:[#allocation48_spill]]  ;;  %s1231_s21 = int_to_ptr.hbm [resolvable:$true] %s1230_s21 }
  0x92   :  { %v2438_v49 = vadd.f32 %v284_v32, %v256_v27  ;;  %v3117_v32 = vstv %s1825_s23  ;;  %s3147_s23 = sld [smem:[#allocation49_spill]] }
  0x93   :  { %3110 = vst [vmem:[#allocation31_spill] sm:$0xff] %v2398_v59  ;;  %v854_v28 = vmul.f32 %v2398_v59, %v841_v31  ;;  %v910_v30 = vmul.f32 %v2398_v59, %v3106_v1  ;;  %v856_v52 = vmul.f32 %v2398_v59, %v843_v47  ;;  %v939_v41 = vmul.f32 %v2398_v59, %v2005_v16 }
  0x94   :  { %v968_v40 = vmul.f32 %v2398_v59, %v2197_v60  ;;  %v997_v18 = vmul.f32 %v2398_v59, %v2229_v3  ;;  %v1026_v31 = vmul.f32 %v2398_v59, %v2242_v57  ;;  %v1055_v6 = vmul.f32 %v2398_v59, %v2260_v0  ;;  %s1217_s20 = sshll.u32 %s3153_s19, 4  ;;  %s1218_s20 = int_to_ptr.hbm [resolvable:$true] %s1217_s20 }
  0x95   :  { %v2422_v47 = vadd.f32 %v854_v28, %v1645_v11  ;;  %912 = vst [vmem:[#allocation10 + $0x40] sm:$0xff] %v910_v30  ;;  %v2425_v19 = vadd.f32 %v856_v52, %v1647_v12  ;;  %v2429_v45 = vmul.f32 %v2398_v59, %v2275_v2  ;;  %v2433_v29 = vmul.f32 %v2398_v59, %v2302_v26 }
  0x96   :  { %941 = vst [vmem:[#allocation10 + $0x48] sm:$0xff] %v939_v41  ;;  %v2440_v28 = vadd.f32 %v729_v33, %v701_v51  ;;  %v2445_v52 = vmul.f32 %v3012_v36, %v2242_v57  ;;  %v3118_v51 = vstv %s1847_s24  ;;  %v3119_v36 = vstv %s1854_s25  ;;  %s3148_s24 = sld [smem:[#allocation50_spill]]  ;;  %s1574_s25 = smov 128  }
  0x97   :  { %v914_v61 = vsub.f32 %v3113_v44, %v2422_v47  ;;  %v916_v62 = vsub.f32 %v3114_v43, %v2425_v19  ;;  %v943_v56 = vsub.f32 %v3115_v37, %v2422_v47  ;;  %v945_v46 = vsub.f32 %v3116_v38, %v2425_v19  ;;  %970 = vst [vmem:[#allocation10 + $0x50] sm:$0xff] %v968_v40 }
  0x98   :  { %v972_v27 = vsub.f32 %v3117_v32, %v2422_v47  ;;  %v2465_v33 = vsub.f32 %v3118_v51, %v2425_v19  ;;  %v1001_v44 = vsub.f32 %v3119_v36, %v2422_v47  ;;  %999 = vst [vmem:[#allocation10 + $0x58] sm:$0xff] %v997_v18  ;;  %v3120_v43 = vstv %s3111_s10  ;;  %s3152_s10 = sld [smem:[#allocation53_spill]] }
  0x99   :  { %v2473_v63 = vsub.f32 %v3120_v43, %v2425_v19  ;;  %v2475_v37 = vmul.f32 %v914_v61, %v910_v30  ;;  %v2477_v9 = vmul.f32 %v916_v62, %v910_v30  ;;  %v2479_v38 = vmul.f32 %v943_v56, %v939_v41  ;;  %1028 = vst [vmem:[#allocation10 + $0x60] sm:$0xff] %v1026_v31 }
  0x9a   :  { %v2481_v50 = vmul.f32 %v945_v46, %v939_v41  ;;  %v2483_v32 = vmul.f32 %v972_v27, %v968_v40  ;;  %v2486_v51 = vmul.f32 %v2465_v33, %v968_v40  ;;  %v2488_v36 = vmul.f32 %v1001_v44, %v997_v18  ;;  %1057 = vst [vmem:[#allocation10 + $0x68] sm:$0xff] %v1055_v6 }
  0x9b   :  { %3121 = vst [vmem:[#allocation32_spill] sm:$0xff] %v2475_v37  ;;  %v2491_v43 = vmul.f32 %v2473_v63, %v997_v18  ;;  %v923_v30 = vmul.f32 %v2475_v37, %v914_v61  ;;  %v925_v41 = vmul.f32 %v2477_v9, %v914_v61  ;;  %v927_v40 = vmul.f32 %v2477_v9, %v916_v62 }
  0x9c   :  { %3122 = vst [vmem:[#allocation19_spill] sm:$0xff] %v2477_v9  ;;  %v952_v17 = vmul.f32 %v2479_v38, %v943_v56  ;;  %v954_v18 = vmul.f32 %v2481_v50, %v943_v56  ;;  %v956_v58 = vmul.f32 %v2481_v50, %v945_v46  ;;  %v981_v25 = vmul.f32 %v2483_v32, %v972_v27 }
  0x9d   :  { %3123 = vst [vmem:[#allocation20_spill] sm:$0xff] %v2479_v38  ;;  %v983_v35 = vmul.f32 %v2486_v51, %v972_v27  ;;  %v1012_v61 = vmul.f32 %v2491_v43, %v1001_v44  ;;  %v3126_v62 = vstv %s1866_s27  ;;  %v3129_v57 = vstv %s1894_s6  ;;  %s1576_s27 = smov [#allocation8]  }
  0x9e   :  { %3124 = vst [vmem:[#allocation21_spill] sm:$0xff] %v2481_v50  ;;  %v1030_v10 = vsub.f32 %v3126_v62, %v2422_v47  ;;  %v955_v46 = vadd.f32 %v954_v18, %v925_v41  ;;  %v1061_v3 = vsub.f32 %v3129_v57, %v2425_v19  ;;  %v3130_v27 = vstv %s1899_s4  ;;  %s1573_s4 = smov [#allocation11]  }
  0x9f   :  { %3125 = vst [vmem:[#allocation22_spill] sm:$0xff] %v2483_v32  ;;  %v3131_v60 = vstv %s1913_s3  ;;  %v3132_v41 = vstv %s1929_s5  ;;  %v953_v26 = vadd.f32 %v952_v17, %v923_v30  ;;  %v1010_v2 = vmul.f32 %v2488_v36, %v1001_v44  ;;  %s3135_s3 = sld [smem:[#allocation47_spill]]  ;;  %s2584_s5 = sshll.u32 %s1573_s4, 4  ;;  %s1229_s5 = int_to_ptr.vmem [resolvable:$true] %s2584_s5 }
  0xa0   :  { %920 = vst [vmem:[#allocation11 + $0x80] sm:$0xff] %v2475_v37  ;;  %v3127_v37 = vstv %s1878_s28  ;;  %v1090_v16 = vsub.f32 %v3131_v60, %v2425_v19  ;;  %v2525_v62 = vmul.f32 %v1030_v10, %v1026_v31  ;;  %v1117_v18 = vsub.f32 %v3132_v41, %v2422_v47  ;;  %s2646_s28 = sshll.u32 %s1576_s27, 4  ;;  %s1203_s28 = int_to_ptr.vmem [resolvable:$true] %s2646_s28 }
  0xa1   :  { %922 = vst [vmem:[#allocation11 + $0x88] sm:$0xff] %v2477_v9  ;;  %v1032_v59 = vsub.f32 %v3127_v37, %v2425_v19  ;;  %v3128_v9 = vstv %s1889_s2  ;;  %v984_v57 = vadd.f32 %v983_v35, %v955_v46  ;;  %v3133_v41 = vstv %s1950_s26  ;;  %s3134_s2 = sld [smem:[#allocation46_spill]]  ;;  %s1575_s26 = smov 8  }
  0xa2   :  { %949 = vst [vmem:[#allocation11 + $0x90] sm:$0xff] %v2479_v38  ;;  %v1059_v56 = vsub.f32 %v3128_v9, %v2422_v47  ;;  %v1088_v38 = vsub.f32 %v3130_v27, %v2422_v47  ;;  %v2541_v60 = vmul.f32 %v1090_v16, %v2429_v45  ;;  %v1119_v1 = vsub.f32 %v3133_v41, %v2425_v19 }
  0xa3   :  { %951 = vst [vmem:[#allocation11 + $0x98] sm:$0xff] %v2481_v50  ;;  %v2527_v37 = vmul.f32 %v1032_v59, %v1026_v31  ;;  %v2535_v50 = vmul.f32 %v1061_v3, %v1055_v6  ;;  %v1013_v35 = vadd.f32 %v1012_v61, %v984_v57  ;;  %v982_v53 = vadd.f32 %v981_v25, %v953_v26 }
  0xa4   :  { %978 = vst [vmem:[#allocation11 + $0xa0] sm:$0xff] %v2483_v32  ;;  %v2529_v9 = vmul.f32 %v1059_v56, %v1055_v6  ;;  %v2538_v27 = vmul.f32 %v1088_v38, %v2429_v45  ;;  %v2546_v32 = vmul.f32 %v1117_v18, %v2433_v29  ;;  %v1099_v46 = vmul.f32 %v2541_v60, %v1088_v38 }
  0xa5   :  { %980 = vst [vmem:[#allocation11 + $0xa8] sm:$0xff] %v2486_v51  ;;  %v1041_v31 = vmul.f32 %v2527_v37, %v1030_v10  ;;  %v1070_v6 = vmul.f32 %v2535_v50, %v1059_v56  ;;  %v2557_v0 = vmul.f32 %v1119_v1, %v2433_v29  ;;  %v1039_v7 = vmul.f32 %v2525_v62, %v1030_v10 }
  0xa6   :  { %1007 = vst [vmem:[#allocation11 + $0xb0] sm:$0xff] %v2488_v36  ;;  %v1068_v41 = vmul.f32 %v2529_v9, %v1059_v56  ;;  %v1097_v30 = vmul.f32 %v2538_v27, %v1088_v38  ;;  %v1126_v61 = vmul.f32 %v2546_v32, %v1117_v18  ;;  %v2566_v44 = vsub.f32 %v1645_v11, %v2422_v47 }
  0xa7   :  { %1009 = vst [vmem:[#allocation11 + $0xb8] sm:$0xff] %v2491_v43  ;;  %v1042_v17 = vadd.f32 %v1041_v31, %v1013_v35  ;;  %v1128_v57 = vmul.f32 %v2557_v0, %v1117_v18  ;;  %v1011_v26 = vadd.f32 %v1010_v2, %v982_v53  ;;  %v1148_v10 = vsub.f32 %v1647_v12, %v2425_v19 }
  0xa8   :  { %1036 = vst [vmem:[#allocation11 + $0xc0] sm:$0xff] %v2525_v62  ;;  %v957_v25 = vadd.f32 %v956_v58, %v927_v40  ;;  %v985_v38 = vmul.f32 %v2486_v51, %v2465_v33  ;;  %v1014_v11 = vmul.f32 %v2491_v43, %v2473_v63  ;;  %v1043_v47 = vmul.f32 %v2527_v37, %v1032_v59 }
  0xa9   :  { %1038 = vst [vmem:[#allocation11 + $0xc8] sm:$0xff] %v2527_v37  ;;  %v1071_v56 = vadd.f32 %v1070_v6, %v1042_v17  ;;  %v1040_v53 = vadd.f32 %v1039_v7, %v1011_v26  ;;  %v1072_v12 = vmul.f32 %v2535_v50, %v1061_v3  ;;  %v1101_v2 = vmul.f32 %v2541_v60, %v1090_v16 }
  0xaa   :  { %1065 = vst [vmem:[#allocation11 + $0xd0] sm:$0xff] %v2529_v9  ;;  %v2582_v58 = vmul.f32 %v2557_v0, %v1119_v1  ;;  %v986_v7 = vadd.f32 %v985_v38, %v957_v25  ;;  %v3137_v59 = vstv %s3134_s2  ;;  %v2595_v16 = vmul.f32 %v3112_v13, %v2438_v49  ;;  %v3142_v13 = vld [vmem:[#allocation36_spill] sm:$0xff]  ;;  %s1204_s2 = sshll.u32 %s3152_s10, 4  ;;  %s1205_s2 = int_to_ptr.hbm [resolvable:$true] %s1204_s2 }
  0xab   :  { %1067 = vst [vmem:[#allocation11 + $0xd8] sm:$0xff] %v2535_v50  ;;  %v1100_v63 = vadd.f32 %v1099_v46, %v1071_v56  ;;  %v296_v3 = vsub.f32 %v3137_v59, %v2436_v15  ;;  %v1069_v1 = vadd.f32 %v1068_v41, %v1040_v53  ;;  %v3139_v19 = vstv %s3135_s3  ;;  %v3143_v46 = vld [vmem:[#allocation37_spill] sm:$0xff]  ;;  %v3145_v56 = vld [vmem:[#allocation38_spill] sm:$0xff]  ;;  %v3146_v53 = vld [vmem:[#allocation39_spill] sm:$0xff]  ;;  %s1577_s3 = smov [#allocation10]  }
  0xac   :  { %1094 = vst [vmem:[#allocation11 + $0xe0] sm:$0xff] %v2538_v27  ;;  %v301_v33 = vsub.f32 %v3139_v19, %v2436_v15  ;;  %v3140_v40 = vstv %s2258_s1  ;;  %v1015_v6 = vadd.f32 %v1014_v11, %v986_v7  ;;  %v3144_v26 = vstv %s3138_s22  ;;  %s2653_s4 = sshll.u32 %s1577_s3, 4  ;;  %s2778_s22 = sld [smem:[#allocation5 + $0x1f]]  ;;  %s1216_s4 = int_to_ptr.vmem [resolvable:$true] %s2653_s4 }
  0xad   :  { %1086 = vst [vmem:[#allocation10 + $0x70] sm:$0xff] %v2429_v45  ;;  %v2604_v18 = vsub.f32 %v3140_v40, %v2436_v15  ;;  %v3141_v45 = vstv %s2262_s30  ;;  %v1129_v35 = vadd.f32 %v1128_v57, %v1100_v63  ;;  %v362_v49 = vmul.f32 %v3142_v13, %v296_v3 }
  0xae   :  { %1096 = vst [vmem:[#allocation11 + $0xe8] sm:$0xff] %v2541_v60  ;;  %v2609_v31 = vsub.f32 %v3141_v45, %v2436_v15  ;;  %v364_v17 = vmul.f32 %v3143_v46, %v296_v3  ;;  %v1098_v41 = vadd.f32 %v1097_v30, %v1069_v1  ;;  %v297_v25 = vsub.f32 %v3144_v26, %v2595_v16 }
  0xaf   :  { %1123 = vst [vmem:[#allocation11 + $0xf0] sm:$0xff] %v2546_v32  ;;  %v391_v38 = vmul.f32 %v3145_v56, %v301_v33  ;;  %v393_v59 = vmul.f32 %v3146_v53, %v301_v33  ;;  %v2623_v57 = vmul.f32 %v2566_v44, %v1129_v35  ;;  %v1044_v11 = vadd.f32 %v1043_v47, %v1015_v6 }
  0xb0   :  { %1115 = vst [vmem:[#allocation10 + $0x78] sm:$0xff] %v2433_v29  ;;  %v1141_v63 = vmul.f32 %v1129_v35, %v1129_v35  ;;  %v2625_v7 = vmul.f32 %v1148_v10, %v1129_v35  ;;  %v1127_v19 = vadd.f32 %v1126_v61, %v1098_v41  ;;  %v366_v29 = vmul.f32 %v3142_v13, %v297_v25  ;;  %v3150_v61 = vld [vmem:[#allocation40_spill] sm:$0xff] }
  0xb1   :  { %1125 = vst [vmem:[#allocation11 + $0xf8] sm:$0xff] %v2557_v0  ;;  %v368_v30 = vmul.f32 %v3143_v46, %v297_v25  ;;  %v392_v1 = vadd.f32 %v391_v38, %v362_v49  ;;  %v1073_v40 = vadd.f32 %v1072_v12, %v1044_v11  ;;  %v394_v47 = vadd.f32 %v393_v59, %v364_v17 }
  0xb2   :  { %1180 = vst [vmem:[#allocation8 + $0x28] sm:$0xff] %v1129_v35  ;;  %1236 = dma.vmem_to_hbm [thread:$0]  %s1229_s5, 4096, %s1231_s21, [#allocation12], %s1574_s25, %s1574_s25, %s1575_s26   ;;  %v420_v41 = vmul.f32 %v3150_v61, %v2604_v18  ;;  %v2637_v26 = vmul.f32 %v1148_v10, %v1127_v19  ;;  %v422_v13 = vmul.f32 %v2096_v21, %v2604_v18 }
  0xb3   :  { %1182 = vst [vmem:[#allocation8 + $0x30] sm:$0xff] %v1129_v35  ;;  %v3149_v45 = vstv %s3147_s23  ;;  %v3151_v49 = vstv %s3148_s24  ;;  %v449_v35 = vmul.f32 %v2098_v34, %v2609_v31  ;;  %v1102_v12 = vadd.f32 %v1101_v2, %v1073_v40  ;;  %s2743_s21 = sld [smem:[#allocation5 + $0x19]] }
  0xb4   :  { %v302_v6 = vsub.f32 %v3149_v45, %v2595_v16  ;;  %1178 = vst [vmem:[#allocation8 + $0x20] sm:$0xff] %v1127_v19  ;;  %v308_v46 = vsub.f32 %v3151_v49, %v2595_v16  ;;  %v421_v38 = vadd.f32 %v420_v41, %v392_v1  ;;  %v1155_v59 = vsub.f32 %v2637_v26, %v2623_v57  ;;  %s3177_s23 = sld [smem:[#allocation51_spill]] }
  0xb5   :  { %298 = vst [vmem:[#allocation13] sm:$0xff] %v296_v3  ;;  %v423_v2 = vadd.f32 %v422_v13, %v394_v47  ;;  %v451_v45 = vmul.f32 %v2101_v22, %v2609_v31  ;;  %v3155_v47 = vstv %s2265_s7  ;;  %s2697_s7 = sld [smem:[#allocation5 + $0x1a]] }
  0xb6   :  { %v395_v10 = vmul.f32 %v3145_v56, %v302_v6  ;;  %v397_v17 = vmul.f32 %v3146_v53, %v302_v6  ;;  %300 = vst [vmem:[#allocation13 + $0x8] sm:$0xff] %v297_v25  ;;  %v424_v3 = vmul.f32 %v3150_v61, %v308_v46  ;;  %v426_v56 = vmul.f32 %v2096_v21, %v308_v46  ;;  %s3188_s24 = sld [smem:[#allocation56_spill]] }
  0xb7   :  { %v1131_v53 = vadd.f32 %v2582_v58, %v1102_v12  ;;  %304 = vst [vmem:[#allocation13 + $0x10] sm:$0xff] %v301_v33  ;;  %v450_v40 = vadd.f32 %v449_v35, %v421_v38  ;;  %v3154_v25 = vstv %s2290_s13  ;;  %v319_v61 = vsub.f32 %v3155_v47, %v2436_v15  ;;  %s2706_s13 = sld [smem:[#allocation5 + $0x1c]] }
  0xb8   :  { %v396_v11 = vadd.f32 %v395_v10, %v366_v29  ;;  %v398_v1 = vadd.f32 %v397_v17, %v368_v30  ;;  %306 = vst [vmem:[#allocation13 + $0x18] sm:$0xff] %v302_v6  ;;  %v314_v41 = vsub.f32 %v3154_v25, %v2595_v16  ;;  %v3156_v21 = vstv %s2292_s14  ;;  %s2714_s14 = sld [smem:[#allocation5 + $0x1e]] }
  0xb9   :  { %v320_v13 = vsub.f32 %v3156_v21, %v2595_v16  ;;  %v1140_v58 = vmul.f32 %v1131_v53, %v1127_v19  ;;  %v2677_v33 = vmul.f32 %v2566_v44, %v1131_v53  ;;  %1184 = vst [vmem:[#allocation8 + $0x38] sm:$0xff] %v1131_v53  ;;  %v452_v6 = vadd.f32 %v451_v45, %v423_v2 }
  0xba   :  { %v425_v29 = vadd.f32 %v424_v3, %v396_v11  ;;  %v427_v30 = vadd.f32 %v426_v56, %v398_v1  ;;  %310 = vst [vmem:[#allocation13 + $0x20] sm:$0xff] %v2604_v18  ;;  %v453_v49 = vmul.f32 %v2098_v34, %v314_v41  ;;  %v455_v35 = vmul.f32 %v2101_v22, %v314_v41  ;;  %1210 = dma.vmem_to_hbm [thread:$0]  %s1203_s28, 1024, %s1205_s2, [#allocation9], %s1574_s25, %s1574_s25, %s1575_s26  }
  0xbb   :  { %v478_v12 = vmul.f32 %v2135_v24, %v319_v61  ;;  %v2686_v19 = vsub.f32 %v1140_v58, %v1141_v63  ;;  %v1151_v44 = vsub.f32 %v2677_v33, %v2625_v7  ;;  %312 = vst [vmem:[#allocation13 + $0x28] sm:$0xff] %v308_v46  ;;  %v480_v18 = vmul.f32 %v2137_v39, %v319_v61  ;;  %1223 = dma.vmem_to_hbm [thread:$0]  %s1216_s4, 2048, %s1218_s20, [#allocation9], %s1574_s25, %s1574_s25, %s1575_s26  }
  0xbc   :  { %v482_v34 = vmul.f32 %v2135_v24, %v320_v13  ;;  %316 = vst [vmem:[#allocation13 + $0x30] sm:$0xff] %v2609_v31  ;;  %v454_v22 = vadd.f32 %v453_v49, %v425_v29  ;;  %v456_v63 = vadd.f32 %v455_v35, %v427_v30  ;;  %v484_v17 = vmul.f32 %v2137_v39, %v320_v13  ;;  %s1243_s27 = sshll.u32 %s3188_s24, 4  ;;  %s1579_s28 = smov [#allocation7]   ;;  %s1244_s27 = int_to_ptr.hbm [resolvable:$true] %s1243_s27 }
  0xbd   :  { %v479_v10 = vadd.f32 %v478_v12, %v450_v40  ;;  %1415 = vrcp.f32 %v2686_v19  ;;  %318 = vst [vmem:[#allocation13 + $0x38] sm:$0xff] %v314_v41  ;;  %v481_v46 = vadd.f32 %v480_v18, %v452_v6  ;;  %v3157_v24 = vstv %s2271_s8  ;;  %s2720_s8 = sld [smem:[#allocation5 + $0x11]]  ;;  %s1189_s1 = sshll.u32 %s1579_s28, 4  ;;  %s1190_s1 = int_to_ptr.vmem [resolvable:$true] %s1189_s1 }
  0xbe   :  { %v325_v38 = vsub.f32 %v3157_v24, %v2436_v15  ;;  %v3158_v2 = vstv %s2300_s16  ;;  %322 = vst [vmem:[#allocation13 + $0x40] sm:$0xff] %v319_v61  ;;  %v483_v31 = vadd.f32 %v482_v34, %v454_v22  ;;  %v485_v56 = vadd.f32 %v484_v17, %v456_v63  ;;  %s2728_s16 = sld [smem:[#allocation5 + $0x15]] }
  0xbf   :  { %v326_v3 = vsub.f32 %v3158_v2, %v2595_v16  ;;  %v3159_v53 = vstv %s2280_s11  ;;  %v3160_v11 = vstv %s2307_s17  ;;  %324 = vst [vmem:[#allocation13 + $0x48] sm:$0xff] %v320_v13  ;;  %s2726_s11 = sld [smem:[#allocation5 + $0x13]]  ;;  %v3162_v49 = vstv %s2339_s29  ;;  %v3165_v2 = vld [vmem:[#allocation43_spill] sm:$0xff] }
  0xc0   :  { %v331_v39 = vsub.f32 %v3159_v53, %v2436_v15  ;;  %v332_v1 = vsub.f32 %v3160_v11, %v2595_v16  ;;  %v507_v40 = vmul.f32 %v2139_v48, %v325_v38  ;;  %v509_v45 = vmul.f32 %v2145_v42, %v325_v38  ;;  %328 = vst [vmem:[#allocation13 + $0x50] sm:$0xff] %v325_v38  ;;  %s2739_s17 = sld [smem:[#allocation5 + $0x17]]  ;;  %v3168_v11 = vld [vmem:[#allocation28_spill] sm:$0xff] }
  0xc1   :  { %v511_v25 = vmul.f32 %v2139_v48, %v326_v3  ;;  %v513_v41 = vmul.f32 %v2145_v42, %v326_v3  ;;  %330 = vst [vmem:[#allocation13 + $0x58] sm:$0xff] %v326_v3  ;;  %v3161_v42 = vstv %s2332_s9  ;;  %v338_v35 = vsub.f32 %v3162_v49, %v2595_v16  ;;  %s2750_s29 = sld [smem:[#allocation5 + $0x1b]]  ;;  %v3166_v3 = vld [vmem:[#allocation42_spill] sm:$0xff] }
  0xc2   :  { %v536_v47 = vmul.f32 %v2148_v55, %v331_v39  ;;  %v538_v61 = vmul.f32 %v2151_v4, %v331_v39  ;;  %v540_v21 = vmul.f32 %v2148_v55, %v332_v1  ;;  %v542_v13 = vmul.f32 %v2151_v4, %v332_v1  ;;  %334 = vst [vmem:[#allocation13 + $0x60] sm:$0xff] %v331_v39  ;;  %s2772_s9 = sld [smem:[#allocation5 + $0x1d]] }
  0xc3   :  { %v508_v58 = vadd.f32 %v507_v40, %v479_v10  ;;  %v510_v29 = vadd.f32 %v509_v45, %v481_v46  ;;  %v512_v48 = vadd.f32 %v511_v25, %v483_v31  ;;  %v514_v30 = vadd.f32 %v513_v41, %v485_v56  ;;  %v2741_v12 = vpop.eup %1415  ;;  %336 = vst [vmem:[#allocation13 + $0x68] sm:$0xff] %v332_v1  ;;  %s3189_s2 = sld [smem:[#allocation52_spill]] }
  0xc4   :  { %v337_v6 = vsub.f32 %v3161_v42, %v2436_v15  ;;  %v3163_v55 = vsub.f32 2.0, %v2298_v20  ;;  %v759_v17 = vadd.f32 %v2445_v52, %v2440_v28  ;;  %342 = vst [vmem:[#allocation13 + $0x78] sm:$0xff] %v338_v35  ;;  %v571_v46 = vmul.f32 %v2168_v23, %v338_v35 }
  0xc5   :  { %v537_v18 = vadd.f32 %v536_v47, %v508_v58  ;;  %v539_v34 = vadd.f32 %v538_v61, %v510_v29  ;;  %v541_v22 = vadd.f32 %v540_v21, %v512_v48  ;;  %v543_v63 = vadd.f32 %v542_v13, %v514_v30  ;;  %v3170_v21 = vld [vmem:[#allocation30_spill] sm:$0xff]  ;;  %v3171_v48 = vld [vmem:[#allocation33_spill] sm:$0xff] }
  0xc6   :  { %v579_v4 = vmul.f32 %v2288_v54, %v3163_v55  ;;  %340 = vst [vmem:[#allocation13 + $0x70] sm:$0xff] %v337_v6  ;;  %v565_v10 = vmul.f32 %v2156_v14, %v337_v6  ;;  %v567_v20 = vmul.f32 %v2168_v23, %v337_v6  ;;  %v569_v54 = vmul.f32 %v2156_v14, %v338_v35  ;;  %v3172_v55 = vld [vmem:[#allocation35_spill] sm:$0xff] }
  0xc7   :  { %v3164_v24 = vsub.f32 %v2248_v8, %v2214_v5  ;;  %v3167_v31 = vsub.f32 %v3165_v2, %v3166_v3  ;;  %v786_v53 = vstv %s2697_s7  ;;  %v2762_v14 = vmul.f32 %v2741_v12, %v2686_v19  ;;  %v3169_v19 = vld [vmem:[#allocation29_spill] sm:$0xff] }
  0xc8   :  { %v566_v28 = vadd.f32 %v565_v10, %v537_v18  ;;  %v568_v52 = vadd.f32 %v567_v20, %v539_v34  ;;  %v570_v39 = vadd.f32 %v569_v54, %v541_v22  ;;  %v572_v23 = vadd.f32 %v571_v46, %v543_v63  ;;  %v3173_v18 = vld [vmem:[#allocation41_spill] sm:$0xff] }
  0xc9   :  { %v585_v38 = vmul.f32 %v3164_v24, %v579_v4  ;;  %v589_v56 = vmul.f32 %v3167_v31, %v579_v4  ;;  %v787_v5 = vmul.f32 %v786_v53, %v3168_v11  ;;  %v815_v8 = vstv %s2706_s13  ;;  %v3174_v24 = vld [vmem:[#allocation44_spill] sm:$0xff]  ;;  %v3175_v2 = vld [vmem:[#allocation45_spill] sm:$0xff]  ;;  %s1191_s3 = sshll.u32 %s3189_s2, 4  ;;  %s1192_s3 = int_to_ptr.hbm [resolvable:$true] %s1191_s3 }
  0xca   :  { %v844_v1 = vstv %s2714_s14  ;;  %v816_v41 = vmul.f32 %v815_v8, %v3169_v19  ;;  %v644_v58 = vstv %s2720_s8  ;;  %v673_v42 = vstv %s2726_s11 }
  0xcb   :  { %v590_v40 = vmul.f32 %v585_v38, %v566_v28  ;;  %v591_v45 = vmul.f32 %v589_v56, %v568_v52  ;;  %v594_v25 = vmul.f32 %v585_v38, %v570_v39  ;;  %v595_v47 = vmul.f32 %v589_v56, %v572_v23 }
  0xcc   :  { %v788_v61 = vadd.f32 %v787_v5, %v759_v17  ;;  %v845_v13 = vmul.f32 %v844_v1, %v3170_v21  ;;  %v645_v30 = vmul.f32 %v644_v58, %v3171_v48  ;;  %v702_v6 = vstv %s2728_s16  ;;  %v3182_v48 = vld [vmem:[#allocation32_spill] sm:$0xff] }
  0xcd   :  { %v592_v29 = vadd.f32 %v591_v45, %v590_v40  ;;  %v596_v49 = vadd.f32 %v595_v47, %v594_v25  ;;  %v674_v4 = vmul.f32 %v673_v42, %v3172_v55  ;;  %v703_v34 = vmul.f32 %v702_v6, %v3173_v18 }
  0xce   :  { %v817_v35 = vadd.f32 %v816_v41, %v788_v61  ;;  %v731_v63 = vstv %s2739_s17  ;;  %v760_v10 = vstv %s2743_s21  ;;  %v789_v20 = vstv %s2750_s29 }
  0xcf   :  { %v593_v22 = vadd.f32 %v592_v29, %v2436_v15  ;;  %v597_v54 = vadd.f32 %v596_v49, %v2595_v16  ;;  %v675_v46 = vadd.f32 %v674_v4, %v645_v30  ;;  %v732_v38 = vmul.f32 %v731_v63, %v3174_v24  ;;  %v3176_v15 = vld [vmem:[#allocation31_spill] sm:$0xff]  ;;  %v3183_v49 = vld [vmem:[#allocation19_spill] sm:$0xff] }
  0xd0   :  { %v846_v17 = vadd.f32 %v845_v13, %v817_v35  ;;  %v761_v3 = vmul.f32 %v760_v10, %v3175_v2  ;;  %v1145_v56 = vsub.f32 2.0, %v2762_v14  ;;  %v790_v52 = vmul.f32 %v789_v20, %v3168_v11 }
  0xd1   :  { %vm598_vm0 = vcmp.ge.f32.partialorder %v593_v22, 0.0  ;;  %vm599_vm1 = vcmp.le.f32.partialorder %v593_v22, 31.0  ;;  %vm602_vm3 = vcmp.ge.f32.partialorder %v597_v54, 0.0  ;;  %vm603_vm4 = vcmp.le.f32.partialorder %v597_v54, 31.0 }
  0xd2   :  { %vm600_vm2 = vmand %vm598_vm0, %vm599_vm1  ;;  %v2803_v16 = vmul.f32 %v3176_v15, %v846_v17  ;;  %v704_v31 = vadd.f32 %v703_v34, %v675_v46  ;;  %v818_v39 = vstv %s2772_s9  ;;  %v3178_v5 = vstv %s2295_s15  ;;  %v3187_v17 = vld [vmem:[#allocation22_spill] sm:$0xff] }
  0xd3   :  { %v601_v28 = vsel %vm600_vm2, %v593_v22, 0.0  ;;  %vm604_vm5 = vmand %vm602_vm3, %vm603_vm4  ;;  %v847_v25 = vstv %s2778_s22  ;;  %v819_v41 = vmul.f32 %v818_v39, %v3169_v19  ;;  %v3179_v14 = vstv %s2319_s18  ;;  %v3185_v19 = vld [vmem:[#allocation20_spill] sm:$0xff]  ;;  %v3186_v22 = vld [vmem:[#allocation21_spill] sm:$0xff] }
  0xd4   :  { %606 = vst [vmem:[#allocation7] sm:$0xff] %v601_v28  ;;  %v605_v23 = vsel %vm604_vm5, %v597_v54, 0.0  ;;  %v860_v40 = vsub.f32 %v3178_v5, %v2803_v16  ;;  %v733_v45 = vadd.f32 %v732_v38, %v704_v31  ;;  %v866_v47 = vsub.f32 %v3179_v14, %v2803_v16 }
  0xd5   :  { %608 = vst [vmem:[#allocation7 + $0x8] sm:$0xff] %v605_v23  ;;  %v3180_v61 = vstv %s2327_s0  ;;  %v3181_v13 = vstv %s3177_s23  ;;  %v3184_v4 = vstv %s2367_s12  ;;  %v848_v2 = vmul.f32 %v847_v25, %v3170_v21  ;;  %s1578_s0 = smov [#allocation13]  }
  0xd6   :  { %v872_v11 = vsub.f32 %v3180_v61, %v2803_v16  ;;  %v878_v29 = vsub.f32 %v3181_v13, %v2803_v16  ;;  %863 = vst [vmem:[#allocation13 + $0x80] sm:$0xff] %v860_v40  ;;  %v929_v30 = vmul.f32 %v3182_v48, %v860_v40  ;;  %v931_v35 = vmul.f32 %v3183_v49, %v860_v40  ;;  %s2892_s12 = sshll.u32 %s1578_s0, 4  ;;  %s1242_s12 = int_to_ptr.vmem [resolvable:$true] %s2892_s12 }
  0xd7   :  { %v762_v55 = vadd.f32 %v761_v3, %v733_v45  ;;  %v884_v18 = vsub.f32 %v3184_v4, %v2803_v16  ;;  %869 = vst [vmem:[#allocation13 + $0x90] sm:$0xff] %v866_v47  ;;  %v958_v34 = vmul.f32 %v3185_v19, %v866_v47  ;;  %v960_v54 = vmul.f32 %v3186_v22, %v866_v47 }
  0xd8   :  { %v987_v46 = vmul.f32 %v3187_v17, %v872_v11  ;;  %v989_v24 = vmul.f32 %v2486_v51, %v872_v11  ;;  %875 = vst [vmem:[#allocation13 + $0xa0] sm:$0xff] %v872_v11  ;;  %v1016_v3 = vmul.f32 %v2488_v36, %v878_v29  ;;  %v1018_v23 = vmul.f32 %v2491_v43, %v878_v29 }
  0xd9   :  { %v791_v38 = vadd.f32 %v790_v52, %v762_v55  ;;  %v959_v31 = vadd.f32 %v958_v34, %v929_v30  ;;  %v961_v28 = vadd.f32 %v960_v54, %v931_v35  ;;  %881 = vst [vmem:[#allocation13 + $0xb0] sm:$0xff] %v878_v29  ;;  %v890_v5 = vsub.f32 %v786_v53, %v2803_v16 }
  0xda   :  { %887 = vst [vmem:[#allocation13 + $0xc0] sm:$0xff] %v884_v18  ;;  %v1045_v45 = vmul.f32 %v2525_v62, %v884_v18  ;;  %v896_v52 = vsub.f32 %v815_v8, %v2803_v16  ;;  %v1146_v21 = vmul.f32 %v2741_v12, %v1145_v56  ;;  %v1047_v61 = vmul.f32 %v2527_v37, %v884_v18 }
  0xdb   :  { %v820_v40 = vadd.f32 %v819_v41, %v791_v38  ;;  %v988_v14 = vadd.f32 %v987_v46, %v959_v31  ;;  %v990_v47 = vadd.f32 %v989_v24, %v961_v28  ;;  %893 = vst [vmem:[#allocation13 + $0xd0] sm:$0xff] %v890_v5  ;;  %v902_v11 = vsub.f32 %v844_v1, %v2803_v16 }
  0xdc   :  { %899 = vst [vmem:[#allocation13 + $0xe0] sm:$0xff] %v896_v52  ;;  %v1074_v8 = vmul.f32 %v2529_v9, %v890_v5  ;;  %v1076_v12 = vmul.f32 %v2535_v50, %v890_v5  ;;  %v2860_v29 = vmul.f32 %v1151_v44, %v1146_v21  ;;  %v1103_v35 = vmul.f32 %v2538_v27, %v896_v52 }
  0xdd   :  { %v849_v53 = vadd.f32 %v848_v2, %v820_v40  ;;  %v1017_v41 = vadd.f32 %v1016_v3, %v988_v14  ;;  %v1019_v13 = vadd.f32 %v1018_v23, %v990_v47  ;;  %905 = vst [vmem:[#allocation13 + $0xf0] sm:$0xff] %v902_v11  ;;  %v1105_v55 = vmul.f32 %v2541_v60, %v896_v52 }
  0xde   :  { %v1132_v54 = vmul.f32 %v2546_v32, %v902_v11  ;;  %v1134_v38 = vmul.f32 %v2557_v0, %v902_v11 }
  0xdf   :  { %v2855_v56 = vmul.f32 %v3176_v15, %v849_v53  ;;  %v1046_v1 = vadd.f32 %v1045_v45, %v1017_v41  ;;  %v1048_v30 = vadd.f32 %v1047_v61, %v1019_v13 }
  0xe1   :  { %v861_v4 = vsub.f32 %v644_v58, %v2855_v56  ;;  %v867_v18 = vsub.f32 %v673_v42, %v2855_v56  ;;  %v873_v15 = vsub.f32 %v702_v6, %v2855_v56  ;;  %v879_v7 = vsub.f32 %v731_v63, %v2855_v56 }
  0xe2   :  { %v885_v33 = vsub.f32 %v760_v10, %v2855_v56  ;;  %v1075_v44 = vadd.f32 %v1074_v8, %v1046_v1  ;;  %v1077_v34 = vadd.f32 %v1076_v12, %v1048_v30  ;;  %v891_v10 = vsub.f32 %v789_v20, %v2855_v56 }
  0xe3   :  { %865 = vst [vmem:[#allocation13 + $0x88] sm:$0xff] %v861_v4  ;;  %v933_v58 = vmul.f32 %v3182_v48, %v861_v4  ;;  %v935_v46 = vmul.f32 %v3183_v49, %v861_v4  ;;  %v962_v42 = vmul.f32 %v3185_v19, %v867_v18  ;;  %v964_v24 = vmul.f32 %v3186_v22, %v867_v18 }
  0xe4   :  { %871 = vst [vmem:[#allocation13 + $0x98] sm:$0xff] %v867_v18  ;;  %v991_v6 = vmul.f32 %v3187_v17, %v873_v15  ;;  %v993_v63 = vmul.f32 %v2486_v51, %v873_v15  ;;  %v1020_v48 = vmul.f32 %v2488_v36, %v879_v7  ;;  %v1022_v49 = vmul.f32 %v2491_v43, %v879_v7 }
  0xe5   :  { %v963_v2 = vadd.f32 %v962_v42, %v933_v58  ;;  %v965_v3 = vadd.f32 %v964_v24, %v935_v46  ;;  %877 = vst [vmem:[#allocation13 + $0xa8] sm:$0xff] %v873_v15  ;;  %v1049_v51 = vmul.f32 %v2525_v62, %v885_v33  ;;  %v1104_v20 = vadd.f32 %v1103_v35, %v1075_v44 }
  0xe6   :  { %883 = vst [vmem:[#allocation13 + $0xb8] sm:$0xff] %v879_v7  ;;  %v1106_v19 = vadd.f32 %v1105_v55, %v1077_v34  ;;  %v1156_v36 = vmul.f32 %v1155_v59, %v1146_v21  ;;  %v1051_v43 = vmul.f32 %v2527_v37, %v885_v33  ;;  %v897_v31 = vsub.f32 %v818_v39, %v2855_v56 }
  0xe7   :  { %v992_v22 = vadd.f32 %v991_v6, %v963_v2  ;;  %v994_v17 = vadd.f32 %v993_v63, %v965_v3  ;;  %889 = vst [vmem:[#allocation13 + $0xc8] sm:$0xff] %v885_v33  ;;  %v903_v28 = vsub.f32 %v847_v25, %v2855_v56  ;;  %v1133_v23 = vadd.f32 %v1132_v54, %v1104_v20 }
  0xe8   :  { %895 = vst [vmem:[#allocation13 + $0xd8] sm:$0xff] %v891_v10  ;;  %v1135_v62 = vadd.f32 %v1134_v38, %v1106_v19  ;;  %v1078_v57 = vmul.f32 %v2529_v9, %v891_v10  ;;  %v1080_v26 = vmul.f32 %v2535_v50, %v891_v10  ;;  %v1107_v52 = vmul.f32 %v2538_v27, %v897_v31 }
  0xe9   :  { %v1021_v5 = vadd.f32 %v1020_v48, %v992_v22  ;;  %v1023_v40 = vadd.f32 %v1022_v49, %v994_v17  ;;  %901 = vst [vmem:[#allocation13 + $0xe8] sm:$0xff] %v897_v31  ;;  %v1157_v37 = vmul.f32 %v2860_v29, %v1133_v23  ;;  %v1109_v25 = vmul.f32 %v2541_v60, %v897_v31 }
  0xea   :  { %907 = vst [vmem:[#allocation13 + $0xf8] sm:$0xff] %v903_v28  ;;  %v1158_v59 = vmul.f32 %v1156_v36, %v1135_v62  ;;  %v1136_v50 = vmul.f32 %v2546_v32, %v903_v28  ;;  %v1138_v47 = vmul.f32 %v2557_v0, %v903_v28 }
  0xeb   :  { %v1050_v39 = vadd.f32 %v1049_v51, %v1021_v5  ;;  %v1052_v45 = vadd.f32 %v1051_v43, %v1023_v40  ;;  %1249 = dma.vmem_to_hbm [thread:$0]  %s1242_s12, 4096, %s1244_s27, [#allocation12], %s1574_s25, %s1574_s25, %s1575_s26  }
  0xec   :  { %v1159_v21 = vadd.f32 %v1158_v59, %v1157_v37 }
  0xed   :  { %v1079_v14 = vadd.f32 %v1078_v57, %v1050_v39  ;;  %v1081_v9 = vadd.f32 %v1080_v26, %v1052_v45 }
  0xee   :  { %v1160_v61 = vadd.f32 %v1159_v21, %v2803_v16 }
  0xef   :  { %v1108_v11 = vadd.f32 %v1107_v52, %v1079_v14  ;;  %v1110_v53 = vadd.f32 %v1109_v25, %v1081_v9 }
  0xf0   :  { %vm1165_vm6 = vcmp.ge.f32.partialorder %v1160_v61, 0.0  ;;  %vm1166_vm7 = vcmp.le.f32.partialorder %v1160_v61, 31.0 }
  0xf1   :  { %vm1167_vm8 = vmand %vm1165_vm6, %vm1166_vm7  ;;  %v1137_v27 = vadd.f32 %v1136_v50, %v1108_v11  ;;  %v1139_v60 = vadd.f32 %v1138_v47, %v1110_v53 }
  0xf2   :  { %v1168_v41 = vsel %vm1167_vm8, %v1160_v61, 0.0 }
  0xf3   :  { %1174 = vst [vmem:[#allocation7 + $0x10] sm:$0xff] %v1168_v41  ;;  %v1161_v13 = vmul.f32 %v2860_v29, %v1137_v27  ;;  %v1162_v8 = vmul.f32 %v1156_v36, %v1139_v60 }
  0xf5   :  { %v1163_v12 = vadd.f32 %v1162_v8, %v1161_v13 }
  0xf7   :  { %v1164_v1 = vadd.f32 %v1163_v12, %v2855_v56 }
  0xf9   :  { %vm1169_vm9 = vcmp.ge.f32.partialorder %v1164_v1, 0.0  ;;  %vm1170_vm10 = vcmp.le.f32.partialorder %v1164_v1, 31.0 }
  0xfa   :  { %vm1171_vm11 = vmand %vm1169_vm9, %vm1170_vm10 }
  0xfb   :  { %v1172_v0 = vsel %vm1171_vm11, %v1164_v1, 0.0 }
  0xfc   :  { %1176 = vst [vmem:[#allocation7 + $0x18] sm:$0xff] %v1172_v0 }
  0xfd   :  { %1197 = dma.vmem_to_hbm [thread:$0]  %s1190_s1, 512, %s1192_s3, [#allocation3], %s1574_s25, %s1574_s25, %s1575_s26  }
  0xfe   :  { %1565 = dma.done.wait [#allocation3], 512  }
  0xff   :  { %1566 = vsyncadd [#allocation3], 4294966784 }
 0x100   :  { %1567 = dma.done.wait [#allocation9], 3072  }
 0x101   :  { %1568 = vsyncadd [#allocation9], 4294964224 }
 0x102   :  { %1569 = dma.done.wait [#allocation12], 8192  }
 0x103   :  { %1570 = vsyncadd [#allocation12], 4294959104 }
 0x104   :  { %1270 = vsyncpa [#allocation3], 1 }
 0x105   :  { %1271 = vsyncpa [#allocation9], 1 }
 0x106   :  { %1272 = vsyncpa [#allocation12], 1 }
 0x107   :  { %1273 = vsyncpa [#allocation4], 1 }
 0x108   :  { %1274 = vsyncpa [#allocation6], 1 }

</bundles_post_ra>
